<compile_context>
chip_gen: v6e
topology: v6e:2x2x1
jax: 0.10.0
libtpu: 0.0.40
codegen_flags: <defaults>
</compile_context>

<pallas_src>
import functools

import jax
import jax.numpy as jnp
from jax.experimental import pallas as pl
from jax.experimental.pallas import tpu as pltpu

EPS = 1e-5  # nn.LayerNorm default eps


def transformer_block_kernel(v_ref, k_ref, q_ref,
                             wv_ref, wk_ref, wq_ref, wo_ref,
                             w1_ref, b1_ref, w2_ref, b2_ref,
                             g1_ref, be1_ref, g2_ref, be2_ref,
                             o_ref,
                             kh_scr, vh_scr,
                             *, heads, tk):
    """One (batch, q-tile) slab per grid step. All refs are VMEM tiles."""
    S = v_ref.shape[1]            # full key/value length
    Tq = q_ref.shape[1]           # query tile length
    E = q_ref.shape[2]
    D = E // heads
    n_kb = S // tk

    # --- project K/V once per batch element (first q-tile only) and cache the
    #     head-major bf16 result in VMEM scratch; reused by every q-tile.
    @pl.when(pl.program_id(1) == 0)
    def _project_kv():
        v = jnp.dot(v_ref[0], wv_ref[...], preferred_element_type=jnp.float32)  # (S, E)
        k = jnp.dot(k_ref[0], wk_ref[...], preferred_element_type=jnp.float32)  # (S, E)
        kh_scr[...] = jnp.transpose(k.reshape(S, heads, D), (1, 0, 2)).astype(jnp.bfloat16)
        vh_scr[...] = jnp.transpose(v.reshape(S, heads, D), (1, 0, 2)).astype(jnp.bfloat16)

    q_in = q_ref[0]                                                    # (Tq, E) f32 residual
    q = jnp.dot(q_in.astype(jnp.bfloat16), wq_ref[...],
                preferred_element_type=jnp.float32)                    # (Tq, E)
    # fold the 1/sqrt(E) softmax scale into q once (hoisted out of attention)
    q = q * (1.0 / jnp.sqrt(jnp.float32(E)))
    qh = jnp.transpose(q.reshape(Tq, heads, D), (1, 0, 2)).astype(jnp.bfloat16)  # (H, Tq, D)

    # --- flash-style online softmax over key blocks (temp bounded to (H,Tq,tk))
    m = jnp.full((heads, Tq, 1), -jnp.inf, jnp.float32)
    l = jnp.zeros((heads, Tq, 1), jnp.float32)
    acc = jnp.zeros((heads, Tq, D), jnp.float32)
    for kb in range(n_kb):  # static trip count; static slices of scratch are free views
        # TODO(synk): for very long S use lax.fori_loop + pl.ds to bound code size.
        k_blk = kh_scr[:, kb * tk:(kb + 1) * tk, :]                    # (H, tk, D) bf16
        v_blk = vh_scr[:, kb * tk:(kb + 1) * tk, :]
        e = jnp.einsum('hqd,hkd->hqk', qh, k_blk,
                       preferred_element_type=jnp.float32)             # (H, Tq, tk)
        m_new = jnp.maximum(m, jnp.max(e, axis=-1, keepdims=True))
        a = jnp.exp(m - m_new)
        p = jnp.exp(e - m_new)          # f32 exp; TODO(synk): bf16 exp on v6e/v7x
        l = a * l + jnp.sum(p, axis=-1, keepdims=True)
        acc = a * acc + jnp.einsum('hqk,hkd->hqd', p.astype(jnp.bfloat16), v_blk,
                                   preferred_element_type=jnp.float32)
        m = m_new

    ctx = acc * pl.reciprocal(l, approx=True)                          # (H, Tq, D)
    ctx = jnp.transpose(ctx, (1, 0, 2)).reshape(Tq, E)                 # torch head-concat layout
    attn_out = jnp.dot(ctx.astype(jnp.bfloat16), wo_ref[...],
                       preferred_element_type=jnp.float32)             # (Tq, E)

    # --- residual + LayerNorm 1 (dropout == identity), f32 math
    x = attn_out + q_in
    mu = jnp.mean(x, axis=-1, keepdims=True)
    var = jnp.mean((x - mu) ** 2, axis=-1, keepdims=True)
    x = (x - mu) * jax.lax.rsqrt(var + EPS) * g1_ref[...] + be1_ref[...]

    # --- feed-forward: Linear -> ReLU -> Linear (bf16 matmuls, f32 bias/acc)
    h = jnp.dot(x.astype(jnp.bfloat16), w1_ref[...],
                preferred_element_type=jnp.float32) + b1_ref[...]
    h = jnp.maximum(h, 0.0)
    y = jnp.dot(h.astype(jnp.bfloat16), w2_ref[...],
                preferred_element_type=jnp.float32) + b2_ref[...]

    # --- residual + LayerNorm 2 (dropout == identity)
    z = x + y
    mu2 = jnp.mean(z, axis=-1, keepdims=True)
    var2 = jnp.mean((z - mu2) ** 2, axis=-1, keepdims=True)
    o_ref[0] = (z - mu2) * jax.lax.rsqrt(var2 + EPS) * g2_ref[...] + be2_ref[...]


def _vmem_budget_bytes():
    """Generation-aware scoped-VMEM limit (leave headroom for compiler internals)."""
    try:
        cap = int(pltpu.get_tpu_info().vmem_capacity_bytes)
    except Exception:
        cap = 64 * 1024 * 1024
    return int(cap * 0.85)


def _choose_tiles(S, E, Ex, heads, vmem_budget):
    """VMEM-aware (tq, tk): budget inputs, weights, scratch and softmax temps."""
    D = E // heads
    cands = [c for c in (1024, 512, 256, 128, 64, 32, 16, 8) if S % c == 0] or [S]
    tk = next((c for c in cands if c <= 512), cands[-1])   # key-block size

    def vmem_bytes(tq):
        b = 0
        b += 2 * 2 * S * E * 2                    # K/V bf16 inputs, double-buffered
        b += 2 * 2 * tq * E * 4                   # query in + output f32, double-buffered
        b += 2 * (4 * E * E + 2 * E * Ex) * 2     # weights bf16 (conservative x2 buffers)
        b += 2 * heads * S * D * 2                # head-major K/V scratch, bf16
        b += 3 * heads * tq * tk * 4              # energy / p live temporaries, f32
        b += 2 * heads * tq * D * 4               # acc / ctx, f32
        b += (tq * Ex + 4 * tq * E) * 4           # FFN hidden + x/y/residual temps, f32
        return b

    for tq in cands:
        if vmem_bytes(tq) <= vmem_budget:
            return tq, tk
    return cands[-1], tk


def _as_bf16(w):
    return w if w.dtype == jnp.bfloat16 else w.astype(jnp.bfloat16)


def prepare_params(params):
    """Cast matmul weights to bf16 once (call this once, not per forward)."""
    out = dict(params)
    for name in ("wv", "wk", "wq", "wo", "w1", "w2"):
        out[name] = _as_bf16(params[name])
    return out


def transformer_block(value, key, query, params, *, heads):
    N, S, E = query.shape
    Ex = params["w1"].shape[1]
    assert (E // heads) * heads == E

    budget = _vmem_budget_bytes()
    tq, tk = _choose_tiles(S, E, Ex, heads, budget)
    n_qt = S // tq

    # bf16 K/V inputs: halve streamed DMA bytes and VMEM residency.
    v_bf = value.astype(jnp.bfloat16)
    k_bf = key.astype(jnp.bfloat16)

    wv, wk, wq, wo = (_as_bf16(params[n]) for n in ("wv", "wk", "wq", "wo"))
    w1, w2 = _as_bf16(params["w1"]), _as_bf16(params["w2"])

    kernel = functools.partial(transformer_block_kernel, heads=heads, tk=tk)

    kv_spec = pl.BlockSpec((1, S, E), lambda n, t: (n, 0, 0))     # full K/V rows per batch
    q_spec = pl.BlockSpec((1, tq, E), lambda n, t: (n, t, 0))     # query tile
    out_spec = pl.BlockSpec((1, tq, E), lambda n, t: (n, t, 0))

    cost = pl.CostEstimate(
        flops=int(2 * N * S * (4 * E * E + 2 * S * E + 2 * E * Ex)),
        transcendentals=int(N * heads * S * S),
        bytes_accessed=int(2 * N * S * E * 2 + 2 * N * S * E * 4
                           + (4 * E * E + 2 * E * Ex) * 2 + (Ex + 5 * E) * 4))

    def _call(single_buffer_weights):
        def const_spec(shape):
            if single_buffer_weights:
                # constant index_map -> no re-DMA; single buffer halves weight VMEM.
                return pl.BlockSpec(shape, lambda n, t: (0, 0),
                                    pipeline_mode=pl.Buffered(1))
            return pl.BlockSpec(shape, lambda n, t: (0, 0))

        in_specs = [
            kv_spec, kv_spec, q_spec,                         # value, key, query
            const_spec((E, E)), const_spec((E, E)),           # Wv, Wk
            const_spec((E, E)), const_spec((E, E)),           # Wq, Wo
            const_spec((E, Ex)), const_spec((1, Ex)),         # W1, b1
            const_spec((Ex, E)), const_spec((1, E)),          # W2, b2
            const_spec((1, E)), const_spec((1, E)),           # gamma1, beta1
            const_spec((1, E)), const_spec((1, E)),           # gamma2, beta2
        ]

        return pl.pallas_call(
            kernel,
            out_shape=jax.ShapeDtypeStruct((N, S, E), jnp.float32),
            grid=(N, n_qt),
            in_specs=in_specs,
            out_specs=out_spec,
            scratch_shapes=[
                pltpu.VMEM((heads, S, E // heads), jnp.bfloat16),  # cached projected K
                pltpu.VMEM((heads, S, E // heads), jnp.bfloat16),  # cached projected V
            ],
            compiler_params=pltpu.CompilerParams(
                dimension_semantics=("parallel", "arbitrary"),
                vmem_limit_bytes=budget),
            cost_estimate=cost,
        )(v_bf, k_bf, query,
          wv, wk, wq, wo,
          w1, params["b1"], w2, params["b2"],
          params["g1"], params["be1"], params["g2"], params["be2"])

    try:
        return _call(True)
    except Exception:
        # Fallback if single-buffered (pl.Buffered(1)) weight specs are rejected.
        return _call(False)


def reference_block(value, key, query, params, *, heads):
    """Pure-JAX f32 reference mirroring the PyTorch forward (eval mode)."""
    N, S, E = query.shape
    D = E // heads
    v = value @ params["wv"]
    k = key @ params["wk"]
    q = query @ params["wq"]
    v = v.reshape(N, S, heads, D)
    k = k.reshape(N, S, heads, D)
    q = q.reshape(N, S, heads, D)
    energy = jnp.einsum("nqhd,nkhd->nhqk", q, k)
    attn = jax.nn.softmax(energy / jnp.sqrt(jnp.float32(E)), axis=3)
    ctx = jnp.einsum("nhql,nlhd->nqhd", attn, v).reshape(N, S, E)
    attn_out = ctx @ params["wo"]

    def ln(x, g, b):
        mu = jnp.mean(x, axis=-1, keepdims=True)
        var = jnp.mean((x - mu) ** 2, axis=-1, keepdims=True)
        return (x - mu) / jnp.sqrt(var + EPS) * g + b

    x = ln(attn_out + query, params["g1"], params["be1"])
    y = jnp.maximum(x @ params["w1"] + params["b1"], 0.0) @ params["w2"] + params["b2"]
    return ln(x + y, params["g2"], params["be2"])


def init_params(rng, embedding_size, expansion_rate):
    E, Ex = embedding_size, embedding_size * expansion_rate
    keys = jax.random.split(rng, 8)
    s = 0.1
    return {
        "wv": jax.random.normal(keys[0], (E, E), jnp.float32) * s,
        "wk": jax.random.normal(keys[1], (E, E), jnp.float32) * s,
        "wq": jax.random.normal(keys[2], (E, E), jnp.float32) * s,
        "wo": jax.random.normal(keys[3], (E, E), jnp.float32) * s,
        "w1": jax.random.normal(keys[4], (E, Ex), jnp.float32) * s,
        "b1": jax.random.normal(keys[5], (1, Ex), jnp.float32) * s,
        "w2": jax.random.normal(keys[6], (Ex, E), jnp.float32) * s,
        "b2": jax.random.normal(keys[7], (1, E), jnp.float32) * s,
        "g1": jnp.ones((1, E), jnp.float32),
        "be1": jnp.zeros((1, E), jnp.float32),
        "g2": jnp.ones((1, E), jnp.float32),
        "be2": jnp.zeros((1, E), jnp.float32),
    }


if __name__ == "__main__":
    N, S, E, heads, expansion = 2, 8, 32, 4, 4

    root = jax.random.PRNGKey(0)
    kp, kv_, kk_, kq_ = jax.random.split(root, 4)
    params = init_params(kp, E, expansion)
    prepared = prepare_params(params)   # bf16 weights cast once, outside the forward

    value = jax.random.normal(kv_, (N, S, E), jnp.float32)
    key = jax.random.normal(kk_, (N, S, E), jnp.float32)
    query = jax.random.normal(kq_, (N, S, E), jnp.float32)

    out = transformer_block(value, key, query, prepared, heads=heads)
    out = jax.block_until_ready(out)

    ref = reference_block(value, key, query, params, heads=heads)
    assert out.shape == (N, S, E)
    # bf16 MXU operands vs. pure-f32 reference -> loosened tolerance (expected).
    assert jnp.allclose(out, ref, atol=7.5e-2, rtol=7.5e-2), "mismatch vs reference"

    print("KERNEL_OK")
</pallas_src>

<mosaic_0001>
module attributes {stable_mosaic.version = 11 : i64} {
  func.func @transformer_block_kernel(%arg0: i32, %arg1: i32, %arg2: memref<1x8x32xbf16, #tpu.memory_space<vmem>>, %arg3: memref<1x8x32xbf16, #tpu.memory_space<vmem>>, %arg4: memref<1x8x32xf32, #tpu.memory_space<vmem>>, %arg5: memref<32x32xbf16, #tpu.memory_space<vmem>>, %arg6: memref<32x32xbf16, #tpu.memory_space<vmem>>, %arg7: memref<32x32xbf16, #tpu.memory_space<vmem>>, %arg8: memref<32x32xbf16, #tpu.memory_space<vmem>>, %arg9: memref<32x128xbf16, #tpu.memory_space<vmem>>, %arg10: memref<1x128xf32, #tpu.memory_space<vmem>>, %arg11: memref<128x32xbf16, #tpu.memory_space<vmem>>, %arg12: memref<1x32xf32, #tpu.memory_space<vmem>>, %arg13: memref<1x32xf32, #tpu.memory_space<vmem>>, %arg14: memref<1x32xf32, #tpu.memory_space<vmem>>, %arg15: memref<1x32xf32, #tpu.memory_space<vmem>>, %arg16: memref<1x32xf32, #tpu.memory_space<vmem>>, %arg17: memref<1x8x32xf32, #tpu.memory_space<vmem>>, %arg18: memref<4x8x8xbf16, #tpu.memory_space<vmem>>, %arg19: memref<4x8x8xbf16, #tpu.memory_space<vmem>>) attributes {dimension_semantics = [#tpu.dimension_semantics<parallel>, #tpu.dimension_semantics<arbitrary>], iteration_bounds = array<i64: 2, 1>, scalar_prefetch = 0 : i64, scratch_operands = 2 : i64, tpu.core_type = #tpu.core_type<tc>, window_params = [{transform_indices = @transform_0, window_bounds = array<i64: 1, 8, 32>}, {transform_indices = @transform_1, window_bounds = array<i64: 1, 8, 32>}, {transform_indices = @transform_2, window_bounds = array<i64: 1, 8, 32>}, {pipeline_mode = #tpu.pipeline_mode<synchronous>, transform_indices = @transform_3, window_bounds = array<i64: 32, 32>}, {pipeline_mode = #tpu.pipeline_mode<synchronous>, transform_indices = @transform_4, window_bounds = array<i64: 32, 32>}, {pipeline_mode = #tpu.pipeline_mode<synchronous>, transform_indices = @transform_5, window_bounds = array<i64: 32, 32>}, {pipeline_mode = #tpu.pipeline_mode<synchronous>, transform_indices = @transform_6, window_bounds = array<i64: 32, 32>}, {pipeline_mode = #tpu.pipeline_mode<synchronous>, transform_indices = @transform_7, window_bounds = array<i64: 32, 128>}, {pipeline_mode = #tpu.pipeline_mode<synchronous>, transform_indices = @transform_8, window_bounds = array<i64: 1, 128>}, {pipeline_mode = #tpu.pipeline_mode<synchronous>, transform_indices = @transform_9, window_bounds = array<i64: 128, 32>}, {pipeline_mode = #tpu.pipeline_mode<synchronous>, transform_indices = @transform_10, window_bounds = array<i64: 1, 32>}, {pipeline_mode = #tpu.pipeline_mode<synchronous>, transform_indices = @transform_11, window_bounds = array<i64: 1, 32>}, {pipeline_mode = #tpu.pipeline_mode<synchronous>, transform_indices = @transform_12, window_bounds = array<i64: 1, 32>}, {pipeline_mode = #tpu.pipeline_mode<synchronous>, transform_indices = @transform_13, window_bounds = array<i64: 1, 32>}, {pipeline_mode = #tpu.pipeline_mode<synchronous>, transform_indices = @transform_14, window_bounds = array<i64: 1, 32>}, {transform_indices = @transform_15, window_bounds = array<i64: 1, 8, 32>}]} {
    %c0_i32 = arith.constant 0 : i32
    %0 = arith.cmpi eq, %arg1, %c0_i32 : i32
    %1 = arith.extui %0 : i1 to i32
    %c0_i32_0 = arith.constant 0 : i32
    %2 = arith.cmpi ne, %1, %c0_i32_0 : i32
    scf.if %2 {
      %c0_55 = arith.constant 0 : index
      %c0_56 = arith.constant 0 : index
      %c0_57 = arith.constant 0 : index
      %113 = vector.load %arg2[%c0_55, %c0_56, %c0_57] : memref<1x8x32xbf16, #tpu.memory_space<vmem>>, vector<1x8x32xbf16>
      %114 = vector.shape_cast %113 : vector<1x8x32xbf16> to vector<8x32xbf16>
      %c0_58 = arith.constant 0 : index
      %c0_59 = arith.constant 0 : index
      %115 = vector.load %arg5[%c0_58, %c0_59] : memref<32x32xbf16, #tpu.memory_space<vmem>>, vector<32x32xbf16>
      %cst_60 = arith.constant dense<0.000000e+00> : vector<8x32xf32>
      %116 = tpu.matmul %114, %115, %cst_60 {dimension_numbers = #tpu.dot_dimension_numbers<[1], [0], [0], [1], [0, 0, 1, 1], [], []>} : vector<8x32xbf16>, vector<32x32xbf16>, vector<8x32xf32> -> vector<8x32xf32>
      %c0_61 = arith.constant 0 : index
      %c0_62 = arith.constant 0 : index
      %c0_63 = arith.constant 0 : index
      %117 = vector.load %arg3[%c0_61, %c0_62, %c0_63] : memref<1x8x32xbf16, #tpu.memory_space<vmem>>, vector<1x8x32xbf16>
      %118 = vector.shape_cast %117 : vector<1x8x32xbf16> to vector<8x32xbf16>
      %c0_64 = arith.constant 0 : index
      %c0_65 = arith.constant 0 : index
      %119 = vector.load %arg6[%c0_64, %c0_65] : memref<32x32xbf16, #tpu.memory_space<vmem>>, vector<32x32xbf16>
      %cst_66 = arith.constant dense<0.000000e+00> : vector<8x32xf32>
      %120 = tpu.matmul %118, %119, %cst_66 {dimension_numbers = #tpu.dot_dimension_numbers<[1], [0], [0], [1], [0, 0, 1, 1], [], []>} : vector<8x32xbf16>, vector<32x32xbf16>, vector<8x32xf32> -> vector<8x32xf32>
      %121 = vector.shape_cast %120 : vector<8x32xf32> to vector<8x4x8xf32>
      %122 = tpu.transpose %121, [1, 0, 2] : vector<8x4x8xf32> -> vector<4x8x8xf32>
      %123 = arith.truncf %122 : vector<4x8x8xf32> to vector<4x8x8xbf16>
      %c0_67 = arith.constant 0 : index
      %c0_68 = arith.constant 0 : index
      %c0_69 = arith.constant 0 : index
      %124 = vector.load %arg18[%c0_67, %c0_68, %c0_69] : memref<4x8x8xbf16, #tpu.memory_space<vmem>>, vector<4x8x8xbf16>
      tpu.vector_store %arg18[%c0_67, %c0_68, %c0_69], %123 {strides = array<i32>} : memref<4x8x8xbf16, #tpu.memory_space<vmem>>, vector<4x8x8xbf16>,
      %125 = vector.shape_cast %116 : vector<8x32xf32> to vector<8x4x8xf32>
      %126 = tpu.transpose %125, [1, 0, 2] : vector<8x4x8xf32> -> vector<4x8x8xf32>
      %127 = arith.truncf %126 : vector<4x8x8xf32> to vector<4x8x8xbf16>
      %c0_70 = arith.constant 0 : index
      %c0_71 = arith.constant 0 : index
      %c0_72 = arith.constant 0 : index
      %128 = vector.load %arg19[%c0_70, %c0_71, %c0_72] : memref<4x8x8xbf16, #tpu.memory_space<vmem>>, vector<4x8x8xbf16>
      tpu.vector_store %arg19[%c0_70, %c0_71, %c0_72], %127 {strides = array<i32>} : memref<4x8x8xbf16, #tpu.memory_space<vmem>>, vector<4x8x8xbf16>,
    } else {
    }
    %c0 = arith.constant 0 : index
    %c0_1 = arith.constant 0 : index
    %c0_2 = arith.constant 0 : index
    %3 = vector.load %arg4[%c0, %c0_1, %c0_2] : memref<1x8x32xf32, #tpu.memory_space<vmem>>, vector<1x8x32xf32>
    %4 = vector.shape_cast %3 : vector<1x8x32xf32> to vector<8x32xf32>
    %5 = arith.truncf %4 : vector<8x32xf32> to vector<8x32xbf16>
    %c0_3 = arith.constant 0 : index
    %c0_4 = arith.constant 0 : index
    %6 = vector.load %arg7[%c0_3, %c0_4] : memref<32x32xbf16, #tpu.memory_space<vmem>>, vector<32x32xbf16>
    %cst = arith.constant dense<0.000000e+00> : vector<8x32xf32>
    %7 = tpu.matmul %5, %6, %cst {dimension_numbers = #tpu.dot_dimension_numbers<[1], [0], [0], [1], [0, 0, 1, 1], [], []>} : vector<8x32xbf16>, vector<32x32xbf16>, vector<8x32xf32> -> vector<8x32xf32>
    %cst_5 = arith.constant 3.200000e+01 : f32
    %8 = math.sqrt %cst_5 : f32
    %cst_6 = arith.constant 1.000000e+00 : f32
    %9 = arith.divf %cst_6, %8 : f32
    %10 = vector.broadcast %9 : f32 to vector<8x32xf32>
    %11 = arith.mulf %7, %10 : vector<8x32xf32>
    %12 = vector.shape_cast %11 : vector<8x32xf32> to vector<8x4x8xf32>
    %13 = tpu.transpose %12, [1, 0, 2] : vector<8x4x8xf32> -> vector<4x8x8xf32>
    %14 = arith.truncf %13 : vector<4x8x8xf32> to vector<4x8x8xbf16>
    %cst_7 = arith.constant 0xFF800000 : f32
    %15 = vector.broadcast %cst_7 : f32 to vector<4x8x1xf32>
    %cst_8 = arith.constant 0.000000e+00 : f32
    %16 = vector.broadcast %cst_8 : f32 to vector<4x8x1xf32>
    %cst_9 = arith.constant 0.000000e+00 : f32
    %17 = vector.broadcast %cst_9 : f32 to vector<4x8x8xf32>
    %c0_10 = arith.constant 0 : index
    %c0_11 = arith.constant 0 : index
    %c0_12 = arith.constant 0 : index
    %18 = vector.load %arg18[%c0_10, %c0_11, %c0_12] : memref<4x8x8xbf16, #tpu.memory_space<vmem>>, vector<4x8x8xbf16>
    %c0_13 = arith.constant 0 : index
    %c0_14 = arith.constant 0 : index
    %c0_15 = arith.constant 0 : index
    %19 = vector.load %arg19[%c0_13, %c0_14, %c0_15] : memref<4x8x8xbf16, #tpu.memory_space<vmem>>, vector<4x8x8xbf16>
    "tpu.trace_start"() <{level = 10 : i32, message = "hqd,hkd->hqk"}> : () -> ()
    %cst_16 = arith.constant dense<0.000000e+00> : vector<4x8x8xf32>
    %20 = tpu.matmul %14, %18, %cst_16 {dimension_numbers = #tpu.dot_dimension_numbers<[2], [2], [1], [1], [0, 0, 0, 1, 1, 1], [0], [0]>} : vector<4x8x8xbf16>, vector<4x8x8xbf16>, vector<4x8x8xf32> -> vector<4x8x8xf32>
    "tpu.trace_stop"() : () -> ()
    %cst_17 = arith.constant dense<0xFF800000> : vector<4x8xf32>
    %21 = vector.multi_reduction <maximumf>, %20, %cst_17 [2] : vector<4x8x8xf32> to vector<4x8xf32>
    %22 = vector.shape_cast %21 : vector<4x8xf32> to vector<4x8x1xf32>
    %23 = arith.maximumf %15, %22 : vector<4x8x1xf32>
    %24 = arith.subf %15, %23 : vector<4x8x1xf32>
    %25 = math.exp %24 : vector<4x8x1xf32>
    %26 = vector.broadcast %23 : vector<4x8x1xf32> to vector<4x8x8xf32>
    %27 = arith.subf %20, %26 : vector<4x8x8xf32>
    %28 = math.exp %27 : vector<4x8x8xf32>
    %29 = arith.mulf %25, %16 : vector<4x8x1xf32>
    %cst_18 = arith.constant dense<0.000000e+00> : vector<4x8xf32>
    %30 = vector.multi_reduction <add>, %28, %cst_18 [2] : vector<4x8x8xf32> to vector<4x8xf32>
    %31 = vector.shape_cast %30 : vector<4x8xf32> to vector<4x8x1xf32>
    %32 = arith.addf %29, %31 : vector<4x8x1xf32>
    %33 = vector.broadcast %25 : vector<4x8x1xf32> to vector<4x8x8xf32>
    %34 = arith.mulf %33, %17 : vector<4x8x8xf32>
    %35 = arith.truncf %28 : vector<4x8x8xf32> to vector<4x8x8xbf16>
    "tpu.trace_start"() <{level = 10 : i32, message = "hqk,hkd->hqd"}> : () -> ()
    %cst_19 = arith.constant dense<0.000000e+00> : vector<4x8x8xf32>
    %36 = tpu.matmul %35, %19, %cst_19 {dimension_numbers = #tpu.dot_dimension_numbers<[2], [1], [1], [2], [0, 0, 0, 1, 1, 2], [0], [0]>} : vector<4x8x8xbf16>, vector<4x8x8xbf16>, vector<4x8x8xf32> -> vector<4x8x8xf32>
    "tpu.trace_stop"() : () -> ()
    %37 = arith.addf %34, %36 : vector<4x8x8xf32>
    %38 = tpu.reciprocal %32 {approx = true} : vector<4x8x1xf32> -> vector<4x8x1xf32>
    %39 = vector.broadcast %38 : vector<4x8x1xf32> to vector<4x8x8xf32>
    %40 = arith.mulf %37, %39 : vector<4x8x8xf32>
    %41 = tpu.transpose %40, [1, 0, 2] : vector<4x8x8xf32> -> vector<8x4x8xf32>
    %42 = vector.shape_cast %41 : vector<8x4x8xf32> to vector<8x32xf32>
    %43 = arith.truncf %42 : vector<8x32xf32> to vector<8x32xbf16>
    %c0_20 = arith.constant 0 : index
    %c0_21 = arith.constant 0 : index
    %44 = vector.load %arg8[%c0_20, %c0_21] : memref<32x32xbf16, #tpu.memory_space<vmem>>, vector<32x32xbf16>
    %cst_22 = arith.constant dense<0.000000e+00> : vector<8x32xf32>
    %45 = tpu.matmul %43, %44, %cst_22 {dimension_numbers = #tpu.dot_dimension_numbers<[1], [0], [0], [1], [0, 0, 1, 1], [], []>} : vector<8x32xbf16>, vector<32x32xbf16>, vector<8x32xf32> -> vector<8x32xf32>
    %46 = arith.addf %45, %4 : vector<8x32xf32>
    %cst_23 = arith.constant dense<0.000000e+00> : vector<8xf32>
    %47 = vector.multi_reduction <add>, %46, %cst_23 [1] : vector<8x32xf32> to vector<8xf32>
    %48 = vector.shape_cast %47 : vector<8xf32> to vector<8x1xf32>
    %cst_24 = arith.constant 3.200000e+01 : f32
    %49 = vector.broadcast %cst_24 : f32 to vector<8x1xf32>
    %50 = arith.divf %48, %49 : vector<8x1xf32>
    %51 = vector.broadcast %50 : vector<8x1xf32> to vector<8x32xf32>
    %52 = arith.subf %46, %51 : vector<8x32xf32>
    %53 = arith.mulf %52, %52 : vector<8x32xf32>
    %cst_25 = arith.constant dense<0.000000e+00> : vector<8xf32>
    %54 = vector.multi_reduction <add>, %53, %cst_25 [1] : vector<8x32xf32> to vector<8xf32>
    %55 = vector.shape_cast %54 : vector<8xf32> to vector<8x1xf32>
    %cst_26 = arith.constant 3.200000e+01 : f32
    %56 = vector.broadcast %cst_26 : f32 to vector<8x1xf32>
    %57 = arith.divf %55, %56 : vector<8x1xf32>
    %58 = vector.broadcast %50 : vector<8x1xf32> to vector<8x32xf32>
    %59 = arith.subf %46, %58 : vector<8x32xf32>
    %cst_27 = arith.constant 9.99999974E-6 : f32
    %60 = vector.broadcast %cst_27 : f32 to vector<8x1xf32>
    %61 = arith.addf %57, %60 : vector<8x1xf32>
    %62 = math.rsqrt %61 : vector<8x1xf32>
    %63 = vector.broadcast %62 : vector<8x1xf32> to vector<8x32xf32>
    %64 = arith.mulf %59, %63 : vector<8x32xf32>
    %c0_28 = arith.constant 0 : index
    %c0_29 = arith.constant 0 : index
    %65 = vector.load %arg13[%c0_28, %c0_29] : memref<1x32xf32, #tpu.memory_space<vmem>>, vector<1x32xf32>
    %66 = vector.broadcast %65 : vector<1x32xf32> to vector<8x32xf32>
    %67 = arith.mulf %64, %66 : vector<8x32xf32>
    %c0_30 = arith.constant 0 : index
    %c0_31 = arith.constant 0 : index
    %68 = vector.load %arg14[%c0_30, %c0_31] : memref<1x32xf32, #tpu.memory_space<vmem>>, vector<1x32xf32>
    %69 = vector.broadcast %68 : vector<1x32xf32> to vector<8x32xf32>
    %70 = arith.addf %67, %69 : vector<8x32xf32>
    %71 = arith.truncf %70 : vector<8x32xf32> to vector<8x32xbf16>
    %c0_32 = arith.constant 0 : index
    %c0_33 = arith.constant 0 : index
    %72 = vector.load %arg9[%c0_32, %c0_33] : memref<32x128xbf16, #tpu.memory_space<vmem>>, vector<32x128xbf16>
    %cst_34 = arith.constant dense<0.000000e+00> : vector<8x128xf32>
    %73 = tpu.matmul %71, %72, %cst_34 {dimension_numbers = #tpu.dot_dimension_numbers<[1], [0], [0], [1], [0, 0, 1, 1], [], []>} : vector<8x32xbf16>, vector<32x128xbf16>, vector<8x128xf32> -> vector<8x128xf32>
    %c0_35 = arith.constant 0 : index
    %c0_36 = arith.constant 0 : index
    %74 = vector.load %arg10[%c0_35, %c0_36] : memref<1x128xf32, #tpu.memory_space<vmem>>, vector<1x128xf32>
    %75 = vector.broadcast %74 : vector<1x128xf32> to vector<8x128xf32>
    %76 = arith.addf %73, %75 : vector<8x128xf32>
    %cst_37 = arith.constant 0.000000e+00 : f32
    %77 = vector.broadcast %cst_37 : f32 to vector<8x128xf32>
    %78 = arith.maximumf %76, %77 : vector<8x128xf32>
    %79 = arith.truncf %78 : vector<8x128xf32> to vector<8x128xbf16>
    %c0_38 = arith.constant 0 : index
    %c0_39 = arith.constant 0 : index
    %80 = vector.load %arg11[%c0_38, %c0_39] : memref<128x32xbf16, #tpu.memory_space<vmem>>, vector<128x32xbf16>
    %cst_40 = arith.constant dense<0.000000e+00> : vector<8x32xf32>
    %81 = tpu.matmul %79, %80, %cst_40 {dimension_numbers = #tpu.dot_dimension_numbers<[1], [0], [0], [1], [0, 0, 1, 1], [], []>} : vector<8x128xbf16>, vector<128x32xbf16>, vector<8x32xf32> -> vector<8x32xf32>
    %c0_41 = arith.constant 0 : index
    %c0_42 = arith.constant 0 : index
    %82 = vector.load %arg12[%c0_41, %c0_42] : memref<1x32xf32, #tpu.memory_space<vmem>>, vector<1x32xf32>
    %83 = vector.broadcast %82 : vector<1x32xf32> to vector<8x32xf32>
    %84 = arith.addf %81, %83 : vector<8x32xf32>
    %85 = arith.addf %70, %84 : vector<8x32xf32>
    %cst_43 = arith.constant dense<0.000000e+00> : vector<8xf32>
    %86 = vector.multi_reduction <add>, %85, %cst_43 [1] : vector<8x32xf32> to vector<8xf32>
    %87 = vector.shape_cast %86 : vector<8xf32> to vector<8x1xf32>
    %cst_44 = arith.constant 3.200000e+01 : f32
    %88 = vector.broadcast %cst_44 : f32 to vector<8x1xf32>
    %89 = arith.divf %87, %88 : vector<8x1xf32>
    %90 = vector.broadcast %89 : vector<8x1xf32> to vector<8x32xf32>
    %91 = arith.subf %85, %90 : vector<8x32xf32>
    %92 = arith.mulf %91, %91 : vector<8x32xf32>
    %cst_45 = arith.constant dense<0.000000e+00> : vector<8xf32>
    %93 = vector.multi_reduction <add>, %92, %cst_45 [1] : vector<8x32xf32> to vector<8xf32>
    %94 = vector.shape_cast %93 : vector<8xf32> to vector<8x1xf32>
    %cst_46 = arith.constant 3.200000e+01 : f32
    %95 = vector.broadcast %cst_46 : f32 to vector<8x1xf32>
    %96 = arith.divf %94, %95 : vector<8x1xf32>
    %97 = vector.broadcast %89 : vector<8x1xf32> to vector<8x32xf32>
    %98 = arith.subf %85, %97 : vector<8x32xf32>
    %cst_47 = arith.constant 9.99999974E-6 : f32
    %99 = vector.broadcast %cst_47 : f32 to vector<8x1xf32>
    %100 = arith.addf %96, %99 : vector<8x1xf32>
    %101 = math.rsqrt %100 : vector<8x1xf32>
    %102 = vector.broadcast %101 : vector<8x1xf32> to vector<8x32xf32>
    %103 = arith.mulf %98, %102 : vector<8x32xf32>
    %c0_48 = arith.constant 0 : index
    %c0_49 = arith.constant 0 : index
    %104 = vector.load %arg15[%c0_48, %c0_49] : memref<1x32xf32, #tpu.memory_space<vmem>>, vector<1x32xf32>
    %105 = vector.broadcast %104 : vector<1x32xf32> to vector<8x32xf32>
    %106 = arith.mulf %103, %105 : vector<8x32xf32>
    %c0_50 = arith.constant 0 : index
    %c0_51 = arith.constant 0 : index
    %107 = vector.load %arg16[%c0_50, %c0_51] : memref<1x32xf32, #tpu.memory_space<vmem>>, vector<1x32xf32>
    %108 = vector.broadcast %107 : vector<1x32xf32> to vector<8x32xf32>
    %109 = arith.addf %106, %108 : vector<8x32xf32>
    %c0_52 = arith.constant 0 : index
    %c0_53 = arith.constant 0 : index
    %c0_54 = arith.constant 0 : index
    %110 = vector.load %arg17[%c0_52, %c0_53, %c0_54] : memref<1x8x32xf32, #tpu.memory_space<vmem>>, vector<1x8x32xf32>
    %111 = vector.shape_cast %110 : vector<1x8x32xf32> to vector<8x32xf32>
    %112 = vector.shape_cast %109 : vector<8x32xf32> to vector<1x8x32xf32>
    tpu.vector_store %arg17[%c0_52, %c0_53, %c0_54], %112 {strides = array<i32>} : memref<1x8x32xf32, #tpu.memory_space<vmem>>, vector<1x8x32xf32>,
    return
  }
  func.func @transform_0(%arg0: i32, %arg1: i32) -> (i32, i32, i32) {
    %c0_i32 = arith.constant 0 : i32
    %c0_i32_0 = arith.constant 0 : i32
    %c0_i32_1 = arith.constant 0 : i32
    return %arg0, %c0_i32, %c0_i32_0 : i32, i32, i32
  }
  func.func @transform_1(%arg0: i32, %arg1: i32) -> (i32, i32, i32) {
    %c0_i32 = arith.constant 0 : i32
    %c0_i32_0 = arith.constant 0 : i32
    %c0_i32_1 = arith.constant 0 : i32
    return %arg0, %c0_i32, %c0_i32_0 : i32, i32, i32
  }
  func.func @transform_2(%arg0: i32, %arg1: i32) -> (i32, i32, i32) {
    %c0_i32 = arith.constant 0 : i32
    %c0_i32_0 = arith.constant 0 : i32
    return %arg0, %arg1, %c0_i32 : i32, i32, i32
  }
  func.func @transform_3(%arg0: i32, %arg1: i32) -> (i32, i32) {
    %c0_i32 = arith.constant 0 : i32
    %c0_i32_0 = arith.constant 0 : i32
    %c0_i32_1 = arith.constant 0 : i32
    return %c0_i32, %c0_i32_0 : i32, i32
  }
  func.func @transform_4(%arg0: i32, %arg1: i32) -> (i32, i32) {
    %c0_i32 = arith.constant 0 : i32
    %c0_i32_0 = arith.constant 0 : i32
    %c0_i32_1 = arith.constant 0 : i32
    return %c0_i32, %c0_i32_0 : i32, i32
  }
  func.func @transform_5(%arg0: i32, %arg1: i32) -> (i32, i32) {
    %c0_i32 = arith.constant 0 : i32
    %c0_i32_0 = arith.constant 0 : i32
    %c0_i32_1 = arith.constant 0 : i32
    return %c0_i32, %c0_i32_0 : i32, i32
  }
  func.func @transform_6(%arg0: i32, %arg1: i32) -> (i32, i32) {
    %c0_i32 = arith.constant 0 : i32
    %c0_i32_0 = arith.constant 0 : i32
    %c0_i32_1 = arith.constant 0 : i32
    return %c0_i32, %c0_i32_0 : i32, i32
  }
  func.func @transform_7(%arg0: i32, %arg1: i32) -> (i32, i32) {
    %c0_i32 = arith.constant 0 : i32
    %c0_i32_0 = arith.constant 0 : i32
    %c0_i32_1 = arith.constant 0 : i32
    return %c0_i32, %c0_i32_0 : i32, i32
  }
  func.func @transform_8(%arg0: i32, %arg1: i32) -> (i32, i32) {
    %c0_i32 = arith.constant 0 : i32
    %c0_i32_0 = arith.constant 0 : i32
    %c0_i32_1 = arith.constant 0 : i32
    return %c0_i32, %c0_i32_0 : i32, i32
  }
  func.func @transform_9(%arg0: i32, %arg1: i32) -> (i32, i32) {
    %c0_i32 = arith.constant 0 : i32
    %c0_i32_0 = arith.constant 0 : i32
    %c0_i32_1 = arith.constant 0 : i32
    return %c0_i32, %c0_i32_0 : i32, i32
  }
  func.func @transform_10(%arg0: i32, %arg1: i32) -> (i32, i32) {
    %c0_i32 = arith.constant 0 : i32
    %c0_i32_0 = arith.constant 0 : i32
    %c0_i32_1 = arith.constant 0 : i32
    return %c0_i32, %c0_i32_0 : i32, i32
  }
  func.func @transform_11(%arg0: i32, %arg1: i32) -> (i32, i32) {
    %c0_i32 = arith.constant 0 : i32
    %c0_i32_0 = arith.constant 0 : i32
    %c0_i32_1 = arith.constant 0 : i32
    return %c0_i32, %c0_i32_0 : i32, i32
  }
  func.func @transform_12(%arg0: i32, %arg1: i32) -> (i32, i32) {
    %c0_i32 = arith.constant 0 : i32
    %c0_i32_0 = arith.constant 0 : i32
    %c0_i32_1 = arith.constant 0 : i32
    return %c0_i32, %c0_i32_0 : i32, i32
  }
  func.func @transform_13(%arg0: i32, %arg1: i32) -> (i32, i32) {
    %c0_i32 = arith.constant 0 : i32
    %c0_i32_0 = arith.constant 0 : i32
    %c0_i32_1 = arith.constant 0 : i32
    return %c0_i32, %c0_i32_0 : i32, i32
  }
  func.func @transform_14(%arg0: i32, %arg1: i32) -> (i32, i32) {
    %c0_i32 = arith.constant 0 : i32
    %c0_i32_0 = arith.constant 0 : i32
    %c0_i32_1 = arith.constant 0 : i32
    return %c0_i32, %c0_i32_0 : i32, i32
  }
  func.func @transform_15(%arg0: i32, %arg1: i32) -> (i32, i32, i32) {
    %c0_i32 = arith.constant 0 : i32
    %c0_i32_0 = arith.constant 0 : i32
    return %arg0, %arg1, %c0_i32 : i32, i32, i32
  }
}

module attributes {stable_mosaic.version = 11 : i64} {
  func.func @transformer_block_kernel(%arg0: i32, %arg1: i32, %arg2: memref<1x8x32xbf16, #tpu.memory_space<vmem>>, %arg3: memref<1x8x32xbf16, #tpu.memory_space<vmem>>, %arg4: memref<1x8x32xf32, #tpu.memory_space<vmem>>, %arg5: memref<32x32xbf16, #tpu.memory_space<vmem>>, %arg6: memref<32x32xbf16, #tpu.memory_space<vmem>>, %arg7: memref<32x32xbf16, #tpu.memory_space<vmem>>, %arg8: memref<32x32xbf16, #tpu.memory_space<vmem>>, %arg9: memref<32x128xbf16, #tpu.memory_space<vmem>>, %arg10: memref<1x128xf32, #tpu.memory_space<vmem>>, %arg11: memref<128x32xbf16, #tpu.memory_space<vmem>>, %arg12: memref<1x32xf32, #tpu.memory_space<vmem>>, %arg13: memref<1x32xf32, #tpu.memory_space<vmem>>, %arg14: memref<1x32xf32, #tpu.memory_space<vmem>>, %arg15: memref<1x32xf32, #tpu.memory_space<vmem>>, %arg16: memref<1x32xf32, #tpu.memory_space<vmem>>, %arg17: memref<1x8x32xf32, #tpu.memory_space<vmem>>, %arg18: memref<4x8x8xbf16, #tpu.memory_space<vmem>>, %arg19: memref<4x8x8xbf16, #tpu.memory_space<vmem>>) attributes {dimension_semantics = [#tpu.dimension_semantics<parallel>, #tpu.dimension_semantics<arbitrary>], iteration_bounds = array<i64: 2, 1>, scalar_prefetch = 0 : i64, scratch_operands = 2 : i64, tpu.core_type = #tpu.core_type<tc>, window_params = [{transform_indices = @transform_0, window_bounds = array<i64: 1, 8, 32>}, {transform_indices = @transform_1, window_bounds = array<i64: 1, 8, 32>}, {transform_indices = @transform_2, window_bounds = array<i64: 1, 8, 32>}, {pipeline_mode = #tpu.pipeline_mode<synchronous>, transform_indices = @transform_3, window_bounds = array<i64: 32, 32>}, {pipeline_mode = #tpu.pipeline_mode<synchronous>, transform_indices = @transform_4, window_bounds = array<i64: 32, 32>}, {pipeline_mode = #tpu.pipeline_mode<synchronous>, transform_indices = @transform_5, window_bounds = array<i64: 32, 32>}, {pipeline_mode = #tpu.pipeline_mode<synchronous>, transform_indices = @transform_6, window_bounds = array<i64: 32, 32>}, {pipeline_mode = #tpu.pipeline_mode<synchronous>, transform_indices = @transform_7, window_bounds = array<i64: 32, 128>}, {pipeline_mode = #tpu.pipeline_mode<synchronous>, transform_indices = @transform_8, window_bounds = array<i64: 1, 128>}, {pipeline_mode = #tpu.pipeline_mode<synchronous>, transform_indices = @transform_9, window_bounds = array<i64: 128, 32>}, {pipeline_mode = #tpu.pipeline_mode<synchronous>, transform_indices = @transform_10, window_bounds = array<i64: 1, 32>}, {pipeline_mode = #tpu.pipeline_mode<synchronous>, transform_indices = @transform_11, window_bounds = array<i64: 1, 32>}, {pipeline_mode = #tpu.pipeline_mode<synchronous>, transform_indices = @transform_12, window_bounds = array<i64: 1, 32>}, {pipeline_mode = #tpu.pipeline_mode<synchronous>, transform_indices = @transform_13, window_bounds = array<i64: 1, 32>}, {pipeline_mode = #tpu.pipeline_mode<synchronous>, transform_indices = @transform_14, window_bounds = array<i64: 1, 32>}, {transform_indices = @transform_15, window_bounds = array<i64: 1, 8, 32>}]} {
    %c0_i32 = arith.constant 0 : i32
    %0 = arith.cmpi eq, %arg1, %c0_i32 : i32
    %1 = arith.extui %0 : i1 to i32
    %c0_i32_0 = arith.constant 0 : i32
    %2 = arith.cmpi ne, %1, %c0_i32_0 : i32
    scf.if %2 {
      %c0_55 = arith.constant 0 : index
      %c0_56 = arith.constant 0 : index
      %c0_57 = arith.constant 0 : index
      %113 = vector.load %arg2[%c0_55, %c0_56, %c0_57] : memref<1x8x32xbf16, #tpu.memory_space<vmem>>, vector<1x8x32xbf16>
      %114 = vector.shape_cast %113 : vector<1x8x32xbf16> to vector<8x32xbf16>
      %c0_58 = arith.constant 0 : index
      %c0_59 = arith.constant 0 : index
      %115 = vector.load %arg5[%c0_58, %c0_59] : memref<32x32xbf16, #tpu.memory_space<vmem>>, vector<32x32xbf16>
      %cst_60 = arith.constant dense<0.000000e+00> : vector<8x32xf32>
      %116 = tpu.matmul %114, %115, %cst_60 {dimension_numbers = #tpu.dot_dimension_numbers<[1], [0], [0], [1], [0, 0, 1, 1], [], []>} : vector<8x32xbf16>, vector<32x32xbf16>, vector<8x32xf32> -> vector<8x32xf32>
      %c0_61 = arith.constant 0 : index
      %c0_62 = arith.constant 0 : index
      %c0_63 = arith.constant 0 : index
      %117 = vector.load %arg3[%c0_61, %c0_62, %c0_63] : memref<1x8x32xbf16, #tpu.memory_space<vmem>>, vector<1x8x32xbf16>
      %118 = vector.shape_cast %117 : vector<1x8x32xbf16> to vector<8x32xbf16>
      %c0_64 = arith.constant 0 : index
      %c0_65 = arith.constant 0 : index
      %119 = vector.load %arg6[%c0_64, %c0_65] : memref<32x32xbf16, #tpu.memory_space<vmem>>, vector<32x32xbf16>
      %cst_66 = arith.constant dense<0.000000e+00> : vector<8x32xf32>
      %120 = tpu.matmul %118, %119, %cst_66 {dimension_numbers = #tpu.dot_dimension_numbers<[1], [0], [0], [1], [0, 0, 1, 1], [], []>} : vector<8x32xbf16>, vector<32x32xbf16>, vector<8x32xf32> -> vector<8x32xf32>
      %121 = vector.shape_cast %120 : vector<8x32xf32> to vector<8x4x8xf32>
      %122 = tpu.transpose %121, [1, 0, 2] : vector<8x4x8xf32> -> vector<4x8x8xf32>
      %123 = arith.truncf %122 : vector<4x8x8xf32> to vector<4x8x8xbf16>
      %c0_67 = arith.constant 0 : index
      %c0_68 = arith.constant 0 : index
      %c0_69 = arith.constant 0 : index
      %124 = vector.load %arg18[%c0_67, %c0_68, %c0_69] : memref<4x8x8xbf16, #tpu.memory_space<vmem>>, vector<4x8x8xbf16>
      tpu.vector_store %arg18[%c0_67, %c0_68, %c0_69], %123 {strides = array<i32>} : memref<4x8x8xbf16, #tpu.memory_space<vmem>>, vector<4x8x8xbf16>,
      %125 = vector.shape_cast %116 : vector<8x32xf32> to vector<8x4x8xf32>
      %126 = tpu.transpose %125, [1, 0, 2] : vector<8x4x8xf32> -> vector<4x8x8xf32>
      %127 = arith.truncf %126 : vector<4x8x8xf32> to vector<4x8x8xbf16>
      %c0_70 = arith.constant 0 : index
      %c0_71 = arith.constant 0 : index
      %c0_72 = arith.constant 0 : index
      %128 = vector.load %arg19[%c0_70, %c0_71, %c0_72] : memref<4x8x8xbf16, #tpu.memory_space<vmem>>, vector<4x8x8xbf16>
      tpu.vector_store %arg19[%c0_70, %c0_71, %c0_72], %127 {strides = array<i32>} : memref<4x8x8xbf16, #tpu.memory_space<vmem>>, vector<4x8x8xbf16>,
    } else {
    }
    %c0 = arith.constant 0 : index
    %c0_1 = arith.constant 0 : index
    %c0_2 = arith.constant 0 : index
    %3 = vector.load %arg4[%c0, %c0_1, %c0_2] : memref<1x8x32xf32, #tpu.memory_space<vmem>>, vector<1x8x32xf32>
    %4 = vector.shape_cast %3 : vector<1x8x32xf32> to vector<8x32xf32>
    %5 = arith.truncf %4 : vector<8x32xf32> to vector<8x32xbf16>
    %c0_3 = arith.constant 0 : index
    %c0_4 = arith.constant 0 : index
    %6 = vector.load %arg7[%c0_3, %c0_4] : memref<32x32xbf16, #tpu.memory_space<vmem>>, vector<32x32xbf16>
    %cst = arith.constant dense<0.000000e+00> : vector<8x32xf32>
    %7 = tpu.matmul %5, %6, %cst {dimension_numbers = #tpu.dot_dimension_numbers<[1], [0], [0], [1], [0, 0, 1, 1], [], []>} : vector<8x32xbf16>, vector<32x32xbf16>, vector<8x32xf32> -> vector<8x32xf32>
    %cst_5 = arith.constant 3.200000e+01 : f32
    %8 = math.sqrt %cst_5 : f32
    %cst_6 = arith.constant 1.000000e+00 : f32
    %9 = arith.divf %cst_6, %8 : f32
    %10 = vector.broadcast %9 : f32 to vector<8x32xf32>
    %11 = arith.mulf %7, %10 : vector<8x32xf32>
    %12 = vector.shape_cast %11 : vector<8x32xf32> to vector<8x4x8xf32>
    %13 = tpu.transpose %12, [1, 0, 2] : vector<8x4x8xf32> -> vector<4x8x8xf32>
    %14 = arith.truncf %13 : vector<4x8x8xf32> to vector<4x8x8xbf16>
    %cst_7 = arith.constant 0xFF800000 : f32
    %15 = vector.broadcast %cst_7 : f32 to vector<4x8x1xf32>
    %cst_8 = arith.constant 0.000000e+00 : f32
    %16 = vector.broadcast %cst_8 : f32 to vector<4x8x1xf32>
    %cst_9 = arith.constant 0.000000e+00 : f32
    %17 = vector.broadcast %cst_9 : f32 to vector<4x8x8xf32>
    %c0_10 = arith.constant 0 : index
    %c0_11 = arith.constant 0 : index
    %c0_12 = arith.constant 0 : index
    %18 = vector.load %arg18[%c0_10, %c0_11, %c0_12] : memref<4x8x8xbf16, #tpu.memory_space<vmem>>, vector<4x8x8xbf16>
    %c0_13 = arith.constant 0 : index
    %c0_14 = arith.constant 0 : index
    %c0_15 = arith.constant 0 : index
    %19 = vector.load %arg19[%c0_13, %c0_14, %c0_15] : memref<4x8x8xbf16, #tpu.memory_space<vmem>>, vector<4x8x8xbf16>
    "tpu.trace_start"() <{level = 10 : i32, message = "hqd,hkd->hqk"}> : () -> ()
    %cst_16 = arith.constant dense<0.000000e+00> : vector<4x8x8xf32>
    %20 = tpu.matmul %14, %18, %cst_16 {dimension_numbers = #tpu.dot_dimension_numbers<[2], [2], [1], [1], [0, 0, 0, 1, 1, 1], [0], [0]>} : vector<4x8x8xbf16>, vector<4x8x8xbf16>, vector<4x8x8xf32> -> vector<4x8x8xf32>
    "tpu.trace_stop"() : () -> ()
    %cst_17 = arith.constant dense<0xFF800000> : vector<4x8xf32>
    %21 = vector.multi_reduction <maximumf>, %20, %cst_17 [2] : vector<4x8x8xf32> to vector<4x8xf32>
    %22 = vector.shape_cast %21 : vector<4x8xf32> to vector<4x8x1xf32>
    %23 = arith.maximumf %15, %22 : vector<4x8x1xf32>
    %24 = arith.subf %15, %23 : vector<4x8x1xf32>
    %25 = math.exp %24 : vector<4x8x1xf32>
    %26 = vector.broadcast %23 : vector<4x8x1xf32> to vector<4x8x8xf32>
    %27 = arith.subf %20, %26 : vector<4x8x8xf32>
    %28 = math.exp %27 : vector<4x8x8xf32>
    %29 = arith.mulf %25, %16 : vector<4x8x1xf32>
    %cst_18 = arith.constant dense<0.000000e+00> : vector<4x8xf32>
    %30 = vector.multi_reduction <add>, %28, %cst_18 [2] : vector<4x8x8xf32> to vector<4x8xf32>
    %31 = vector.shape_cast %30 : vector<4x8xf32> to vector<4x8x1xf32>
    %32 = arith.addf %29, %31 : vector<4x8x1xf32>
    %33 = vector.broadcast %25 : vector<4x8x1xf32> to vector<4x8x8xf32>
    %34 = arith.mulf %33, %17 : vector<4x8x8xf32>
    %35 = arith.truncf %28 : vector<4x8x8xf32> to vector<4x8x8xbf16>
    "tpu.trace_start"() <{level = 10 : i32, message = "hqk,hkd->hqd"}> : () -> ()
    %cst_19 = arith.constant dense<0.000000e+00> : vector<4x8x8xf32>
    %36 = tpu.matmul %35, %19, %cst_19 {dimension_numbers = #tpu.dot_dimension_numbers<[2], [1], [1], [2], [0, 0, 0, 1, 1, 2], [0], [0]>} : vector<4x8x8xbf16>, vector<4x8x8xbf16>, vector<4x8x8xf32> -> vector<4x8x8xf32>
    "tpu.trace_stop"() : () -> ()
    %37 = arith.addf %34, %36 : vector<4x8x8xf32>
    %38 = tpu.reciprocal %32 {approx = true} : vector<4x8x1xf32> -> vector<4x8x1xf32>
    %39 = vector.broadcast %38 : vector<4x8x1xf32> to vector<4x8x8xf32>
    %40 = arith.mulf %37, %39 : vector<4x8x8xf32>
    %41 = tpu.transpose %40, [1, 0, 2] : vector<4x8x8xf32> -> vector<8x4x8xf32>
    %42 = vector.shape_cast %41 : vector<8x4x8xf32> to vector<8x32xf32>
    %43 = arith.truncf %42 : vector<8x32xf32> to vector<8x32xbf16>
    %c0_20 = arith.constant 0 : index
    %c0_21 = arith.constant 0 : index
    %44 = vector.load %arg8[%c0_20, %c0_21] : memref<32x32xbf16, #tpu.memory_space<vmem>>, vector<32x32xbf16>
    %cst_22 = arith.constant dense<0.000000e+00> : vector<8x32xf32>
    %45 = tpu.matmul %43, %44, %cst_22 {dimension_numbers = #tpu.dot_dimension_numbers<[1], [0], [0], [1], [0, 0, 1, 1], [], []>} : vector<8x32xbf16>, vector<32x32xbf16>, vector<8x32xf32> -> vector<8x32xf32>
    %46 = arith.addf %45, %4 : vector<8x32xf32>
    %cst_23 = arith.constant dense<0.000000e+00> : vector<8xf32>
    %47 = vector.multi_reduction <add>, %46, %cst_23 [1] : vector<8x32xf32> to vector<8xf32>
    %48 = vector.shape_cast %47 : vector<8xf32> to vector<8x1xf32>
    %cst_24 = arith.constant 3.200000e+01 : f32
    %49 = vector.broadcast %cst_24 : f32 to vector<8x1xf32>
    %50 = arith.divf %48, %49 : vector<8x1xf32>
    %51 = vector.broadcast %50 : vector<8x1xf32> to vector<8x32xf32>
    %52 = arith.subf %46, %51 : vector<8x32xf32>
    %53 = arith.mulf %52, %52 : vector<8x32xf32>
    %cst_25 = arith.constant dense<0.000000e+00> : vector<8xf32>
    %54 = vector.multi_reduction <add>, %53, %cst_25 [1] : vector<8x32xf32> to vector<8xf32>
    %55 = vector.shape_cast %54 : vector<8xf32> to vector<8x1xf32>
    %cst_26 = arith.constant 3.200000e+01 : f32
    %56 = vector.broadcast %cst_26 : f32 to vector<8x1xf32>
    %57 = arith.divf %55, %56 : vector<8x1xf32>
    %58 = vector.broadcast %50 : vector<8x1xf32> to vector<8x32xf32>
    %59 = arith.subf %46, %58 : vector<8x32xf32>
    %cst_27 = arith.constant 9.99999974E-6 : f32
    %60 = vector.broadcast %cst_27 : f32 to vector<8x1xf32>
    %61 = arith.addf %57, %60 : vector<8x1xf32>
    %62 = math.rsqrt %61 : vector<8x1xf32>
    %63 = vector.broadcast %62 : vector<8x1xf32> to vector<8x32xf32>
    %64 = arith.mulf %59, %63 : vector<8x32xf32>
    %c0_28 = arith.constant 0 : index
    %c0_29 = arith.constant 0 : index
    %65 = vector.load %arg13[%c0_28, %c0_29] : memref<1x32xf32, #tpu.memory_space<vmem>>, vector<1x32xf32>
    %66 = vector.broadcast %65 : vector<1x32xf32> to vector<8x32xf32>
    %67 = arith.mulf %64, %66 : vector<8x32xf32>
    %c0_30 = arith.constant 0 : index
    %c0_31 = arith.constant 0 : index
    %68 = vector.load %arg14[%c0_30, %c0_31] : memref<1x32xf32, #tpu.memory_space<vmem>>, vector<1x32xf32>
    %69 = vector.broadcast %68 : vector<1x32xf32> to vector<8x32xf32>
    %70 = arith.addf %67, %69 : vector<8x32xf32>
    %71 = arith.truncf %70 : vector<8x32xf32> to vector<8x32xbf16>
    %c0_32 = arith.constant 0 : index
    %c0_33 = arith.constant 0 : index
    %72 = vector.load %arg9[%c0_32, %c0_33] : memref<32x128xbf16, #tpu.memory_space<vmem>>, vector<32x128xbf16>
    %cst_34 = arith.constant dense<0.000000e+00> : vector<8x128xf32>
    %73 = tpu.matmul %71, %72, %cst_34 {dimension_numbers = #tpu.dot_dimension_numbers<[1], [0], [0], [1], [0, 0, 1, 1], [], []>} : vector<8x32xbf16>, vector<32x128xbf16>, vector<8x128xf32> -> vector<8x128xf32>
    %c0_35 = arith.constant 0 : index
    %c0_36 = arith.constant 0 : index
    %74 = vector.load %arg10[%c0_35, %c0_36] : memref<1x128xf32, #tpu.memory_space<vmem>>, vector<1x128xf32>
    %75 = vector.broadcast %74 : vector<1x128xf32> to vector<8x128xf32>
    %76 = arith.addf %73, %75 : vector<8x128xf32>
    %cst_37 = arith.constant 0.000000e+00 : f32
    %77 = vector.broadcast %cst_37 : f32 to vector<8x128xf32>
    %78 = arith.maximumf %76, %77 : vector<8x128xf32>
    %79 = arith.truncf %78 : vector<8x128xf32> to vector<8x128xbf16>
    %c0_38 = arith.constant 0 : index
    %c0_39 = arith.constant 0 : index
    %80 = vector.load %arg11[%c0_38, %c0_39] : memref<128x32xbf16, #tpu.memory_space<vmem>>, vector<128x32xbf16>
    %cst_40 = arith.constant dense<0.000000e+00> : vector<8x32xf32>
    %81 = tpu.matmul %79, %80, %cst_40 {dimension_numbers = #tpu.dot_dimension_numbers<[1], [0], [0], [1], [0, 0, 1, 1], [], []>} : vector<8x128xbf16>, vector<128x32xbf16>, vector<8x32xf32> -> vector<8x32xf32>
    %c0_41 = arith.constant 0 : index
    %c0_42 = arith.constant 0 : index
    %82 = vector.load %arg12[%c0_41, %c0_42] : memref<1x32xf32, #tpu.memory_space<vmem>>, vector<1x32xf32>
    %83 = vector.broadcast %82 : vector<1x32xf32> to vector<8x32xf32>
    %84 = arith.addf %81, %83 : vector<8x32xf32>
    %85 = arith.addf %70, %84 : vector<8x32xf32>
    %cst_43 = arith.constant dense<0.000000e+00> : vector<8xf32>
    %86 = vector.multi_reduction <add>, %85, %cst_43 [1] : vector<8x32xf32> to vector<8xf32>
    %87 = vector.shape_cast %86 : vector<8xf32> to vector<8x1xf32>
    %cst_44 = arith.constant 3.200000e+01 : f32
    %88 = vector.broadcast %cst_44 : f32 to vector<8x1xf32>
    %89 = arith.divf %87, %88 : vector<8x1xf32>
    %90 = vector.broadcast %89 : vector<8x1xf32> to vector<8x32xf32>
    %91 = arith.subf %85, %90 : vector<8x32xf32>
    %92 = arith.mulf %91, %91 : vector<8x32xf32>
    %cst_45 = arith.constant dense<0.000000e+00> : vector<8xf32>
    %93 = vector.multi_reduction <add>, %92, %cst_45 [1] : vector<8x32xf32> to vector<8xf32>
    %94 = vector.shape_cast %93 : vector<8xf32> to vector<8x1xf32>
    %cst_46 = arith.constant 3.200000e+01 : f32
    %95 = vector.broadcast %cst_46 : f32 to vector<8x1xf32>
    %96 = arith.divf %94, %95 : vector<8x1xf32>
    %97 = vector.broadcast %89 : vector<8x1xf32> to vector<8x32xf32>
    %98 = arith.subf %85, %97 : vector<8x32xf32>
    %cst_47 = arith.constant 9.99999974E-6 : f32
    %99 = vector.broadcast %cst_47 : f32 to vector<8x1xf32>
    %100 = arith.addf %96, %99 : vector<8x1xf32>
    %101 = math.rsqrt %100 : vector<8x1xf32>
    %102 = vector.broadcast %101 : vector<8x1xf32> to vector<8x32xf32>
    %103 = arith.mulf %98, %102 : vector<8x32xf32>
    %c0_48 = arith.constant 0 : index
    %c0_49 = arith.constant 0 : index
    %104 = vector.load %arg15[%c0_48, %c0_49] : memref<1x32xf32, #tpu.memory_space<vmem>>, vector<1x32xf32>
    %105 = vector.broadcast %104 : vector<1x32xf32> to vector<8x32xf32>
    %106 = arith.mulf %103, %105 : vector<8x32xf32>
    %c0_50 = arith.constant 0 : index
    %c0_51 = arith.constant 0 : index
    %107 = vector.load %arg16[%c0_50, %c0_51] : memref<1x32xf32, #tpu.memory_space<vmem>>, vector<1x32xf32>
    %108 = vector.broadcast %107 : vector<1x32xf32> to vector<8x32xf32>
    %109 = arith.addf %106, %108 : vector<8x32xf32>
    %c0_52 = arith.constant 0 : index
    %c0_53 = arith.constant 0 : index
    %c0_54 = arith.constant 0 : index
    %110 = vector.load %arg17[%c0_52, %c0_53, %c0_54] : memref<1x8x32xf32, #tpu.memory_space<vmem>>, vector<1x8x32xf32>
    %111 = vector.shape_cast %110 : vector<1x8x32xf32> to vector<8x32xf32>
    %112 = vector.shape_cast %109 : vector<8x32xf32> to vector<1x8x32xf32>
    tpu.vector_store %arg17[%c0_52, %c0_53, %c0_54], %112 {strides = array<i32>} : memref<1x8x32xf32, #tpu.memory_space<vmem>>, vector<1x8x32xf32>,
    return
  }
  func.func @transform_0(%arg0: i32, %arg1: i32) -> (i32, i32, i32) {
    %c0_i32 = arith.constant 0 : i32
    %c0_i32_0 = arith.constant 0 : i32
    %c0_i32_1 = arith.constant 0 : i32
    return %arg0, %c0_i32, %c0_i32_0 : i32, i32, i32
  }
  func.func @transform_1(%arg0: i32, %arg1: i32) -> (i32, i32, i32) {
    %c0_i32 = arith.constant 0 : i32
    %c0_i32_0 = arith.constant 0 : i32
    %c0_i32_1 = arith.constant 0 : i32
    return %arg0, %c0_i32, %c0_i32_0 : i32, i32, i32
  }
  func.func @transform_2(%arg0: i32, %arg1: i32) -> (i32, i32, i32) {
    %c0_i32 = arith.constant 0 : i32
    %c0_i32_0 = arith.constant 0 : i32
    return %arg0, %arg1, %c0_i32 : i32, i32, i32
  }
  func.func @transform_3(%arg0: i32, %arg1: i32) -> (i32, i32) {
    %c0_i32 = arith.constant 0 : i32
    %c0_i32_0 = arith.constant 0 : i32
    %c0_i32_1 = arith.constant 0 : i32
    return %c0_i32, %c0_i32_0 : i32, i32
  }
  func.func @transform_4(%arg0: i32, %arg1: i32) -> (i32, i32) {
    %c0_i32 = arith.constant 0 : i32
    %c0_i32_0 = arith.constant 0 : i32
    %c0_i32_1 = arith.constant 0 : i32
    return %c0_i32, %c0_i32_0 : i32, i32
  }
  func.func @transform_5(%arg0: i32, %arg1: i32) -> (i32, i32) {
    %c0_i32 = arith.constant 0 : i32
    %c0_i32_0 = arith.constant 0 : i32
    %c0_i32_1 = arith.constant 0 : i32
    return %c0_i32, %c0_i32_0 : i32, i32
  }
  func.func @transform_6(%arg0: i32, %arg1: i32) -> (i32, i32) {
    %c0_i32 = arith.constant 0 : i32
    %c0_i32_0 = arith.constant 0 : i32
    %c0_i32_1 = arith.constant 0 : i32
    return %c0_i32, %c0_i32_0 : i32, i32
  }
  func.func @transform_7(%arg0: i32, %arg1: i32) -> (i32, i32) {
    %c0_i32 = arith.constant 0 : i32
    %c0_i32_0 = arith.constant 0 : i32
    %c0_i32_1 = arith.constant 0 : i32
    return %c0_i32, %c0_i32_0 : i32, i32
  }
  func.func @transform_8(%arg0: i32, %arg1: i32) -> (i32, i32) {
    %c0_i32 = arith.constant 0 : i32
    %c0_i32_0 = arith.constant 0 : i32
    %c0_i32_1 = arith.constant 0 : i32
    return %c0_i32, %c0_i32_0 : i32, i32
  }
  func.func @transform_9(%arg0: i32, %arg1: i32) -> (i32, i32) {
    %c0_i32 = arith.constant 0 : i32
    %c0_i32_0 = arith.constant 0 : i32
    %c0_i32_1 = arith.constant 0 : i32
    return %c0_i32, %c0_i32_0 : i32, i32
  }
  func.func @transform_10(%arg0: i32, %arg1: i32) -> (i32, i32) {
    %c0_i32 = arith.constant 0 : i32
    %c0_i32_0 = arith.constant 0 : i32
    %c0_i32_1 = arith.constant 0 : i32
    return %c0_i32, %c0_i32_0 : i32, i32
  }
  func.func @transform_11(%arg0: i32, %arg1: i32) -> (i32, i32) {
    %c0_i32 = arith.constant 0 : i32
    %c0_i32_0 = arith.constant 0 : i32
    %c0_i32_1 = arith.constant 0 : i32
    return %c0_i32, %c0_i32_0 : i32, i32
  }
  func.func @transform_12(%arg0: i32, %arg1: i32) -> (i32, i32) {
    %c0_i32 = arith.constant 0 : i32
    %c0_i32_0 = arith.constant 0 : i32
    %c0_i32_1 = arith.constant 0 : i32
    return %c0_i32, %c0_i32_0 : i32, i32
  }
  func.func @transform_13(%arg0: i32, %arg1: i32) -> (i32, i32) {
    %c0_i32 = arith.constant 0 : i32
    %c0_i32_0 = arith.constant 0 : i32
    %c0_i32_1 = arith.constant 0 : i32
    return %c0_i32, %c0_i32_0 : i32, i32
  }
  func.func @transform_14(%arg0: i32, %arg1: i32) -> (i32, i32) {
    %c0_i32 = arith.constant 0 : i32
    %c0_i32_0 = arith.constant 0 : i32
    %c0_i32_1 = arith.constant 0 : i32
    return %c0_i32, %c0_i32_0 : i32, i32
  }
  func.func @transform_15(%arg0: i32, %arg1: i32) -> (i32, i32, i32) {
    %c0_i32 = arith.constant 0 : i32
    %c0_i32_0 = arith.constant 0 : i32
    return %arg0, %arg1, %c0_i32 : i32, i32, i32
  }
}

</mosaic_0001>

<bundles_post_ra>
// kernel: tpu_custom_call.1
= control target key start
LH: loop header
LB: loop body
LE: loop exit
PB: predicated region body
PF: predicated region fallthrough
CT: control target
= control target key end

     0   :  { %s3418_s0 = inlined_call_operand.hbm [shape: bf16[2,8,32], index: 0, kind: input, shape index: {}]   ;;  %s3419_s1 = inlined_call_operand.hbm [shape: bf16[2,8,32], index: 1, kind: input, shape index: {}]   ;;  %s3420_s2 = inlined_call_operand.vmem [shape: f32[2,8,32], index: 2, kind: input, shape index: {}]   ;;  %s3421_s3 = inlined_call_operand.vmem [shape: bf16[32,32], index: 3, kind: input, shape index: {}]   ;;  %s3422_s4 = inlined_call_operand.vmem [shape: bf16[32,32], index: 4, kind: input, shape index: {}]   ;;  %s3423_s5 = inlined_call_operand.vmem [shape: bf16[32,32], index: 5, kind: input, shape index: {}]   ;;  %s3424_s6 = inlined_call_operand.vmem [shape: bf16[32,32], index: 6, kind: input, shape index: {}]   ;;  %s3425_s7 = inlined_call_operand.hbm [shape: bf16[32,128], index: 7, kind: input, shape index: {}]   ;;  %s3426_s8 = inlined_call_operand.hbm [shape: f32[1,128], index: 8, kind: input, shape index: {}]   ;;  %s3427_s9 = inlined_call_operand.vmem [shape: bf16[128,32], index: 9, kind: input, shape index: {}]   ;;  %s3428_s10 = inlined_call_operand.vmem [shape: f32[1,32], index: 10, kind: input, shape index: {}]   ;;  %s3429_s11 = inlined_call_operand.vmem [shape: f32[1,32], index: 11, kind: input, shape index: {}]   ;;  %s3430_s12 = inlined_call_operand.vmem [shape: f32[1,32], index: 12, kind: input, shape index: {}]   ;;  %s3431_s13 = inlined_call_operand.vmem [shape: f32[1,32], index: 13, kind: input, shape index: {}]   ;;  %s3432_s14 = inlined_call_operand.vmem [shape: f32[1,32], index: 14, kind: input, shape index: {}]   ;;  %s3433_s15 = inlined_call_operand.hbm [shape: f32[2,8,32], index: 15, kind: output, shape index: {}]  }
   0x1   :  { %3440 = sst [smem:[#allocation22_spill]] %s3418_s0 }
   0x2   :  { %3441 = sst [smem:[#allocation23_spill]] %s3419_s1 }
   0x3   :  { %3442 = sst [smem:[#allocation24_spill]] %s3425_s7 }
   0x4   :  { %3443 = sst [smem:[#allocation25_spill]] %s3426_s8 }
   0x5   :  { %3444 = sst [smem:[#allocation26_spill]] %s3428_s10 }
   0x6   :  { %3445 = sst [smem:[#allocation27_spill]] %s3430_s12 }
   0x7   :  { %3446 = sst [smem:[#allocation28_spill]] %s3431_s13 }
   0x8   :  { %3447 = sst [smem:[#allocation29_spill]] %s3432_s14 }
   0x9   :  { %3448 = sst [smem:[#allocation30_spill]] %s3433_s15 }
   0xa   :  { %20 = vsyncpa [#allocation5], 0 }
   0xb   :  { %22 = vsyncpa [#allocation5 + $0x1], 0 }
   0xc   :  { %23 = vsyncpa [#allocation8], 0 }
   0xd   :  { %25 = vsyncpa [#allocation8 + $0x1], 0 }
   0xe   :  { %26 = vsyncpa [#allocation11], 0 }
   0xf   :  { %27 = vsyncpa [#allocation6], 0 }
  0x10   :  { %29 = vsyncpa [#allocation6 + $0x1], 0  ;;  %s2978_s18 = smov 0   ;;  %s2980_s19 = smov 0  }
  0x11   :  { %s2982_s20 = smov 0   ;;  %s2984_s21 = smov 0  }
  0x12   :  { %s2986_s22 = smov 0   ;;  %s2988_s23 = smov 0  }
  0x13 LB: > { %3449 = sst [smem:[#allocation18_spill]] %s2859_s18  ;;  %s3009_s24 = sadd.s32 4294967295, %s2879_s23   ;;  %s2879_s23 = sphi %s2988_s23, %s35_s23   ;;  %s2875_s22 = sphi %s2986_s22, %s3477_s22   ;;  %s2871_s21 = sphi %s2984_s21, %s3476_s21   ;;  %s2867_s20 = sphi %s2982_s20, %s3480_s20   ;;  %s2863_s19 = sphi %s2980_s19, %s3479_s19   ;;  %s2859_s18 = sphi %s2978_s18, %s3478_s18  }
  0x14   : > { %3450 = sst [smem:[#allocation19_spill]] %s2875_s22  ;;  %s2320_s25 = sadd.s32 4294967294, %s2879_s23  }
  0x15   : > { %p67_p0 = scmp.ne.s32.totalorder %s2863_s19, %s2859_s18  ;;  %p3437_p1 = scmp.eq.s32.totalorder %s3009_s24, 0 }
  0x16   : > { %p405_p3 = scmp.eq.s32.totalorder %s2320_s25, 1  ;;  %p2321_p5 = scmp.ge.s32.totalorder %s2879_s23, 1 }
  0x17   : > { %p3018_p4 = por %p3437_p1, %p67_p0  ;;  %p412_p7 = scmp.lt.s32.totalorder %s2879_s23, 3 }
  0x18   : > { %p3023_p6 = por %p405_p3, %p67_p0  ;;  %s2881_s29 = smov [#allocation9]  }
  0x19   : > { %p3028_p8 = pnand %p2321_p5, %p412_p7  ;;  %s436_s30 = sshll.u32 %s2881_s29, 4  ;;  %s437_s30 = int_to_ptr.vmem [resolvable:$true] %s436_s30 }
  0x1a   : > { %s3452_s27 = scalar_select %p3023_p6, 1, 0 }
  0x1b   : > { %p2547_p9 = pneg %p3028_p8  ;;  %s2882_s17 = smov [#allocation10]  }
  0x1c   : > { %3453 = sst [smem:[#allocation20_spill]] %s3452_s27  ;;  %s450_s25 = sshll.u32 %s2882_s17, 4  ;;  %s451_s25 = int_to_ptr.vmem [resolvable:$true] %s450_s25 }
  0x1d   : > { %p3037_p11 = pnand %p2547_p9, %p3437_p1  ;;  %s2690_s27 = scalar_lea.vmem %s437_s30, 256 }
  0x1e   : > { %p2691_p13 = scmp.ne.s32.totalorder %s437_s30, %s2690_s27  ;;  %p2698_p5 = scmp.lt.s32.totalorder %s437_s30, %s437_s30 }
  0x1f   : > { %p2681_p12 = pneg %p3037_p11  ;;  %p2699_p7 = scmp.lt.s32.totalorder %s2690_s27, %s2690_s27 }
  0x21   : > { %p2693_p0 = pnand %p2691_p13, %p2681_p12  ;;  %p2700_p10 = por %p2699_p7, %p2698_p5 }
  0x23   : > { %p2694_p3 = pneg %p2693_p0 }
  0x25   : > { %p2701_p9 = pnand %p2700_p10, %p2694_p3 }
  0x27   : > { %2704 = shalt.err (!%p2701_p9)
}
  0x28   : > { %s2883_s29 = smov 64   ;;  %s2884_s18 = smov 4  }
  0x29   : > { %s3456_s7 = sld [smem:[#allocation24_spill]]  ;;  %s2716_s14 = scalar_lea.vmem %s451_s25, 16 }
  0x2a   : > { %p2717_p1 = scmp.ne.s32.totalorder %s451_s25, %s2716_s14  ;;  %s2723_s13 = scalar_lea.vmem %s451_s25, 32 }
  0x2b   : > { %p2724_p2 = scmp.lt.s32.totalorder %s451_s25, %s451_s25  ;;  %p2725_p5 = scmp.lt.s32.totalorder %s2723_s13, %s2716_s14 }
  0x2c   : > { %p2719_p13 = pnand %p2717_p1, %p2681_p12 }
  0x2d   : > { %p2726_p10 = por %p2725_p5, %p2724_p2 }
  0x2e   : > { %p2720_p0 = pneg %p2719_p13 }
  0x2f   : > { %2550 = dma.hbm_to_vmem [thread:$0]  (!%p3037_p11), %s3456_s7, 256, %s437_s30, [#allocation8], %s2883_s29, %s2883_s29, %s2884_s18  }
  0x30   : > { %p2727_p3 = pnand %p2726_p10, %p2720_p0 }
  0x32   : > { %2730 = shalt.err (!%p2727_p3)
}
  0x33   : > { %s3457_s8 = sld [smem:[#allocation25_spill]]  ;;  %s47_s13 = sadd.s32 1, %s2875_s22 }
  0x34   : > { %s54_s14 = sadd.s32 1, %s2867_s20  ;;  %p49_p1 = scmp.ge.s32.totalorder %s47_s13, 2 }
  0x35   : > { %p61_p2 = scmp.ne.s32.totalorder %s2867_s20, %s2863_s19  ;;  %p62_p12 = scmp.eq.s32.totalorder %s2879_s23, 0 }
  0x36   : > { %p2567_p7 = scmp.lt.s32.totalorder %s2879_s23, 2  ;;  %s3482_s13 = smov (%p49_p1, %s47_s13), 0 }
  0x37   : > { %3458 = sst [smem:[#allocation21_spill]] %s3482_s13  ;;  %p63_p9 = por %p62_p12, %p61_p2 }
  0x38   : > { %p3459_p13 = scmp.eq.s32.totalorder %s3009_s24, 1  ;;  %s51_s15 = ssub.s32 %s2875_s22, %s3482_s13 }
  0x39   : > { %2553 = dma.hbm_to_vmem [thread:$0]  (!%p3037_p11), %s3457_s8, 16, %s451_s25, [#allocation11]  }
  0x3a   : > { %p3069_p0 = por %p3459_p13, %p61_p2  ;;  %s479_s18 = sand.u32 1, %s2867_s20  }
  0x3b   : > { %p52_p5 = scmp.eq.s32.totalorder %s51_s15, 0  ;;  %s2325_s30 = sshll.u32 %s479_s18, 2 }
  0x3c   : > { %s2326_s16 = sshll.u32 %s2875_s22, 6  ;;  %s3461_s0 = sld [smem:[#allocation22_spill]] }
  0x3d   : > { %s3078_s25 = scalar_select %p52_p5, %s2867_s20, %s54_s14  }
  0x3e   : > { %s483_s7 = scalar_lea.vmem [#allocation4], %s2325_s30  ;;  %p3085_p11 = pnand %p2567_p7, %p63_p9 }
  0x3f   : > { %s490_s8 = sshll.u32 %s483_s7, 4  ;;  %s3463_s1 = sld [smem:[#allocation23_spill]]  ;;  %s491_s8 = int_to_ptr.vmem [resolvable:$true] %s490_s8 }
  0x40   : > { %s480_s14 = scalar_lea.sflag [#allocation5], %s479_s18  ;;  %p2733_p10 = pneg %p3085_p11 }
  0x41   : > { %s2744_s29 = scalar_lea.vmem %s491_s8, 64  ;;  %s2885_s7 = smov [#allocation4]  }
  0x42   : > { %s488_s27 = scalar_lea.hbm %s3461_s0, %s2326_s16  ;;  %p2745_p3 = scmp.ne.s32.totalorder %s491_s8, %s2744_s29 }
  0x43   : > { %s2749_s17 = sshll.u32 %s2885_s7, 4  ;;  %s2750_s17 = int_to_ptr.vmem [resolvable:$false] %s2749_s17 }
  0x44   : > { %p2747_p1 = pnand %p2745_p3, %p2733_p10  ;;  %s2751_s0 = scalar_lea.vmem %s2750_s17, 128 }
  0x45   : > { %s3092_s22 = scalar_lea.hbm %s3463_s1, %s2326_s16  ;;  %p2752_p12 = scmp.lt.s32.totalorder %s491_s8, %s2750_s17 }
  0x46   : > { %p2748_p2 = pneg %p2747_p1  ;;  %p2753_p7 = scmp.lt.s32.totalorder %s2751_s0, %s2744_s29 }
  0x48   : > { %p2754_p9 = por %p2753_p7, %p2752_p12 }
  0x4a   : > { %p2755_p13 = pnand %p2754_p9, %p2748_p2 }
  0x4c   : > { %2758 = shalt.err (!%p2755_p13)
}
  0x4d   : > { %2557 = dma.hbm_to_vmem [thread:$0]  (!%p3085_p11), %s488_s27, 64, %s491_s8, %s480_s14  }
  0x4e   : > { %s497_s13 = sand.u32 1, %s2879_s23   ;;  %s501_s18 = scalar_lea.vmem [#allocation7], %s2325_s30 }
  0x4f   : > { %s508_s16 = sshll.u32 %s501_s18, 4  ;;  %s498_s15 = scalar_lea.sflag [#allocation8], %s497_s13  ;;  %s509_s16 = int_to_ptr.vmem [resolvable:$true] %s508_s16 }
  0x50   : > { %s2772_s1 = scalar_lea.vmem %s509_s16, 64  ;;  %s2886_s0 = smov [#allocation7]  }
  0x51   : > { %p2773_p5 = scmp.ne.s32.totalorder %s509_s16, %s2772_s1  ;;  %s2777_s29 = sshll.u32 %s2886_s0, 4  ;;  %s2778_s29 = int_to_ptr.vmem [resolvable:$false] %s2777_s29 }
  0x52   : > { %s2779_s7 = scalar_lea.vmem %s2778_s29, 128  ;;  %p2780_p2 = scmp.lt.s32.totalorder %s509_s16, %s2778_s29 }
  0x53   : > { %p2775_p3 = pnand %p2773_p5, %p2733_p10  ;;  %p2781_p12 = scmp.lt.s32.totalorder %s2779_s7, %s2772_s1 }
  0x55   : > { %p2776_p1 = pneg %p2775_p3  ;;  %p2782_p7 = por %p2781_p12, %p2780_p2 }
  0x57   : > { %p2783_p9 = pnand %p2782_p7, %p2776_p1 }
  0x59   : > { %2786 = shalt.err (!%p2783_p9)
}
  0x5a   : > { %2560 = dma.hbm_to_vmem [thread:$0]  (!%p3085_p11), %s3092_s22, 64, %s509_s16, %s498_s15  }
  0x5b   : > { %527 = sbr.rel (%p3028_p8) target bundleno = 2393 (0x959), region = 80  ;;  %s3111_s8 = sand.u32 (!%p3028_p8), 1, %s2863_s19  }
  0x5c   : > { %s2330_s30 = sshll.u32 (!%p3028_p8), %s3111_s8, 2  ;;  %s530_s27 = scalar_lea.sflag (!%p3028_p8), [#allocation5], %s3111_s8 }
  0x5d   : > { %s533_s14 = scalar_lea.vmem (!%p3028_p8), [#allocation4], %s2330_s30 }
  0x60   : > { %2838 = dma.done.wait (%p3018_p4), %s530_s27, 64  }
  0x61   : > { %2840 = vsyncadd (%p3018_p4), %s530_s27, 4294967232  ;;  %s538_s1 = sand.u32 1, %s3009_s24   ;;  %s542_s22 = scalar_lea.vmem [#allocation7], %s2330_s30 }
  0x62   : > { %s539_s12 = scalar_lea.sflag [#allocation8], %s538_s1 }
  0x63   : > { %2842 = dma.done.wait (%p3018_p4), %s539_s12, 64  }
  0x64   : > { %2844 = vsyncadd (%p3018_p4), %s539_s12, 4294967232  ;;  %p3464_p8 = scmp.eq.s32.totalorder %s3009_s24, 0 }
  0x66   : > { %2846 = dma.done.wait (%p3464_p8), [#allocation8], 256   ;;  %p3465_p11 = pmov %p3464_p8 }
  0x67   : > { %p3466_p10 = pmov %p3464_p8 }
  0x68   : > { %2848 = vsyncadd (%p3465_p11), [#allocation8], 4294967040 }
  0x69   : > { %2850 = dma.done.wait (%p3466_p10), [#allocation11], 16   ;;  %p3467_p13 = pmov %p3464_p8 }
  0x6a   : > { %v2887_v0 = vmov 0.0   ;;  %vm2888_vm0 = vmmov 0   ;;  %p609_p4 = scmp.lt.s32.totalorder %s2871_s21, 1  ;;  %v2633_v1 = vld [vmem:[%s3421_s3 + $0x8] sm:$0xff]   ;;  %v2634_v2 = vld [vmem:[%s3421_s3] sm:$0xff]   ;;  %vm638_vm1 = vcmask 261120   ;;  %v757_v26 = vlaneseq }
  0x6b   : > { %2852 = vsyncadd (%p3467_p13), [#allocation11], 4294967280  ;;  %2425 = vmatprep.subr.bf16.mxu0 %v2887_v0  ;;  %2429 = vmatprep.mubr.msk.bf16.mxu0 %vm2888_vm0, %v2887_v0  ;;  %v621_v3 = vld [vmem:[%s533_s14] sm:$0xf]  ;;  %v2635_v4 = vld [vmem:[%s3422_s4 + $0x8] sm:$0xff]   ;;  %s2890_s28 = smov 120  }
  0x6c   : > { %2449 = vmatprep.subr.bf16.mxu1 %v2887_v0  ;;  %2451 = vmatprep.mubr.msk.bf16.mxu1 %vm2888_vm0, %v2887_v0  ;;  %s610_s13 = scalar_select %p609_p4, %s2871_s21, 1  ;;  %v2636_v5 = vld [vmem:[%s3422_s4] sm:$0xff]   ;;  %v682_v6 = vld [vmem:[%s542_s22] sm:$0xf]  ;;  %v2892_v24 = vmov 1983009808  }
  0x6d   : > { %2426 = vmatpush3.bf16.msra.mxu0 %v2633_v1  ;;  %v2637_v7 = vld [vmem:[%s3423_s5 + $0x8] sm:$0xff]   ;;  %v2638_v8 = vld [vmem:[%s3423_s5] sm:$0xff]   ;;  %s2889_s22 = smov 104   ;;  %s2891_s24 = smov 112   ;;  %v755_v25 = vunpack.c.l.s4 %v2892_v24  ;;  %v2893_v27 = vmov 1934713408  }
  0x6e   : > { %2427 = vmatprep.subr.bf16.mxu0 %v2887_v0  ;;  %s2335_s15 = sshll.u32 %s610_s13, 3  ;;  %v787_v28 = vunpack.c.l.s4 %v2893_v27  ;;  %v758_v30 = vshrl.u32 %v757_v26, 7  ;;  %vm892_vm2 = vcmask 60416   ;;  %vm1272_vm3 = vcmask 64512   ;;  %s2895_s0 = smov 8  }
  0x6f   : > { %s615_s1 = scalar_lea.vmem %s3420_s2, %s2335_s15  ;;  %v756_v29 = vunpack.c.0.s8 %v755_v25  ;;  %vm1520_vm4 = vcmask 1043456   ;;  %s2894_s15 = smov 16   ;;  %vm1863_vm5 = vcmask 130048   ;;  %vm1865_vm6 = vcmask 195584  }
  0x70   : > { %v3171_v9 = vld [vmem:[%s615_s1] sm:$0xff]  ;;  %v788_v33 = vunpack.c.0.s8 %v787_v28  ;;  %s2896_s29 = smov 24   ;;  %s3469_s26 = sld [smem:[#allocation26_spill]] }
  0x71   : > { %2428 = vmatpush3.bf16.msra.mxu0 %v2634_v2  ;;  %v1052_v10 = vpack.c.bf16 %v3171_v9, %v3171_v9  ;;  %v3185_v34 = vsub.s32 %v756_v29, %v758_v30  ;;  %s3470_s17 = sld [smem:[#allocation28_spill]]  ;;  %s2169_s1 = scalar_lea.sflag [#allocation6], %s3111_s8 }
  0x72   : > { %2433 = vmatprep.subr.bf16.mxu0 %v2887_v0  ;;  %v3187_v40 = vsub.s32 %v788_v33, %v758_v30  ;;  %s3471_s16 = sld [smem:[#allocation29_spill]] }
  0x73   : > { %s3472_s27 = sld [smem:[#allocation30_spill]] }
  0x74   : > { %2430 = vmatmul.mubr.msk.bf16.vlgmr.msra.gmra.mxu0 %vm638_vm1, %v621_v3 }
  0x75   : > { %2434 = vmatpush3.bf16.msra.mxu0 %v2635_v4  ;;  %2437 = vmatprep.mubr.msk.bf16.mxu0 %vm2888_vm0, %v2887_v0 }
  0x76   : > { %2435 = vmatprep.subr.bf16.mxu0 %v2887_v0 }
  0x79   : > { %2436 = vmatpush3.bf16.msra.mxu0 %v2636_v5 }
  0x7a   : > { %2441 = vmatprep.subr.bf16.mxu0 %v2887_v0 }
  0x7c   : > { %2438 = vmatmul.mubr.msk.bf16.vlgmr.msra.gmra.mxu0 %vm638_vm1, %v682_v6 }
  0x7d   : > { %2442 = vmatpush3.bf16.msra.mxu0 %v2637_v7  ;;  %2445 = vmatprep.mubr.msk.bf16.mxu0 %vm2888_vm0, %v2887_v0 }
  0x7e   : > { %2443 = vmatprep.subr.bf16.mxu0 %v2887_v0 }
  0x81   : > { %2444 = vmatpush3.bf16.msra.mxu0 %v2638_v8 }
  0x82   : > { %2455 = vmatprep.subr.bf16.mxu0 %v2887_v0 }
  0x84   : > { %2446 = vmatmul.mubr.msk.bf16.vlgmr.msra.gmra.mxu0 %vm638_vm1, %v1052_v10 }
  0x85   : > { %2457 = vmatprep.mubr.msk.bf16.mxu0 %vm2888_vm0, %v2887_v0 }
 0x134   : > { %v3180_v11 = vpop.f32.mrf.mxu0 }
 0x136   : > { %v2431_v12 = vpop.f32.mrf.mxu0 }
 0x138   : > { %v679_v13 = vpop.f32.mrf.mxu0 }
 0x13a   : > { %v2432_v14 = vpop.f32.mrf.mxu0 }
 0x13c   : > { %v736_v15 = vpop.f32.mrf.mxu0 }
 0x13d   : > { %749 = vrot.lane.b32.xlu1 %v736_v15, %s2889_s22  ;;  %743 = vrot.lane.b32.xlu0 %v736_v15, %s2890_s28 }
 0x13e   : > { %v2439_v16 = vpop.f32.mrf.mxu0 }
 0x140   : > { %v739_v17 = vpop.f32.mrf.mxu0 }
 0x141   : > { %746 = vrot.lane.b32.xlu0 %v736_v15, %s2891_s24 }
 0x142   : > { %v2440_v18 = vpop.f32.mrf.mxu0 }
 0x144   : > { %v1107_v19 = vpop.f32.mrf.mxu0 }
 0x145   : > { %v1113_v20 = vmul.f32 0.17677669, %v1107_v19 }
 0x146   : > { %v2447_v21 = vpop.f32.mrf.mxu0 }
 0x147   : > { %1118 = vrot.lane.b32.xlu0 %v1113_v20, %s2891_s24  ;;  %1115 = vrot.lane.b32.xlu1 %v1113_v20, %s2890_s28 }
 0x148   : > { %v1110_v22 = vpop.f32.mrf.mxu0 }
 0x14a   : > { %v2448_v23 = vpop.f32.mrf.mxu0 }
 0x14b   : > { %898 = vrot.lane.b32.xlu0 %v3180_v11, %s2890_s28  ;;  %1121 = vrot.lane.b32.xlu1 %v1113_v20, %s2889_s22 }
 0x14f   : > { %904 = vrot.lane.b32.xlu0 %v3180_v11, %s2889_s22  ;;  %901 = vrot.lane.b32.xlu1 %v3180_v11, %s2891_s24  ;;  %s2334_s22 = sshll.u32 %s3111_s8, 3 }
 0x1af   : > { %v750_v31 = vpop.permute.xlu1 %749  ;;  %v744_v32 = vpop.permute.xlu0 %743 }
 0x1b0   : > { %v768_v35 = vcombine.low %v744_v32, %v750_v31  ;;  %v769_v36 = vcombine.high %v744_v32, %v750_v31 }
 0x1b2   : > { %v776_v41 = vrot.slane %v768_v35, %v3185_v34  ;;  %v783_v42 = vrot.slane %v769_v36, %v3185_v34 }
 0x1b3   : > { %v747_v37 = vpop.permute.xlu0 %746 }
 0x1b4   : > { %v752_v38 = vcombine.low %v736_v15, %v747_v37  ;;  %v753_v39 = vcombine.high %v736_v15, %v747_v37 }
 0x1b6   : > { %v760_v43 = vrot.slane %v752_v38, %v3185_v34  ;;  %v767_v44 = vrot.slane %v753_v39, %v3185_v34 }
 0x1b8   : > { %v784_v45 = vcombine.low %v760_v43, %v776_v41  ;;  %v785_v46 = vcombine.high %v760_v43, %v776_v41  ;;  %v800_v47 = vcombine.low %v767_v44, %v783_v42  ;;  %v801_v48 = vcombine.high %v767_v44, %v783_v42 }
 0x1b9   : > { %v1119_v49 = vpop.permute.xlu0 %1118  ;;  %v1116_v50 = vpop.permute.xlu1 %1115 }
 0x1ba   : > { %v792_v51 = vrot.slane %v784_v45, %v3187_v40  ;;  %v799_v52 = vrot.slane %v785_v46, %v3187_v40  ;;  %v808_v53 = vrot.slane %v800_v47, %v3187_v40  ;;  %v815_v54 = vrot.slane %v801_v48, %v3187_v40 }
 0x1bb   : > { %v1124_v59 = vcombine.low %v1113_v20, %v1119_v49  ;;  %v1125_v60 = vcombine.high %v1113_v20, %v1119_v49 }
 0x1bc   : > { %v820_v55 = vcombine.low %v792_v51, %v799_v52  ;;  %v2342_v56 = vcombine.high %v792_v51, %v799_v52  ;;  %v836_v57 = vcombine.low %v808_v53, %v815_v54  ;;  %v2343_v58 = vcombine.high %v808_v53, %v815_v54 }
 0x1bd   : > { %v1122_v61 = vpop.permute.xlu1 %1121  ;;  %v899_v3 = vpop.permute.xlu0 %898  ;;  %v1132_v12 = vrot.slane %v1124_v59, %v3185_v34  ;;  %v1139_v13 = vrot.slane %v1125_v60, %v3185_v34 }
 0x1be   : > { %v827_v62 = vrot.slane %v820_v55, %v3185_v34  ;;  %v835_v63 = vrot.slane %v2342_v56, %v3185_v34  ;;  %v843_v1 = vrot.slane %v836_v57, %v3185_v34  ;;  %v851_v2 = vrot.slane %v2343_v58, %v3185_v34 }
 0x1bf   : > { %v1140_v4 = vcombine.low %v1116_v50, %v1122_v61  ;;  %v1141_v5 = vcombine.high %v1116_v50, %v1122_v61 }
 0x1c0   : > { %v852_v6 = vcombine.low %v827_v62, %v835_v63  ;;  %v853_v7 = vcombine.high %v827_v62, %v835_v63  ;;  %v868_v8 = vcombine.low %v843_v1, %v851_v2  ;;  %v869_v10 = vcombine.high %v843_v1, %v851_v2 }
 0x1c1   : > { %v1148_v14 = vrot.slane %v1140_v4, %v3185_v34  ;;  %v1155_v15 = vrot.slane %v1141_v5, %v3185_v34  ;;  %v905_v32 = vpop.permute.xlu0 %904  ;;  %v902_v33 = vpop.permute.xlu1 %901 }
 0x1c2   : > { %v860_v16 = vrot.slane %v852_v6, %v3187_v40  ;;  %v867_v17 = vrot.slane %v853_v7, %v3187_v40  ;;  %v876_v18 = vrot.slane %v868_v8, %v3187_v40  ;;  %v883_v19 = vrot.slane %v869_v10, %v3187_v40 }
 0x1c3   : > { %v1156_v20 = vcombine.low %v1132_v12, %v1148_v14  ;;  %v1157_v21 = vcombine.high %v1132_v12, %v1148_v14  ;;  %v1172_v22 = vcombine.low %v1139_v13, %v1155_v15  ;;  %v1173_v23 = vcombine.high %v1139_v13, %v1155_v15 }
 0x1c4   : > { %v884_v24 = vcombine.low %v860_v16, %v876_v18  ;;  %v885_v25 = vcombine.high %v860_v16, %v876_v18  ;;  %v886_v26 = vcombine.low %v867_v17, %v883_v19  ;;  %v887_v27 = vcombine.high %v867_v17, %v883_v19 }
 0x1c5   : > { %v1164_v28 = vrot.slane %v1156_v20, %v3187_v40  ;;  %v1171_v29 = vrot.slane %v1157_v21, %v3187_v40  ;;  %v1180_v30 = vrot.slane %v1172_v22, %v3187_v40  ;;  %v1187_v31 = vrot.slane %v1173_v23, %v3187_v40 }
 0x1c6   : > { %v888_v35 = vpack.c.bf16 %v884_v24, %v884_v24  ;;  %v889_v36 = vpack.c.bf16 %v885_v25, %v885_v25  ;;  %v890_v37 = vpack.c.bf16 %v886_v26, %v886_v26  ;;  %v891_v38 = vpack.c.bf16 %v887_v27, %v887_v27 }
 0x1c7   : > { %v1192_v39 = vcombine.low %v1164_v28, %v1171_v29  ;;  %v2349_v41 = vcombine.high %v1164_v28, %v1171_v29  ;;  %v1208_v42 = vcombine.low %v1180_v30, %v1187_v31  ;;  %v2350_v43 = vcombine.high %v1180_v30, %v1187_v31 }
 0x1c8   : > { %893 = vst.msk [vmem:[#allocation2] sm:$0xf] %vm892_vm2, %v888_v35  ;;  %894 = vst.msk [vmem:[#allocation2 + $0x4] sm:$0xf] %vm892_vm2, %v889_v36  ;;  %v923_v44 = vcombine.low %v899_v3, %v905_v32  ;;  %v924_v45 = vcombine.high %v899_v3, %v905_v32  ;;  %v907_v46 = vcombine.low %v3180_v11, %v902_v33 }
 0x1c9   : > { %895 = vst.msk [vmem:[#allocation2 + $0x8] sm:$0xf] %vm892_vm2, %v890_v37  ;;  %896 = vst.msk [vmem:[#allocation2 + $0xc] sm:$0xf] %vm892_vm2, %v891_v38  ;;  %v908_v47 = vcombine.high %v3180_v11, %v902_v33  ;;  %v1199_v48 = vrot.slane %v1192_v39, %v3185_v34  ;;  %v1207_v49 = vrot.slane %v2349_v41, %v3185_v34 }
 0x1ca   : > { %v1215_v50 = vrot.slane %v1208_v42, %v3185_v34  ;;  %v1223_v51 = vrot.slane %v2350_v43, %v3185_v34  ;;  %v931_v52 = vrot.slane %v923_v44, %v3185_v34  ;;  %v938_v53 = vrot.slane %v924_v45, %v3185_v34 }
 0x1cb   : > { %v915_v54 = vrot.slane %v907_v46, %v3185_v34  ;;  %v922_v55 = vrot.slane %v908_v47, %v3185_v34  ;;  %v1224_v56 = vcombine.low %v1199_v48, %v1207_v49  ;;  %v1225_v12 = vcombine.high %v1199_v48, %v1207_v49 }
 0x1cc   : > { %v1240_v57 = vcombine.low %v1215_v50, %v1223_v51  ;;  %v1241_v19 = vcombine.high %v1215_v50, %v1223_v51 }
 0x1cd   : > { %v939_v58 = vcombine.low %v915_v54, %v931_v52  ;;  %v940_v11 = vcombine.high %v915_v54, %v931_v52  ;;  %v955_v59 = vcombine.low %v922_v55, %v938_v53  ;;  %v956_v60 = vcombine.high %v922_v55, %v938_v53 }
 0x1ce   : > { %v1232_v4 = vrot.slane %v1224_v56, %v3187_v40  ;;  %v1248_v5 = vrot.slane %v1240_v57, %v3187_v40  ;;  %v1239_v35 = vrot.slane %v1225_v12, %v3187_v40  ;;  %v1255_v36 = vrot.slane %v1241_v19, %v3187_v40 }
 0x1cf   : > { %v947_v61 = vrot.slane %v939_v58, %v3187_v40  ;;  %v954_v62 = vrot.slane %v940_v11, %v3187_v40  ;;  %v963_v63 = vrot.slane %v955_v59, %v3187_v40  ;;  %v970_v1 = vrot.slane %v956_v60, %v3187_v40  ;;  %v1264_v2 = vld [vmem:[#allocation2] sm:$0xf]  ;;  %v1265_v3 = vld [vmem:[#allocation2 + $0x4] sm:$0xf] }
 0x1d0   : > { %v1277_v13 = vsel %vm1272_vm3, %v1264_v2, 0  ;;  %v1323_v14 = vsel %vm1272_vm3, %v1265_v3, 0  ;;  %v1256_v20 = vcombine.low %v1232_v4, %v1248_v5  ;;  %v1257_v21 = vcombine.high %v1232_v4, %v1248_v5  ;;  %v1266_v30 = vld [vmem:[#allocation2 + $0x8] sm:$0xf]  ;;  %v1267_v31 = vld [vmem:[#allocation2 + $0xc] sm:$0xf] }
 0x1d1   : > { %v975_v6 = vcombine.low %v947_v61, %v954_v62  ;;  %v2344_v7 = vcombine.high %v947_v61, %v954_v62  ;;  %v991_v8 = vcombine.low %v963_v63, %v970_v1  ;;  %v2345_v10 = vcombine.high %v963_v63, %v970_v1  ;;  %2450 = vmatpush3.bf16.xpose.msra.mxu1 %v1277_v13 }
 0x1d2   : > { %2456 = vmatpush3.bf16.xpose.msra.mxu0 %v1323_v14  ;;  %2461 = vmatprep.subr.bf16.mxu1 %v2887_v0  ;;  %v1260_v32 = vpack.c.bf16 %v1256_v20, %v1256_v20  ;;  %v1261_v33 = vpack.c.bf16 %v1257_v21, %v1257_v21  ;;  %v1369_v42 = vsel %vm1272_vm3, %v1266_v30, 0  ;;  %v1415_v43 = vsel %vm1272_vm3, %v1267_v31, 0 }
 0x1d3   : > { %v982_v15 = vrot.slane %v975_v6, %v3185_v34  ;;  %v990_v16 = vrot.slane %v2344_v7, %v3185_v34  ;;  %v998_v17 = vrot.slane %v991_v8, %v3185_v34  ;;  %v1006_v18 = vrot.slane %v2345_v10, %v3185_v34  ;;  %2467 = vmatprep.subr.bf16.mxu0 %v2887_v0 }
 0x1d4   : > { %v1258_v48 = vcombine.low %v1239_v35, %v1255_v36  ;;  %v1259_v49 = vcombine.high %v1239_v35, %v1255_v36 }
 0x1d5   : > { %v1007_v22 = vcombine.low %v982_v15, %v990_v16  ;;  %v1008_v23 = vcombine.high %v982_v15, %v990_v16  ;;  %v1023_v24 = vcombine.low %v998_v17, %v1006_v18  ;;  %v1024_v25 = vcombine.high %v998_v17, %v1006_v18 }
 0x1d6   : > { %v1262_v50 = vpack.c.bf16 %v1258_v48, %v1258_v48  ;;  %v1263_v51 = vpack.c.bf16 %v1259_v49, %v1259_v49 }
 0x1d7   : > { %v1015_v26 = vrot.slane %v1007_v22, %v3187_v40  ;;  %v1022_v27 = vrot.slane %v1008_v23, %v3187_v40  ;;  %v1031_v28 = vrot.slane %v1023_v24, %v3187_v40  ;;  %v1038_v29 = vrot.slane %v1024_v25, %v3187_v40 }
 0x1d8   : > { %2452 = vmatmul.mubr.msk.bf16.vlgmr.msra.gmra.mxu1 %vm1272_vm3, %v1260_v32 }
 0x1d9   : > { %v1039_v37 = vcombine.low %v1015_v26, %v1031_v28  ;;  %v1040_v38 = vcombine.high %v1015_v26, %v1031_v28  ;;  %v1041_v39 = vcombine.low %v1022_v27, %v1038_v29  ;;  %v1042_v41 = vcombine.high %v1022_v27, %v1038_v29  ;;  %2458 = vmatmul.mubr.msk.bf16.vlgmr.msra.gmra.mxu0 %vm1272_vm3, %v1261_v33 }
 0x1da   : > { %2462 = vmatpush3.bf16.xpose.msra.mxu1 %v1369_v42  ;;  %2468 = vmatpush3.bf16.xpose.msra.mxu0 %v1415_v43 }
 0x1db   : > { %v1043_v44 = vpack.c.bf16 %v1039_v37, %v1039_v37  ;;  %v1044_v45 = vpack.c.bf16 %v1040_v38, %v1040_v38  ;;  %v1045_v46 = vpack.c.bf16 %v1041_v39, %v1041_v39  ;;  %v1046_v47 = vpack.c.bf16 %v1042_v41, %v1042_v41  ;;  %2463 = vmatprep.mubr.msk.bf16.mxu1 %vm2888_vm0, %v2887_v0 }
 0x1dc   : > { %2469 = vmatprep.mubr.msk.bf16.mxu0 %vm2888_vm0, %v2887_v0  ;;  %2473 = vmatprep.subr.bf16.mxu1 %v2887_v0 }
 0x1dd   : > { %1047 = vst.msk [vmem:[#allocation3] sm:$0xf] %vm892_vm2, %v1043_v44  ;;  %1048 = vst.msk [vmem:[#allocation3 + $0x4] sm:$0xf] %vm892_vm2, %v1044_v45  ;;  %2479 = vmatprep.subr.bf16.mxu0 %v2887_v0 }
 0x1de   : > { %1049 = vst.msk [vmem:[#allocation3 + $0x8] sm:$0xf] %vm892_vm2, %v1045_v46  ;;  %1050 = vst.msk [vmem:[#allocation3 + $0xc] sm:$0xf] %vm892_vm2, %v1046_v47 }
 0x1e1   : > { %2464 = vmatmul.mubr.msk.bf16.vlgmr.msra.gmra.mxu1 %vm1272_vm3, %v1262_v50  ;;  %2470 = vmatmul.mubr.msk.bf16.vlgmr.msra.gmra.mxu0 %vm1272_vm3, %v1263_v51 }
 0x1e2   : > { %2475 = vmatprep.mubr.msk.bf16.mxu1 %vm2888_vm0, %v2887_v0  ;;  %2481 = vmatprep.mubr.msk.bf16.mxu0 %vm2888_vm0, %v2887_v0 }
 0x1e4   : > { %v1268_v52 = vld [vmem:[#allocation3] sm:$0xf]  ;;  %v1269_v53 = vld [vmem:[#allocation3 + $0x4] sm:$0xf] }
 0x1e5   : > { %v1522_v54 = vsel %vm1520_vm4, %v1268_v52, 0  ;;  %v1568_v55 = vsel %vm1520_vm4, %v1269_v53, 0  ;;  %v1270_v27 = vld [vmem:[#allocation3 + $0x8] sm:$0xf]  ;;  %v1271_v31 = vld [vmem:[#allocation3 + $0xc] sm:$0xf] }
 0x1e6   : > { %2474 = vmatpush3.bf16.msra.mxu1 %v1522_v54  ;;  %2480 = vmatpush3.bf16.msra.mxu0 %v1568_v55  ;;  %v1614_v35 = vsel %vm1520_vm4, %v1270_v27, 0  ;;  %v1660_v36 = vsel %vm1520_vm4, %v1271_v31, 0 }
 0x1e7   : > { %2485 = vmatprep.subr.bf16.mxu1 %v2887_v0  ;;  %2491 = vmatprep.subr.bf16.mxu0 %v2887_v0 }
 0x298   : > { %v1313_v56 = vpop.f32.mrf.mxu1 }
 0x299   : > { %v1359_v57 = vpop.f32.mrf.mxu0  ;;  %v1457_v58 = vsel %vm1272_vm3, %v1313_v56, -inf }
 0x29a   : > { %1458 = vmax.xlane.f32.xlu1 %v1457_v58  ;;  %v2453_v11 = vpop.f32.mrf.mxu1  ;;  %v1460_v59 = vsel %vm1272_vm3, %v1359_v57, -inf }
 0x29b   : > { %1461 = vmax.xlane.f32.xlu0 %v1460_v59  ;;  %v2459_v60 = vpop.f32.mrf.mxu0 }
 0x29c   : > { %v1316_v61 = vpop.f32.mrf.mxu1 }
 0x29d   : > { %v1362_v62 = vpop.f32.mrf.mxu0 }
 0x29e   : > { %v2454_v63 = vpop.f32.mrf.mxu1 }
 0x29f   : > { %v2460_v1 = vpop.f32.mrf.mxu0 }
 0x2a1   : > { %v1405_v2 = vpop.f32.mrf.mxu1  ;;  %v1451_v3 = vpop.f32.mrf.mxu0 }
 0x2a2   : > { %v1463_v4 = vsel %vm1272_vm3, %v1405_v2, -inf  ;;  %v1466_v5 = vsel %vm1272_vm3, %v1451_v3, -inf }
 0x2a3   : > { %v2465_v6 = vpop.f32.mrf.mxu1  ;;  %1464 = vmax.xlane.f32.xlu0 %v1463_v4  ;;  %1467 = vmax.xlane.f32.xlu1 %v1466_v5  ;;  %v2471_v7 = vpop.f32.mrf.mxu0 }
 0x2a5   : > { %v1408_v8 = vpop.f32.mrf.mxu1  ;;  %v1454_v10 = vpop.f32.mrf.mxu0 }
 0x2a7   : > { %v2466_v12 = vpop.f32.mrf.mxu1  ;;  %v2472_v13 = vpop.f32.mrf.mxu0 }
 0x323   : > { %v1459_v14 = vpop.xlane.xlu1 %1458 }
 0x324   : > { %v1481_v15 = vsub.f32 %v1313_v56, %v1459_v14  ;;  %v1462_v16 = vpop.xlane.xlu0 %1461  ;;  %v1469_v44 = vsub.f32 -inf, %v1459_v14 }
 0x325   : > { %v1482_v17 = vsub.f32 %v1359_v57, %v1462_v16  ;;  %v1470_v46 = vsub.f32 -inf, %v1462_v16 }
 0x326   : > { %v1485_v18 = vmul.f32 1.442695, %v1481_v15  ;;  %v1473_v48 = vmul.f32 1.442695, %v1469_v44 }
 0x327   : > { %v1487_v19 = vmul.f32 1.442695, %v1482_v17  ;;  %v1475_v50 = vmul.f32 1.442695, %v1470_v46 }
 0x328   : > { %2651 = vpow2.f32 %v1485_v18 }
 0x329   : > { %2653 = vpow2.f32 %v1487_v19 }
 0x32c   : > { %v1465_v20 = vpop.xlane.xlu0 %1464  ;;  %v1468_v21 = vpop.xlane.xlu1 %1467 }
 0x32d   : > { %v1483_v22 = vsub.f32 %v1405_v2, %v1465_v20  ;;  %v1484_v23 = vsub.f32 %v1451_v3, %v1468_v21  ;;  %v1471_v45 = vsub.f32 -inf, %v1465_v20  ;;  %v1472_v47 = vsub.f32 -inf, %v1468_v21 }
 0x32f   : > { %v1489_v24 = vmul.f32 1.442695, %v1483_v22  ;;  %v1491_v25 = vmul.f32 1.442695, %v1484_v23  ;;  %v1477_v49 = vmul.f32 1.442695, %v1471_v45 }
 0x330   : > { %v1479_v51 = vmul.f32 1.442695, %v1472_v47 }
 0x331   : > { %2655 = vpow2.f32 %v1489_v24 }
 0x332   : > { %2657 = vpow2.f32 %v1491_v25 }
 0x333   : > { %2659 = vpow2.f32 %v1473_v48  ;;  %v2639_v48 = vld [vmem:[%s3424_s6 + $0x8] sm:$0xff]  }
 0x334   : > { %2661 = vpow2.f32 %v1477_v49 }
 0x335   : > { %v2652_v26 = vpop.eup %2651  ;;  %2663 = vpow2.f32 %v1475_v50 }
 0x336   : > { %v1497_v28 = vsel %vm1272_vm3, %v2652_v26, 0.0  ;;  %v1513_v29 = vpack.c.bf16 %v2652_v26, %v2652_v26  ;;  %v2654_v30 = vpop.eup %2653  ;;  %2665 = vpow2.f32 %v1479_v51 }
 0x337   : > { %1498 = vadd.xlane.f32.xlu0 %v1497_v28  ;;  %v1500_v32 = vsel %vm1272_vm3, %v2654_v30, 0.0  ;;  %v1514_v33 = vpack.c.bf16 %v2654_v30, %v2654_v30 }
 0x338   : > { %2476 = vmatmul.mubr.msk.bf16.vlgmr.msra.gmra.mxu1 %vm1272_vm3, %v1513_v29  ;;  %1501 = vadd.xlane.f32.xlu1 %v1500_v32 }
 0x339   : > { %2486 = vmatpush3.bf16.msra.mxu1 %v1614_v35  ;;  %2482 = vmatmul.mubr.msk.bf16.vlgmr.msra.gmra.mxu0 %vm1272_vm3, %v1514_v33 }
 0x33a   : > { %2487 = vmatprep.mubr.msk.bf16.mxu1 %vm2888_vm0, %v2887_v0  ;;  %2492 = vmatpush3.bf16.msra.mxu0 %v1660_v36 }
 0x33b   : > { %2493 = vmatprep.mubr.msk.bf16.mxu0 %vm2888_vm0, %v2887_v0  ;;  %2497 = vmatprep.subr.bf16.mxu1 %v2887_v0 }
 0x33c   : > { %2505 = vmatprep.subr.bf16.mxu0 %v2887_v0 }
 0x33e   : > { %v2656_v37 = vpop.eup %2655 }
 0x33f   : > { %v1503_v38 = vsel %vm1272_vm3, %v2656_v37, 0.0  ;;  %v1515_v39 = vpack.c.bf16 %v2656_v37, %v2656_v37  ;;  %v2658_v41 = vpop.eup %2657 }
 0x340   : > { %1504 = vadd.xlane.f32.xlu0 %v1503_v38  ;;  %v1506_v42 = vsel %vm1272_vm3, %v2658_v41, 0.0  ;;  %v1516_v43 = vpack.c.bf16 %v2658_v41, %v2658_v41  ;;  %v2660_v53 = vpop.eup %2659 }
 0x341   : > { %2488 = vmatmul.mubr.msk.bf16.vlgmr.msra.gmra.mxu1 %vm1272_vm3, %v1515_v39  ;;  %1507 = vadd.xlane.f32.xlu1 %v1506_v42  ;;  %v2662_v54 = vpop.eup %2661  ;;  %v1493_v58 = vmul.f32 0.0, %v2660_v53 }
 0x342   : > { %2501 = vmatprep.mubr.msk.bf16.mxu1 %vm2888_vm0, %v2887_v0  ;;  %2494 = vmatmul.mubr.msk.bf16.vlgmr.msra.gmra.mxu0 %vm1272_vm3, %v1516_v43  ;;  %v2664_v56 = vpop.eup %2663  ;;  %v1495_v59 = vmul.f32 0.0, %v2662_v54 }
 0x343   : > { %2509 = vmatprep.mubr.msk.bf16.mxu0 %vm2888_vm0, %v2887_v0  ;;  %v2666_v57 = vpop.eup %2665  ;;  %v1494_v61 = vmul.f32 0.0, %v2664_v56  ;;  %2498 = vmatpush3.bf16.msra.mxu1 %v2639_v48  ;;  %v2650_v48 = vld [vmem:[%s3427_s9] sm:$0xff]  }
 0x344   : > { %v1496_v1 = vmul.f32 0.0, %v2666_v57  ;;  %2499 = vmatprep.subr.bf16.mxu1 %v2887_v0  ;;  %v2640_v57 = vld [vmem:[%s3424_s6] sm:$0xff]  }
 0x347   : > { %2500 = vmatpush3.bf16.msra.mxu1 %v2640_v57  ;;  %v2370_v57 = vld [vmem:[%s3469_s26] ss:$0 sm:$0xff]  ;;  %s2897_s26 = smov [#allocation12]  }
 0x348   : > { %2513 = vmatprep.subr.bf16.mxu1 %v2887_v0  ;;  %s2791_s28 = sshll.u32 %s2897_s26, 4  ;;  %s2792_s28 = int_to_ptr.vmem [resolvable:$false] %s2791_s28 }
 0x3c0   : > { %v1499_v52 = vpop.xlane.xlu0 %1498 }
 0x3c1   : > { %v1502_v55 = vpop.xlane.xlu1 %1501  ;;  %v1509_v60 = vadd.f32 %v1499_v52, %v1493_v58 }
 0x3c2   : > { %v1510_v2 = vadd.f32 %v1502_v55, %v1494_v61 }
 0x3c3   : > { %2667 = vrcp.f32 %v1509_v60 }
 0x3c9   : > { %v1505_v11 = vpop.xlane.xlu0 %1504 }
 0x3ca   : > { %v1508_v62 = vpop.xlane.xlu1 %1507  ;;  %v1511_v63 = vadd.f32 %v1505_v11, %v1495_v59 }
 0x3cb   : > { %v1512_v3 = vadd.f32 %v1508_v62, %v1496_v1 }
 0x3cc   : > { %2669 = vrcp.f32 %v1511_v63 }
 0x3cd   : > { %2671 = vrcp.f32 %v1510_v2 }
 0x3ce   : > { %2673 = vrcp.f32 %v1512_v3 }
 0x3d0   : > { %v2668_v16 = vpop.eup %2667 }
 0x3d9   : > { %v2670_v19 = vpop.eup %2669 }
 0x3da   : > { %v2672_v22 = vpop.eup %2671 }
 0x3db   : > { %v2674_v26 = vpop.eup %2673 }
 0x3f8   : > { %v1558_v4 = vpop.f32.mrf.mxu1 }
 0x3f9   : > { %v1604_v5 = vpop.f32.mrf.mxu0  ;;  %v1702_v13 = vadd.f32 %v1558_v4, %v1493_v58 }
 0x3fa   : > { %v2477_v6 = vpop.f32.mrf.mxu1  ;;  %v1703_v17 = vadd.f32 %v1604_v5, %v1494_v61 }
 0x3fb   : > { %v2483_v7 = vpop.f32.mrf.mxu0  ;;  %v1710_v23 = vmul.f32 %v2668_v16, %v1702_v13 }
 0x3fc   : > { %v1561_v8 = vpop.f32.mrf.mxu1  ;;  %v1711_v29 = vmul.f32 %v2672_v22, %v1703_v17 }
 0x3fd   : > { %v1607_v10 = vpop.f32.mrf.mxu0 }
 0x3fe   : > { %v2478_v12 = vpop.f32.mrf.mxu1 }
 0x3ff   : > { %v2484_v14 = vpop.f32.mrf.mxu0 }
 0x401   : > { %v1650_v15 = vpop.f32.mrf.mxu1 }
 0x402   : > { %v1704_v18 = vadd.f32 %v1650_v15, %v1495_v59  ;;  %v1696_v20 = vpop.f32.mrf.mxu0 }
 0x403   : > { %v2489_v21 = vpop.f32.mrf.mxu1  ;;  %v1705_v25 = vadd.f32 %v1696_v20, %v1496_v1 }
 0x404   : > { %v1712_v24 = vmul.f32 %v2670_v19, %v1704_v18  ;;  %v2495_v27 = vpop.f32.mrf.mxu0 }
 0x405   : > { %v1653_v28 = vpop.f32.mrf.mxu1  ;;  %v1713_v32 = vmul.f32 %v2674_v26, %v1705_v25 }
 0x406   : > { %v1714_v30 = vcombine.low %v1710_v23, %v1712_v24  ;;  %v1715_v31 = vcombine.high %v1710_v23, %v1712_v24  ;;  %v1699_v33 = vpop.f32.mrf.mxu0  ;;  %v2641_v28 = vld [vmem:[#allocation9 + $0x8] sm:$0xff]  }
 0x407   : > { %v2490_v35 = vpop.f32.mrf.mxu1  ;;  %v1730_v38 = vcombine.low %v1711_v29, %v1713_v32  ;;  %v1731_v39 = vcombine.high %v1711_v29, %v1713_v32  ;;  %2506 = vmatpush3.bf16.msra.mxu0 %v2641_v28  ;;  %v2642_v29 = vld [vmem:[#allocation9] sm:$0xff]   ;;  %v2646_v32 = vld [vmem:[%s3427_s9 + $0x20] sm:$0xff]   ;;  %v2647_v33 = vld [vmem:[%s3427_s9 + $0x18] sm:$0xff]  }
 0x408   : > { %v1722_v36 = vrot.slane %v1714_v30, %v3185_v34  ;;  %v1729_v37 = vrot.slane %v1715_v31, %v3185_v34  ;;  %v2496_v41 = vpop.f32.mrf.mxu0  ;;  %2507 = vmatprep.subr.bf16.mxu0 %v2887_v0  ;;  %v2644_v30 = vld [vmem:[%s3427_s9 + $0x30] sm:$0xff]   ;;  %v2645_v31 = vld [vmem:[%s3427_s9 + $0x28] sm:$0xff]  }
 0x409   : > { %v1738_v42 = vrot.slane %v1730_v38, %v3185_v34  ;;  %v1745_v43 = vrot.slane %v1731_v39, %v3185_v34  ;;  %v2648_v35 = vld [vmem:[%s3427_s9 + $0x10] sm:$0xff]   ;;  %v2364_v41 = vld [vmem:[%s3429_s11] ss:$0 sm:$0xff] }
 0x40b   : > { %v1746_v44 = vcombine.low %v1722_v36, %v1738_v42  ;;  %v1747_v45 = vcombine.high %v1722_v36, %v1738_v42  ;;  %v1762_v46 = vcombine.low %v1729_v37, %v1745_v43  ;;  %v1763_v47 = vcombine.high %v1729_v37, %v1745_v43  ;;  %2508 = vmatpush3.bf16.msra.mxu0 %v2642_v29 }
 0x40d   : > { %v1754_v49 = vrot.slane %v1746_v44, %v3187_v40  ;;  %v1761_v50 = vrot.slane %v1747_v45, %v3187_v40  ;;  %v1770_v51 = vrot.slane %v1762_v46, %v3187_v40  ;;  %v1777_v52 = vrot.slane %v1763_v47, %v3187_v40  ;;  %v2649_v47 = vld [vmem:[%s3427_s9 + $0x8] sm:$0xff]  }
 0x40f   : > { %v1782_v53 = vcombine.low %v1754_v49, %v1761_v50  ;;  %v2359_v54 = vcombine.high %v1754_v49, %v1761_v50  ;;  %v1798_v55 = vcombine.low %v1770_v51, %v1777_v52  ;;  %v2360_v56 = vcombine.high %v1770_v51, %v1777_v52  ;;  %v2366_v49 = vld [vmem:[#allocation10] ss:$0 sm:$0xff] }
 0x411   : > { %v1789_v58 = vrot.slane %v1782_v53, %v3185_v34  ;;  %v1797_v11 = vrot.slane %v2359_v54, %v3185_v34  ;;  %v1805_v59 = vrot.slane %v1798_v55, %v3185_v34  ;;  %v1813_v60 = vrot.slane %v2360_v56, %v3185_v34 }
 0x413   : > { %v1815_v61 = vcombine.high %v1789_v58, %v1797_v11  ;;  %v1831_v62 = vcombine.high %v1805_v59, %v1813_v60  ;;  %v1814_v63 = vcombine.low %v1789_v58, %v1797_v11  ;;  %v1830_v1 = vcombine.low %v1805_v59, %v1813_v60 }
 0x415   : > { %v1829_v2 = vrot.slane %v1815_v61, %v3187_v40  ;;  %v1845_v3 = vrot.slane %v1831_v62, %v3187_v40  ;;  %v1822_v4 = vrot.slane %v1814_v63, %v3187_v40  ;;  %v1838_v5 = vrot.slane %v1830_v1, %v3187_v40 }
 0x417   : > { %v1848_v6 = vcombine.low %v1829_v2, %v1845_v3  ;;  %v1847_v7 = vcombine.high %v1822_v4, %v1838_v5  ;;  %v1849_v8 = vcombine.high %v1829_v2, %v1845_v3  ;;  %v1846_v10 = vcombine.low %v1822_v4, %v1838_v5 }
 0x419   : > { %1855 = vrot.lane.b32.xlu1 %v1848_v6, %s2894_s15  ;;  %1851 = vrot.lane.b32.xlu0 %v1847_v7, %s2895_s0  ;;  %s2382_s15 = sshll.u32 %s2871_s21, 7  ;;  %s608_s0 = scalar_lea.vmem [#allocation12], %s2334_s22 }
 0x41a   : > { %s2181_s14 = scalar_lea.hbm %s3472_s27, %s2382_s15  ;;  %s2793_s21 = scalar_lea.vmem %s2792_s28, 256 }
 0x41d   : > { %1859 = vrot.lane.b32.xlu1 %v1849_v8, %s2896_s29  ;;  %s3468_s29 = sld [smem:[#allocation27_spill]] }
 0x423   : > { %v2365_v43 = vld [vmem:[%s3468_s29] ss:$0 sm:$0xff]  ;;  %s2183_s29 = sshll.u32 %s608_s0, 4  ;;  %s2184_s29 = int_to_ptr.vmem [resolvable:$true] %s2183_s29 }
 0x424   : > { %s2787_s12 = scalar_lea.vmem %s2184_s29, 128  ;;  %p2794_p2 = scmp.lt.s32.totalorder %s2184_s29, %s2792_s28 }
 0x425   : > { %p2788_p5 = scmp.ne.s32.totalorder %s2184_s29, %s2787_s12  ;;  %p2795_p12 = scmp.lt.s32.totalorder %s2793_s21, %s2787_s12 }
 0x427   : > { %p2789_p3 = pnand %p2788_p5, %p3069_p0  ;;  %p2796_p7 = por %p2795_p12, %p2794_p2 }
 0x429   : > { %p2790_p1 = pneg %p2789_p3 }
 0x42b   : > { %p2797_p9 = pnand %p2796_p7, %p2790_p1 }
 0x48b   : > { %v1856_v34 = vpop.permute.xlu1 %1855  ;;  %v1852_v12 = vpop.permute.xlu0 %1851 }
 0x48c   : > { %v1862_v13 = vsel %vm1272_vm3, %v1846_v10, %v1852_v12  ;;  %v2379_v10 = vld [vmem:[%s3470_s17] ss:$0 sm:$0xff] }
 0x48d   : > { %v1864_v15 = vsel %vm1863_vm5, %v1862_v13, %v1856_v34  ;;  %v2380_v12 = vld [vmem:[%s3471_s16] ss:$0 sm:$0xff] }
 0x48f   : > { %v1860_v14 = vpop.permute.xlu1 %1859 }
 0x490   : > { %v1866_v16 = vsel %vm1865_vm6, %v1864_v15, %v1860_v14 }
 0x491   : > { %v1867_v40 = vpack.c.bf16 %v1866_v16, %v1866_v16 }
 0x493   : > { %2502 = vmatmul.mubr.msk.bf16.vlgmr.msra.gmra.mxu1 %vm638_vm1, %v1867_v40 }
 0x494   : > { %2529 = vmatprep.mubr.msk.bf16.mxu1 %vm2888_vm0, %v2887_v0 }
 0x553   : > { %v1921_v17 = vpop.f32.mrf.mxu1 }
 0x554   : > { %v1922_v18 = vadd.f32 %v1921_v17, %v3171_v9  ;;  %v2643_v9 = vld [vmem:[%s3427_s9 + $0x38] sm:$0xff]  }
 0x555   : > { %v2503_v19 = vpop.f32.mrf.mxu1  ;;  %2514 = vmatpush3.bf16.msra.mxu1 %v2643_v9 }
 0x556   : > { %v1927_v20 = vsel %vm638_vm1, %v1922_v18, 0.0  ;;  %2515 = vmatprep.subr.bf16.mxu1 %v2887_v0 }
 0x557   : > { %1928 = vadd.xlane.f32.xlu0 %v1927_v20  ;;  %v1924_v21 = vpop.f32.mrf.mxu1 }
 0x559   : > { %v2504_v22 = vpop.f32.mrf.mxu1  ;;  %2516 = vmatpush3.bf16.msra.mxu1 %v2644_v30 }
 0x55a   : > { %2517 = vmatprep.subr.bf16.mxu1 %v2887_v0 }
 0x55d   : > { %2518 = vmatpush3.bf16.msra.mxu1 %v2645_v31 }
 0x55e   : > { %2519 = vmatprep.subr.bf16.mxu1 %v2887_v0 }
 0x561   : > { %2520 = vmatpush3.bf16.msra.mxu1 %v2646_v32 }
 0x562   : > { %2521 = vmatprep.subr.bf16.mxu1 %v2887_v0 }
 0x565   : > { %2522 = vmatpush3.bf16.msra.mxu1 %v2647_v33 }
 0x566   : > { %2523 = vmatprep.subr.bf16.mxu1 %v2887_v0 }
 0x569   : > { %2524 = vmatpush3.bf16.msra.mxu1 %v2648_v35 }
 0x56a   : > { %2525 = vmatprep.subr.bf16.mxu1 %v2887_v0 }
 0x56d   : > { %2526 = vmatpush3.bf16.msra.mxu1 %v2649_v47 }
 0x56e   : > { %2527 = vmatprep.subr.bf16.mxu1 %v2887_v0 }
 0x571   : > { %2528 = vmatpush3.bf16.msra.mxu1 %v2650_v48 }
 0x5e0   : > { %v1929_v23 = vpop.xlane.xlu0 %1928 }
 0x5e1   : > { %v1931_v24 = vmul.f32 0.03125, %v1929_v23 }
 0x5e3   : > { %v1932_v25 = vsub.f32 %v1922_v18, %v1931_v24 }
 0x5e5   : > { %v1933_v26 = vmul.f32 %v1932_v25, %v1932_v25 }
 0x5e7   : > { %v1934_v27 = vsel %vm638_vm1, %v1933_v26, 0.0 }
 0x5e8   : > { %1935 = vadd.xlane.f32.xlu1 %v1934_v27 }
 0x671   : > { %v1936_v36 = vpop.xlane.xlu1 %1935 }
 0x672   : > { %v1937_v37 = vmul.f32 0.03125, %v1936_v36 }
 0x674   : > { %v1938_v38 = vadd.f32 1e-05, %v1937_v37 }
 0x676   : > { %2675 = vrsqrt.f32 %v1938_v38 }
 0x683   : > { %v2676_v39 = vpop.eup %2675 }
 0x684   : > { %v1940_v42 = vmul.f32 %v2676_v39, %v1932_v25 }
 0x686   : > { %v1948_v44 = vmul.f32 %v2364_v41, %v1940_v42 }
 0x688   : > { %v1956_v45 = vadd.f32 %v2365_v43, %v1948_v44 }
 0x68a   : > { %v1957_v46 = vpack.c.bf16 %v1956_v45, %v1956_v45 }
 0x68c   : > { %2510 = vmatmul.mubr.msk.bf16.vlgmr.msra.gmra.mxu0 %vm638_vm1, %v1957_v46 }
 0x74c   : > { %v2018_v50 = vpop.f32.mrf.mxu0 }
 0x74d   : > { %v2019_v51 = vadd.f32 %v2366_v49, %v2018_v50 }
 0x74e   : > { %v2511_v52 = vpop.f32.mrf.mxu0 }
 0x74f   : > { %v2024_v53 = vmax.f32 %v2019_v51, 0.0 }
 0x750   : > { %v2021_v54 = vpop.f32.mrf.mxu0 }
 0x751   : > { %v2025_v55 = vpack.c.bf16 %v2024_v53, %v2024_v53 }
 0x752   : > { %v2512_v56 = vpop.f32.mrf.mxu0 }
 0x753   : > { %2530 = vmatmul.mubr.bf16.vlgmr.msra.gmra.mxu1 %v2025_v55 }
 0x813   : > { %v2131_v58 = vpop.f32.mrf.mxu1 }
 0x814   : > { %v2132_v0 = vadd.f32 %v2370_v57, %v2131_v58 }
 0x815   : > { %v2531_v11 = vpop.f32.mrf.mxu1 }
 0x816   : > { %v2137_v59 = vadd.f32 %v2132_v0, %v1956_v45 }
 0x817   : > { %v2134_v60 = vpop.f32.mrf.mxu1 }
 0x818   : > { %v2138_v61 = vsel %vm638_vm1, %v2137_v59, 0.0 }
 0x819   : > { %2139 = vadd.xlane.f32.xlu0 %v2138_v61  ;;  %v2532_v62 = vpop.f32.mrf.mxu1 }
 0x8a2   : > { %v2140_v63 = vpop.xlane.xlu0 %2139 }
 0x8a3   : > { %v2141_v1 = vmul.f32 0.03125, %v2140_v63 }
 0x8a5   : > { %v2142_v2 = vsub.f32 %v2137_v59, %v2141_v1 }
 0x8a7   : > { %v2143_v3 = vmul.f32 %v2142_v2, %v2142_v2 }
 0x8a9   : > { %v2144_v4 = vsel %vm638_vm1, %v2143_v3, 0.0 }
 0x8aa   : > { %2145 = vadd.xlane.f32.xlu0 %v2144_v4 }
 0x933   : > { %v2146_v5 = vpop.xlane.xlu0 %2145 }
 0x934   : > { %v2147_v6 = vmul.f32 0.03125, %v2146_v5 }
 0x936   : > { %v2148_v7 = vadd.f32 1e-05, %v2147_v6 }
 0x938   : > { %2677 = vrsqrt.f32 %v2148_v7 }
 0x945   : > { %v2678_v8 = vpop.eup %2677 }
 0x946   : > { %v2150_v34 = vmul.f32 %v2678_v8, %v2142_v2 }
 0x948   : > { %v2158_v13 = vmul.f32 %v2379_v10, %v2150_v34 }
 0x94a   : > { %v2166_v14 = vadd.f32 %v2380_v12, %v2158_v13 }
 0x94c   : > { %2167 = vst.msk [vmem:[%s608_s0] sm:$0xff] %vm638_vm1, %v2166_v14 }
 0x94d   : > { %2800 = shalt.err (!%p2797_p9)
}
 0x94e   : > { %s2801_s22 = scalar_lea.hbm %s2181_s14, 128  ;;  %s2805_s17 = scalar_lea.hbm %s3472_s27, 256 }
 0x94f   : > { %p2802_p8 = scmp.ne.s32.totalorder %s2181_s14, %s2801_s22  ;;  %p2806_p13 = scmp.lt.s32.totalorder %s2181_s14, %s3472_s27 }
 0x950   : > { %p2807_p4 = scmp.lt.s32.totalorder %s2805_s17, %s2801_s22 }
 0x951   : > { %p2803_p11 = pnand %p2802_p8, %p3069_p0 }
 0x952   : > { %p2808_p5 = por %p2807_p4, %p2806_p13 }
 0x953   : > { %p2804_p10 = pneg %p2803_p11 }
 0x955   : > { %p2809_p3 = pnand %p2808_p5, %p2804_p10 }
 0x957   : > { %2812 = shalt.err (!%p2809_p3)
}
 0x958   : > { %2545 = dma.vmem_to_hbm [thread:$0]  (%p3069_p0), %s2184_s29, 128, %s2181_s14, %s2169_s1  }
 0x959 PF: > { %s3473_s16 = sld [smem:[#allocation18_spill]]  ;;  %p3475_p1 = scmp.ge.s32.totalorder %s2879_s23, 2 }
 0x95b   : > { %p2562_p2 = pnand %p3475_p1, %p3023_p6 }
 0x95d   : > { %p2563_p12 = pneg %p2562_p2 }
 0x95f   : > { %s2195_s0 = sand.u32 1, %s3473_s16  }
 0x960   : > { %s2196_s7 = scalar_lea.sflag [#allocation6], %s2195_s0 }
 0x961   : > { %2854 = dma.done.wait (%p2563_p12), %s2196_s7, 128  }
 0x962   : > { %2856 = vsyncadd (%p2563_p12), %s2196_s7, 4294967168  ;;  %s35_s23 = sadd.s32 1, %s2879_s23   ;;  %s3476_s21 = sld [smem:[#allocation19_spill]] }
 0x963   : > { %p32_p7 = scmp.ge.s32.totalorder %s35_s23, 4   ;;  %s3477_s22 = sld [smem:[#allocation21_spill]] }
 0x964   : > { %s3478_s18 = smov %s2863_s19  ;;  %s3479_s19 = smov %s2867_s20 }
 0x965   : > { %s3480_s20 = smov %s3078_s25  ;;  %34 = sbr.rel (!%p32_p7) target bundleno = 19 (0x13), region = 153 }
 0x96a   :  { %2201 = vsyncpa [#allocation5], 1 }
 0x96b   :  { %2203 = vsyncpa [#allocation5 + $0x1], 1 }
 0x96c   :  { %2204 = vsyncpa [#allocation8], 1 }
 0x96d   :  { %2206 = vsyncpa [#allocation8 + $0x1], 1 }
 0x96e   :  { %2207 = vsyncpa [#allocation11], 1 }
 0x96f   :  { %2208 = vsyncpa [#allocation6], 1 }
 0x970   :  { %2210 = vsyncpa [#allocation6 + $0x1], 1 }

// kernel: tpu_custom_call.1
= control target key start
LH: loop header
LB: loop body
LE: loop exit
PB: predicated region body
PF: predicated region fallthrough
CT: control target
= control target key end

     0   :  { %s3418_s0 = inlined_call_operand.hbm [shape: bf16[2,8,32], index: 0, kind: input, shape index: {}]   ;;  %s3419_s1 = inlined_call_operand.hbm [shape: bf16[2,8,32], index: 1, kind: input, shape index: {}]   ;;  %s3420_s2 = inlined_call_operand.vmem [shape: f32[2,8,32], index: 2, kind: input, shape index: {}]   ;;  %s3421_s3 = inlined_call_operand.vmem [shape: bf16[32,32], index: 3, kind: input, shape index: {}]   ;;  %s3422_s4 = inlined_call_operand.vmem [shape: bf16[32,32], index: 4, kind: input, shape index: {}]   ;;  %s3423_s5 = inlined_call_operand.vmem [shape: bf16[32,32], index: 5, kind: input, shape index: {}]   ;;  %s3424_s6 = inlined_call_operand.vmem [shape: bf16[32,32], index: 6, kind: input, shape index: {}]   ;;  %s3425_s7 = inlined_call_operand.hbm [shape: bf16[32,128], index: 7, kind: input, shape index: {}]   ;;  %s3426_s8 = inlined_call_operand.hbm [shape: f32[1,128], index: 8, kind: input, shape index: {}]   ;;  %s3427_s9 = inlined_call_operand.vmem [shape: bf16[128,32], index: 9, kind: input, shape index: {}]   ;;  %s3428_s10 = inlined_call_operand.vmem [shape: f32[1,32], index: 10, kind: input, shape index: {}]   ;;  %s3429_s11 = inlined_call_operand.vmem [shape: f32[1,32], index: 11, kind: input, shape index: {}]   ;;  %s3430_s12 = inlined_call_operand.vmem [shape: f32[1,32], index: 12, kind: input, shape index: {}]   ;;  %s3431_s13 = inlined_call_operand.vmem [shape: f32[1,32], index: 13, kind: input, shape index: {}]   ;;  %s3432_s14 = inlined_call_operand.vmem [shape: f32[1,32], index: 14, kind: input, shape index: {}]   ;;  %s3433_s15 = inlined_call_operand.hbm [shape: f32[2,8,32], index: 15, kind: output, shape index: {}]  }
   0x1   :  { %3440 = sst [smem:[#allocation22_spill]] %s3418_s0 }
   0x2   :  { %3441 = sst [smem:[#allocation23_spill]] %s3419_s1 }
   0x3   :  { %3442 = sst [smem:[#allocation24_spill]] %s3425_s7 }
   0x4   :  { %3443 = sst [smem:[#allocation25_spill]] %s3426_s8 }
   0x5   :  { %3444 = sst [smem:[#allocation26_spill]] %s3428_s10 }
   0x6   :  { %3445 = sst [smem:[#allocation27_spill]] %s3430_s12 }
   0x7   :  { %3446 = sst [smem:[#allocation28_spill]] %s3431_s13 }
   0x8   :  { %3447 = sst [smem:[#allocation29_spill]] %s3432_s14 }
   0x9   :  { %3448 = sst [smem:[#allocation30_spill]] %s3433_s15 }
   0xa   :  { %20 = vsyncpa [#allocation5], 0 }
   0xb   :  { %22 = vsyncpa [#allocation5 + $0x1], 0 }
   0xc   :  { %23 = vsyncpa [#allocation8], 0 }
   0xd   :  { %25 = vsyncpa [#allocation8 + $0x1], 0 }
   0xe   :  { %26 = vsyncpa [#allocation11], 0 }
   0xf   :  { %27 = vsyncpa [#allocation6], 0 }
  0x10   :  { %29 = vsyncpa [#allocation6 + $0x1], 0  ;;  %s2978_s18 = smov 0   ;;  %s2980_s19 = smov 0  }
  0x11   :  { %s2982_s20 = smov 0   ;;  %s2984_s21 = smov 0  }
  0x12   :  { %s2986_s22 = smov 0   ;;  %s2988_s23 = smov 0  }
  0x13 LB: > { %3449 = sst [smem:[#allocation18_spill]] %s2859_s18  ;;  %s3009_s24 = sadd.s32 4294967295, %s2879_s23   ;;  %s2879_s23 = sphi %s2988_s23, %s35_s23   ;;  %s2875_s22 = sphi %s2986_s22, %s3477_s22   ;;  %s2871_s21 = sphi %s2984_s21, %s3476_s21   ;;  %s2867_s20 = sphi %s2982_s20, %s3480_s20   ;;  %s2863_s19 = sphi %s2980_s19, %s3479_s19   ;;  %s2859_s18 = sphi %s2978_s18, %s3478_s18  }
  0x14   : > { %3450 = sst [smem:[#allocation19_spill]] %s2875_s22  ;;  %s2320_s25 = sadd.s32 4294967294, %s2879_s23  }
  0x15   : > { %p67_p0 = scmp.ne.s32.totalorder %s2863_s19, %s2859_s18  ;;  %p3437_p1 = scmp.eq.s32.totalorder %s3009_s24, 0 }
  0x16   : > { %p405_p3 = scmp.eq.s32.totalorder %s2320_s25, 1  ;;  %p2321_p5 = scmp.ge.s32.totalorder %s2879_s23, 1 }
  0x17   : > { %p3018_p4 = por %p3437_p1, %p67_p0  ;;  %p412_p7 = scmp.lt.s32.totalorder %s2879_s23, 3 }
  0x18   : > { %p3023_p6 = por %p405_p3, %p67_p0  ;;  %s2881_s29 = smov [#allocation9]  }
  0x19   : > { %p3028_p8 = pnand %p2321_p5, %p412_p7  ;;  %s436_s30 = sshll.u32 %s2881_s29, 4  ;;  %s437_s30 = int_to_ptr.vmem [resolvable:$true] %s436_s30 }
  0x1a   : > { %s3452_s27 = scalar_select %p3023_p6, 1, 0 }
  0x1b   : > { %p2547_p9 = pneg %p3028_p8  ;;  %s2882_s17 = smov [#allocation10]  }
  0x1c   : > { %3453 = sst [smem:[#allocation20_spill]] %s3452_s27  ;;  %s450_s25 = sshll.u32 %s2882_s17, 4  ;;  %s451_s25 = int_to_ptr.vmem [resolvable:$true] %s450_s25 }
  0x1d   : > { %p3037_p11 = pnand %p2547_p9, %p3437_p1  ;;  %s2690_s27 = scalar_lea.vmem %s437_s30, 256 }
  0x1e   : > { %p2691_p13 = scmp.ne.s32.totalorder %s437_s30, %s2690_s27  ;;  %p2698_p5 = scmp.lt.s32.totalorder %s437_s30, %s437_s30 }
  0x1f   : > { %p2681_p12 = pneg %p3037_p11  ;;  %p2699_p7 = scmp.lt.s32.totalorder %s2690_s27, %s2690_s27 }
  0x21   : > { %p2693_p0 = pnand %p2691_p13, %p2681_p12  ;;  %p2700_p10 = por %p2699_p7, %p2698_p5 }
  0x23   : > { %p2694_p3 = pneg %p2693_p0 }
  0x25   : > { %p2701_p9 = pnand %p2700_p10, %p2694_p3 }
  0x27   : > { %2704 = shalt.err (!%p2701_p9)
}
  0x28   : > { %s2883_s29 = smov 64   ;;  %s2884_s18 = smov 4  }
  0x29   : > { %s3456_s7 = sld [smem:[#allocation24_spill]]  ;;  %s2716_s14 = scalar_lea.vmem %s451_s25, 16 }
  0x2a   : > { %p2717_p1 = scmp.ne.s32.totalorder %s451_s25, %s2716_s14  ;;  %s2723_s13 = scalar_lea.vmem %s451_s25, 32 }
  0x2b   : > { %p2724_p2 = scmp.lt.s32.totalorder %s451_s25, %s451_s25  ;;  %p2725_p5 = scmp.lt.s32.totalorder %s2723_s13, %s2716_s14 }
  0x2c   : > { %p2719_p13 = pnand %p2717_p1, %p2681_p12 }
  0x2d   : > { %p2726_p10 = por %p2725_p5, %p2724_p2 }
  0x2e   : > { %p2720_p0 = pneg %p2719_p13 }
  0x2f   : > { %2550 = dma.hbm_to_vmem [thread:$0]  (!%p3037_p11), %s3456_s7, 256, %s437_s30, [#allocation8], %s2883_s29, %s2883_s29, %s2884_s18  }
  0x30   : > { %p2727_p3 = pnand %p2726_p10, %p2720_p0 }
  0x32   : > { %2730 = shalt.err (!%p2727_p3)
}
  0x33   : > { %s3457_s8 = sld [smem:[#allocation25_spill]]  ;;  %s47_s13 = sadd.s32 1, %s2875_s22 }
  0x34   : > { %s54_s14 = sadd.s32 1, %s2867_s20  ;;  %p49_p1 = scmp.ge.s32.totalorder %s47_s13, 2 }
  0x35   : > { %p61_p2 = scmp.ne.s32.totalorder %s2867_s20, %s2863_s19  ;;  %p62_p12 = scmp.eq.s32.totalorder %s2879_s23, 0 }
  0x36   : > { %p2567_p7 = scmp.lt.s32.totalorder %s2879_s23, 2  ;;  %s3482_s13 = smov (%p49_p1, %s47_s13), 0 }
  0x37   : > { %3458 = sst [smem:[#allocation21_spill]] %s3482_s13  ;;  %p63_p9 = por %p62_p12, %p61_p2 }
  0x38   : > { %p3459_p13 = scmp.eq.s32.totalorder %s3009_s24, 1  ;;  %s51_s15 = ssub.s32 %s2875_s22, %s3482_s13 }
  0x39   : > { %2553 = dma.hbm_to_vmem [thread:$0]  (!%p3037_p11), %s3457_s8, 16, %s451_s25, [#allocation11]  }
  0x3a   : > { %p3069_p0 = por %p3459_p13, %p61_p2  ;;  %s479_s18 = sand.u32 1, %s2867_s20  }
  0x3b   : > { %p52_p5 = scmp.eq.s32.totalorder %s51_s15, 0  ;;  %s2325_s30 = sshll.u32 %s479_s18, 2 }
  0x3c   : > { %s2326_s16 = sshll.u32 %s2875_s22, 6  ;;  %s3461_s0 = sld [smem:[#allocation22_spill]] }
  0x3d   : > { %s3078_s25 = scalar_select %p52_p5, %s2867_s20, %s54_s14  }
  0x3e   : > { %s483_s7 = scalar_lea.vmem [#allocation4], %s2325_s30  ;;  %p3085_p11 = pnand %p2567_p7, %p63_p9 }
  0x3f   : > { %s490_s8 = sshll.u32 %s483_s7, 4  ;;  %s3463_s1 = sld [smem:[#allocation23_spill]]  ;;  %s491_s8 = int_to_ptr.vmem [resolvable:$true] %s490_s8 }
  0x40   : > { %s480_s14 = scalar_lea.sflag [#allocation5], %s479_s18  ;;  %p2733_p10 = pneg %p3085_p11 }
  0x41   : > { %s2744_s29 = scalar_lea.vmem %s491_s8, 64  ;;  %s2885_s7 = smov [#allocation4]  }
  0x42   : > { %s488_s27 = scalar_lea.hbm %s3461_s0, %s2326_s16  ;;  %p2745_p3 = scmp.ne.s32.totalorder %s491_s8, %s2744_s29 }
  0x43   : > { %s2749_s17 = sshll.u32 %s2885_s7, 4  ;;  %s2750_s17 = int_to_ptr.vmem [resolvable:$false] %s2749_s17 }
  0x44   : > { %p2747_p1 = pnand %p2745_p3, %p2733_p10  ;;  %s2751_s0 = scalar_lea.vmem %s2750_s17, 128 }
  0x45   : > { %s3092_s22 = scalar_lea.hbm %s3463_s1, %s2326_s16  ;;  %p2752_p12 = scmp.lt.s32.totalorder %s491_s8, %s2750_s17 }
  0x46   : > { %p2748_p2 = pneg %p2747_p1  ;;  %p2753_p7 = scmp.lt.s32.totalorder %s2751_s0, %s2744_s29 }
  0x48   : > { %p2754_p9 = por %p2753_p7, %p2752_p12 }
  0x4a   : > { %p2755_p13 = pnand %p2754_p9, %p2748_p2 }
  0x4c   : > { %2758 = shalt.err (!%p2755_p13)
}
  0x4d   : > { %2557 = dma.hbm_to_vmem [thread:$0]  (!%p3085_p11), %s488_s27, 64, %s491_s8, %s480_s14  }
  0x4e   : > { %s497_s13 = sand.u32 1, %s2879_s23   ;;  %s501_s18 = scalar_lea.vmem [#allocation7], %s2325_s30 }
  0x4f   : > { %s508_s16 = sshll.u32 %s501_s18, 4  ;;  %s498_s15 = scalar_lea.sflag [#allocation8], %s497_s13  ;;  %s509_s16 = int_to_ptr.vmem [resolvable:$true] %s508_s16 }
  0x50   : > { %s2772_s1 = scalar_lea.vmem %s509_s16, 64  ;;  %s2886_s0 = smov [#allocation7]  }
  0x51   : > { %p2773_p5 = scmp.ne.s32.totalorder %s509_s16, %s2772_s1  ;;  %s2777_s29 = sshll.u32 %s2886_s0, 4  ;;  %s2778_s29 = int_to_ptr.vmem [resolvable:$false] %s2777_s29 }
  0x52   : > { %s2779_s7 = scalar_lea.vmem %s2778_s29, 128  ;;  %p2780_p2 = scmp.lt.s32.totalorder %s509_s16, %s2778_s29 }
  0x53   : > { %p2775_p3 = pnand %p2773_p5, %p2733_p10  ;;  %p2781_p12 = scmp.lt.s32.totalorder %s2779_s7, %s2772_s1 }
  0x55   : > { %p2776_p1 = pneg %p2775_p3  ;;  %p2782_p7 = por %p2781_p12, %p2780_p2 }
  0x57   : > { %p2783_p9 = pnand %p2782_p7, %p2776_p1 }
  0x59   : > { %2786 = shalt.err (!%p2783_p9)
}
  0x5a   : > { %2560 = dma.hbm_to_vmem [thread:$0]  (!%p3085_p11), %s3092_s22, 64, %s509_s16, %s498_s15  }
  0x5b   : > { %527 = sbr.rel (%p3028_p8) target bundleno = 2393 (0x959), region = 80  ;;  %s3111_s8 = sand.u32 (!%p3028_p8), 1, %s2863_s19  }
  0x5c   : > { %s2330_s30 = sshll.u32 (!%p3028_p8), %s3111_s8, 2  ;;  %s530_s27 = scalar_lea.sflag (!%p3028_p8), [#allocation5], %s3111_s8 }
  0x5d   : > { %s533_s14 = scalar_lea.vmem (!%p3028_p8), [#allocation4], %s2330_s30 }
  0x60   : > { %2838 = dma.done.wait (%p3018_p4), %s530_s27, 64  }
  0x61   : > { %2840 = vsyncadd (%p3018_p4), %s530_s27, 4294967232  ;;  %s538_s1 = sand.u32 1, %s3009_s24   ;;  %s542_s22 = scalar_lea.vmem [#allocation7], %s2330_s30 }
  0x62   : > { %s539_s12 = scalar_lea.sflag [#allocation8], %s538_s1 }
  0x63   : > { %2842 = dma.done.wait (%p3018_p4), %s539_s12, 64  }
  0x64   : > { %2844 = vsyncadd (%p3018_p4), %s539_s12, 4294967232  ;;  %p3464_p8 = scmp.eq.s32.totalorder %s3009_s24, 0 }
  0x66   : > { %2846 = dma.done.wait (%p3464_p8), [#allocation8], 256   ;;  %p3465_p11 = pmov %p3464_p8 }
  0x67   : > { %p3466_p10 = pmov %p3464_p8 }
  0x68   : > { %2848 = vsyncadd (%p3465_p11), [#allocation8], 4294967040 }
  0x69   : > { %2850 = dma.done.wait (%p3466_p10), [#allocation11], 16   ;;  %p3467_p13 = pmov %p3464_p8 }
  0x6a   : > { %v2887_v0 = vmov 0.0   ;;  %vm2888_vm0 = vmmov 0   ;;  %p609_p4 = scmp.lt.s32.totalorder %s2871_s21, 1  ;;  %v2633_v1 = vld [vmem:[%s3421_s3 + $0x8] sm:$0xff]   ;;  %v2634_v2 = vld [vmem:[%s3421_s3] sm:$0xff]   ;;  %vm638_vm1 = vcmask 261120   ;;  %v757_v26 = vlaneseq }
  0x6b   : > { %2852 = vsyncadd (%p3467_p13), [#allocation11], 4294967280  ;;  %2425 = vmatprep.subr.bf16.mxu0 %v2887_v0  ;;  %2429 = vmatprep.mubr.msk.bf16.mxu0 %vm2888_vm0, %v2887_v0  ;;  %v621_v3 = vld [vmem:[%s533_s14] sm:$0xf]  ;;  %v2635_v4 = vld [vmem:[%s3422_s4 + $0x8] sm:$0xff]   ;;  %s2890_s28 = smov 120  }
  0x6c   : > { %2449 = vmatprep.subr.bf16.mxu1 %v2887_v0  ;;  %2451 = vmatprep.mubr.msk.bf16.mxu1 %vm2888_vm0, %v2887_v0  ;;  %s610_s13 = scalar_select %p609_p4, %s2871_s21, 1  ;;  %v2636_v5 = vld [vmem:[%s3422_s4] sm:$0xff]   ;;  %v682_v6 = vld [vmem:[%s542_s22] sm:$0xf]  ;;  %v2892_v24 = vmov 1983009808  }
  0x6d   : > { %2426 = vmatpush3.bf16.msra.mxu0 %v2633_v1  ;;  %v2637_v7 = vld [vmem:[%s3423_s5 + $0x8] sm:$0xff]   ;;  %v2638_v8 = vld [vmem:[%s3423_s5] sm:$0xff]   ;;  %s2889_s22 = smov 104   ;;  %s2891_s24 = smov 112   ;;  %v755_v25 = vunpack.c.l.s4 %v2892_v24  ;;  %v2893_v27 = vmov 1934713408  }
  0x6e   : > { %2427 = vmatprep.subr.bf16.mxu0 %v2887_v0  ;;  %s2335_s15 = sshll.u32 %s610_s13, 3  ;;  %v787_v28 = vunpack.c.l.s4 %v2893_v27  ;;  %v758_v30 = vshrl.u32 %v757_v26, 7  ;;  %vm892_vm2 = vcmask 60416   ;;  %vm1272_vm3 = vcmask 64512   ;;  %s2895_s0 = smov 8  }
  0x6f   : > { %s615_s1 = scalar_lea.vmem %s3420_s2, %s2335_s15  ;;  %v756_v29 = vunpack.c.0.s8 %v755_v25  ;;  %vm1520_vm4 = vcmask 1043456   ;;  %s2894_s15 = smov 16   ;;  %vm1863_vm5 = vcmask 130048   ;;  %vm1865_vm6 = vcmask 195584  }
  0x70   : > { %v3171_v9 = vld [vmem:[%s615_s1] sm:$0xff]  ;;  %v788_v33 = vunpack.c.0.s8 %v787_v28  ;;  %s2896_s29 = smov 24   ;;  %s3469_s26 = sld [smem:[#allocation26_spill]] }
  0x71   : > { %2428 = vmatpush3.bf16.msra.mxu0 %v2634_v2  ;;  %v1052_v10 = vpack.c.bf16 %v3171_v9, %v3171_v9  ;;  %v3185_v34 = vsub.s32 %v756_v29, %v758_v30  ;;  %s3470_s17 = sld [smem:[#allocation28_spill]]  ;;  %s2169_s1 = scalar_lea.sflag [#allocation6], %s3111_s8 }
  0x72   : > { %2433 = vmatprep.subr.bf16.mxu0 %v2887_v0  ;;  %v3187_v40 = vsub.s32 %v788_v33, %v758_v30  ;;  %s3471_s16 = sld [smem:[#allocation29_spill]] }
  0x73   : > { %s3472_s27 = sld [smem:[#allocation30_spill]] }
  0x74   : > { %2430 = vmatmul.mubr.msk.bf16.vlgmr.msra.gmra.mxu0 %vm638_vm1, %v621_v3 }
  0x75   : > { %2434 = vmatpush3.bf16.msra.mxu0 %v2635_v4  ;;  %2437 = vmatprep.mubr.msk.bf16.mxu0 %vm2888_vm0, %v2887_v0 }
  0x76   : > { %2435 = vmatprep.subr.bf16.mxu0 %v2887_v0 }
  0x79   : > { %2436 = vmatpush3.bf16.msra.mxu0 %v2636_v5 }
  0x7a   : > { %2441 = vmatprep.subr.bf16.mxu0 %v2887_v0 }
  0x7c   : > { %2438 = vmatmul.mubr.msk.bf16.vlgmr.msra.gmra.mxu0 %vm638_vm1, %v682_v6 }
  0x7d   : > { %2442 = vmatpush3.bf16.msra.mxu0 %v2637_v7  ;;  %2445 = vmatprep.mubr.msk.bf16.mxu0 %vm2888_vm0, %v2887_v0 }
  0x7e   : > { %2443 = vmatprep.subr.bf16.mxu0 %v2887_v0 }
  0x81   : > { %2444 = vmatpush3.bf16.msra.mxu0 %v2638_v8 }
  0x82   : > { %2455 = vmatprep.subr.bf16.mxu0 %v2887_v0 }
  0x84   : > { %2446 = vmatmul.mubr.msk.bf16.vlgmr.msra.gmra.mxu0 %vm638_vm1, %v1052_v10 }
  0x85   : > { %2457 = vmatprep.mubr.msk.bf16.mxu0 %vm2888_vm0, %v2887_v0 }
 0x134   : > { %v3180_v11 = vpop.f32.mrf.mxu0 }
 0x136   : > { %v2431_v12 = vpop.f32.mrf.mxu0 }
 0x138   : > { %v679_v13 = vpop.f32.mrf.mxu0 }
 0x13a   : > { %v2432_v14 = vpop.f32.mrf.mxu0 }
 0x13c   : > { %v736_v15 = vpop.f32.mrf.mxu0 }
 0x13d   : > { %749 = vrot.lane.b32.xlu1 %v736_v15, %s2889_s22  ;;  %743 = vrot.lane.b32.xlu0 %v736_v15, %s2890_s28 }
 0x13e   : > { %v2439_v16 = vpop.f32.mrf.mxu0 }
 0x140   : > { %v739_v17 = vpop.f32.mrf.mxu0 }
 0x141   : > { %746 = vrot.lane.b32.xlu0 %v736_v15, %s2891_s24 }
 0x142   : > { %v2440_v18 = vpop.f32.mrf.mxu0 }
 0x144   : > { %v1107_v19 = vpop.f32.mrf.mxu0 }
 0x145   : > { %v1113_v20 = vmul.f32 0.17677669, %v1107_v19 }
 0x146   : > { %v2447_v21 = vpop.f32.mrf.mxu0 }
 0x147   : > { %1118 = vrot.lane.b32.xlu0 %v1113_v20, %s2891_s24  ;;  %1115 = vrot.lane.b32.xlu1 %v1113_v20, %s2890_s28 }
 0x148   : > { %v1110_v22 = vpop.f32.mrf.mxu0 }
 0x14a   : > { %v2448_v23 = vpop.f32.mrf.mxu0 }
 0x14b   : > { %898 = vrot.lane.b32.xlu0 %v3180_v11, %s2890_s28  ;;  %1121 = vrot.lane.b32.xlu1 %v1113_v20, %s2889_s22 }
 0x14f   : > { %904 = vrot.lane.b32.xlu0 %v3180_v11, %s2889_s22  ;;  %901 = vrot.lane.b32.xlu1 %v3180_v11, %s2891_s24  ;;  %s2334_s22 = sshll.u32 %s3111_s8, 3 }
 0x1af   : > { %v750_v31 = vpop.permute.xlu1 %749  ;;  %v744_v32 = vpop.permute.xlu0 %743 }
 0x1b0   : > { %v768_v35 = vcombine.low %v744_v32, %v750_v31  ;;  %v769_v36 = vcombine.high %v744_v32, %v750_v31 }
 0x1b2   : > { %v776_v41 = vrot.slane %v768_v35, %v3185_v34  ;;  %v783_v42 = vrot.slane %v769_v36, %v3185_v34 }
 0x1b3   : > { %v747_v37 = vpop.permute.xlu0 %746 }
 0x1b4   : > { %v752_v38 = vcombine.low %v736_v15, %v747_v37  ;;  %v753_v39 = vcombine.high %v736_v15, %v747_v37 }
 0x1b6   : > { %v760_v43 = vrot.slane %v752_v38, %v3185_v34  ;;  %v767_v44 = vrot.slane %v753_v39, %v3185_v34 }
 0x1b8   : > { %v784_v45 = vcombine.low %v760_v43, %v776_v41  ;;  %v785_v46 = vcombine.high %v760_v43, %v776_v41  ;;  %v800_v47 = vcombine.low %v767_v44, %v783_v42  ;;  %v801_v48 = vcombine.high %v767_v44, %v783_v42 }
 0x1b9   : > { %v1119_v49 = vpop.permute.xlu0 %1118  ;;  %v1116_v50 = vpop.permute.xlu1 %1115 }
 0x1ba   : > { %v792_v51 = vrot.slane %v784_v45, %v3187_v40  ;;  %v799_v52 = vrot.slane %v785_v46, %v3187_v40  ;;  %v808_v53 = vrot.slane %v800_v47, %v3187_v40  ;;  %v815_v54 = vrot.slane %v801_v48, %v3187_v40 }
 0x1bb   : > { %v1124_v59 = vcombine.low %v1113_v20, %v1119_v49  ;;  %v1125_v60 = vcombine.high %v1113_v20, %v1119_v49 }
 0x1bc   : > { %v820_v55 = vcombine.low %v792_v51, %v799_v52  ;;  %v2342_v56 = vcombine.high %v792_v51, %v799_v52  ;;  %v836_v57 = vcombine.low %v808_v53, %v815_v54  ;;  %v2343_v58 = vcombine.high %v808_v53, %v815_v54 }
 0x1bd   : > { %v1122_v61 = vpop.permute.xlu1 %1121  ;;  %v899_v3 = vpop.permute.xlu0 %898  ;;  %v1132_v12 = vrot.slane %v1124_v59, %v3185_v34  ;;  %v1139_v13 = vrot.slane %v1125_v60, %v3185_v34 }
 0x1be   : > { %v827_v62 = vrot.slane %v820_v55, %v3185_v34  ;;  %v835_v63 = vrot.slane %v2342_v56, %v3185_v34  ;;  %v843_v1 = vrot.slane %v836_v57, %v3185_v34  ;;  %v851_v2 = vrot.slane %v2343_v58, %v3185_v34 }
 0x1bf   : > { %v1140_v4 = vcombine.low %v1116_v50, %v1122_v61  ;;  %v1141_v5 = vcombine.high %v1116_v50, %v1122_v61 }
 0x1c0   : > { %v852_v6 = vcombine.low %v827_v62, %v835_v63  ;;  %v853_v7 = vcombine.high %v827_v62, %v835_v63  ;;  %v868_v8 = vcombine.low %v843_v1, %v851_v2  ;;  %v869_v10 = vcombine.high %v843_v1, %v851_v2 }
 0x1c1   : > { %v1148_v14 = vrot.slane %v1140_v4, %v3185_v34  ;;  %v1155_v15 = vrot.slane %v1141_v5, %v3185_v34  ;;  %v905_v32 = vpop.permute.xlu0 %904  ;;  %v902_v33 = vpop.permute.xlu1 %901 }
 0x1c2   : > { %v860_v16 = vrot.slane %v852_v6, %v3187_v40  ;;  %v867_v17 = vrot.slane %v853_v7, %v3187_v40  ;;  %v876_v18 = vrot.slane %v868_v8, %v3187_v40  ;;  %v883_v19 = vrot.slane %v869_v10, %v3187_v40 }
 0x1c3   : > { %v1156_v20 = vcombine.low %v1132_v12, %v1148_v14  ;;  %v1157_v21 = vcombine.high %v1132_v12, %v1148_v14  ;;  %v1172_v22 = vcombine.low %v1139_v13, %v1155_v15  ;;  %v1173_v23 = vcombine.high %v1139_v13, %v1155_v15 }
 0x1c4   : > { %v884_v24 = vcombine.low %v860_v16, %v876_v18  ;;  %v885_v25 = vcombine.high %v860_v16, %v876_v18  ;;  %v886_v26 = vcombine.low %v867_v17, %v883_v19  ;;  %v887_v27 = vcombine.high %v867_v17, %v883_v19 }
 0x1c5   : > { %v1164_v28 = vrot.slane %v1156_v20, %v3187_v40  ;;  %v1171_v29 = vrot.slane %v1157_v21, %v3187_v40  ;;  %v1180_v30 = vrot.slane %v1172_v22, %v3187_v40  ;;  %v1187_v31 = vrot.slane %v1173_v23, %v3187_v40 }
 0x1c6   : > { %v888_v35 = vpack.c.bf16 %v884_v24, %v884_v24  ;;  %v889_v36 = vpack.c.bf16 %v885_v25, %v885_v25  ;;  %v890_v37 = vpack.c.bf16 %v886_v26, %v886_v26  ;;  %v891_v38 = vpack.c.bf16 %v887_v27, %v887_v27 }
 0x1c7   : > { %v1192_v39 = vcombine.low %v1164_v28, %v1171_v29  ;;  %v2349_v41 = vcombine.high %v1164_v28, %v1171_v29  ;;  %v1208_v42 = vcombine.low %v1180_v30, %v1187_v31  ;;  %v2350_v43 = vcombine.high %v1180_v30, %v1187_v31 }
 0x1c8   : > { %893 = vst.msk [vmem:[#allocation2] sm:$0xf] %vm892_vm2, %v888_v35  ;;  %894 = vst.msk [vmem:[#allocation2 + $0x4] sm:$0xf] %vm892_vm2, %v889_v36  ;;  %v923_v44 = vcombine.low %v899_v3, %v905_v32  ;;  %v924_v45 = vcombine.high %v899_v3, %v905_v32  ;;  %v907_v46 = vcombine.low %v3180_v11, %v902_v33 }
 0x1c9   : > { %895 = vst.msk [vmem:[#allocation2 + $0x8] sm:$0xf] %vm892_vm2, %v890_v37  ;;  %896 = vst.msk [vmem:[#allocation2 + $0xc] sm:$0xf] %vm892_vm2, %v891_v38  ;;  %v908_v47 = vcombine.high %v3180_v11, %v902_v33  ;;  %v1199_v48 = vrot.slane %v1192_v39, %v3185_v34  ;;  %v1207_v49 = vrot.slane %v2349_v41, %v3185_v34 }
 0x1ca   : > { %v1215_v50 = vrot.slane %v1208_v42, %v3185_v34  ;;  %v1223_v51 = vrot.slane %v2350_v43, %v3185_v34  ;;  %v931_v52 = vrot.slane %v923_v44, %v3185_v34  ;;  %v938_v53 = vrot.slane %v924_v45, %v3185_v34 }
 0x1cb   : > { %v915_v54 = vrot.slane %v907_v46, %v3185_v34  ;;  %v922_v55 = vrot.slane %v908_v47, %v3185_v34  ;;  %v1224_v56 = vcombine.low %v1199_v48, %v1207_v49  ;;  %v1225_v12 = vcombine.high %v1199_v48, %v1207_v49 }
 0x1cc   : > { %v1240_v57 = vcombine.low %v1215_v50, %v1223_v51  ;;  %v1241_v19 = vcombine.high %v1215_v50, %v1223_v51 }
 0x1cd   : > { %v939_v58 = vcombine.low %v915_v54, %v931_v52  ;;  %v940_v11 = vcombine.high %v915_v54, %v931_v52  ;;  %v955_v59 = vcombine.low %v922_v55, %v938_v53  ;;  %v956_v60 = vcombine.high %v922_v55, %v938_v53 }
 0x1ce   : > { %v1232_v4 = vrot.slane %v1224_v56, %v3187_v40  ;;  %v1248_v5 = vrot.slane %v1240_v57, %v3187_v40  ;;  %v1239_v35 = vrot.slane %v1225_v12, %v3187_v40  ;;  %v1255_v36 = vrot.slane %v1241_v19, %v3187_v40 }
 0x1cf   : > { %v947_v61 = vrot.slane %v939_v58, %v3187_v40  ;;  %v954_v62 = vrot.slane %v940_v11, %v3187_v40  ;;  %v963_v63 = vrot.slane %v955_v59, %v3187_v40  ;;  %v970_v1 = vrot.slane %v956_v60, %v3187_v40  ;;  %v1264_v2 = vld [vmem:[#allocation2] sm:$0xf]  ;;  %v1265_v3 = vld [vmem:[#allocation2 + $0x4] sm:$0xf] }
 0x1d0   : > { %v1277_v13 = vsel %vm1272_vm3, %v1264_v2, 0  ;;  %v1323_v14 = vsel %vm1272_vm3, %v1265_v3, 0  ;;  %v1256_v20 = vcombine.low %v1232_v4, %v1248_v5  ;;  %v1257_v21 = vcombine.high %v1232_v4, %v1248_v5  ;;  %v1266_v30 = vld [vmem:[#allocation2 + $0x8] sm:$0xf]  ;;  %v1267_v31 = vld [vmem:[#allocation2 + $0xc] sm:$0xf] }
 0x1d1   : > { %v975_v6 = vcombine.low %v947_v61, %v954_v62  ;;  %v2344_v7 = vcombine.high %v947_v61, %v954_v62  ;;  %v991_v8 = vcombine.low %v963_v63, %v970_v1  ;;  %v2345_v10 = vcombine.high %v963_v63, %v970_v1  ;;  %2450 = vmatpush3.bf16.xpose.msra.mxu1 %v1277_v13 }
 0x1d2   : > { %2456 = vmatpush3.bf16.xpose.msra.mxu0 %v1323_v14  ;;  %2461 = vmatprep.subr.bf16.mxu1 %v2887_v0  ;;  %v1260_v32 = vpack.c.bf16 %v1256_v20, %v1256_v20  ;;  %v1261_v33 = vpack.c.bf16 %v1257_v21, %v1257_v21  ;;  %v1369_v42 = vsel %vm1272_vm3, %v1266_v30, 0  ;;  %v1415_v43 = vsel %vm1272_vm3, %v1267_v31, 0 }
 0x1d3   : > { %v982_v15 = vrot.slane %v975_v6, %v3185_v34  ;;  %v990_v16 = vrot.slane %v2344_v7, %v3185_v34  ;;  %v998_v17 = vrot.slane %v991_v8, %v3185_v34  ;;  %v1006_v18 = vrot.slane %v2345_v10, %v3185_v34  ;;  %2467 = vmatprep.subr.bf16.mxu0 %v2887_v0 }
 0x1d4   : > { %v1258_v48 = vcombine.low %v1239_v35, %v1255_v36  ;;  %v1259_v49 = vcombine.high %v1239_v35, %v1255_v36 }
 0x1d5   : > { %v1007_v22 = vcombine.low %v982_v15, %v990_v16  ;;  %v1008_v23 = vcombine.high %v982_v15, %v990_v16  ;;  %v1023_v24 = vcombine.low %v998_v17, %v1006_v18  ;;  %v1024_v25 = vcombine.high %v998_v17, %v1006_v18 }
 0x1d6   : > { %v1262_v50 = vpack.c.bf16 %v1258_v48, %v1258_v48  ;;  %v1263_v51 = vpack.c.bf16 %v1259_v49, %v1259_v49 }
 0x1d7   : > { %v1015_v26 = vrot.slane %v1007_v22, %v3187_v40  ;;  %v1022_v27 = vrot.slane %v1008_v23, %v3187_v40  ;;  %v1031_v28 = vrot.slane %v1023_v24, %v3187_v40  ;;  %v1038_v29 = vrot.slane %v1024_v25, %v3187_v40 }
 0x1d8   : > { %2452 = vmatmul.mubr.msk.bf16.vlgmr.msra.gmra.mxu1 %vm1272_vm3, %v1260_v32 }
 0x1d9   : > { %v1039_v37 = vcombine.low %v1015_v26, %v1031_v28  ;;  %v1040_v38 = vcombine.high %v1015_v26, %v1031_v28  ;;  %v1041_v39 = vcombine.low %v1022_v27, %v1038_v29  ;;  %v1042_v41 = vcombine.high %v1022_v27, %v1038_v29  ;;  %2458 = vmatmul.mubr.msk.bf16.vlgmr.msra.gmra.mxu0 %vm1272_vm3, %v1261_v33 }
 0x1da   : > { %2462 = vmatpush3.bf16.xpose.msra.mxu1 %v1369_v42  ;;  %2468 = vmatpush3.bf16.xpose.msra.mxu0 %v1415_v43 }
 0x1db   : > { %v1043_v44 = vpack.c.bf16 %v1039_v37, %v1039_v37  ;;  %v1044_v45 = vpack.c.bf16 %v1040_v38, %v1040_v38  ;;  %v1045_v46 = vpack.c.bf16 %v1041_v39, %v1041_v39  ;;  %v1046_v47 = vpack.c.bf16 %v1042_v41, %v1042_v41  ;;  %2463 = vmatprep.mubr.msk.bf16.mxu1 %vm2888_vm0, %v2887_v0 }
 0x1dc   : > { %2469 = vmatprep.mubr.msk.bf16.mxu0 %vm2888_vm0, %v2887_v0  ;;  %2473 = vmatprep.subr.bf16.mxu1 %v2887_v0 }
 0x1dd   : > { %1047 = vst.msk [vmem:[#allocation3] sm:$0xf] %vm892_vm2, %v1043_v44  ;;  %1048 = vst.msk [vmem:[#allocation3 + $0x4] sm:$0xf] %vm892_vm2, %v1044_v45  ;;  %2479 = vmatprep.subr.bf16.mxu0 %v2887_v0 }
 0x1de   : > { %1049 = vst.msk [vmem:[#allocation3 + $0x8] sm:$0xf] %vm892_vm2, %v1045_v46  ;;  %1050 = vst.msk [vmem:[#allocation3 + $0xc] sm:$0xf] %vm892_vm2, %v1046_v47 }
 0x1e1   : > { %2464 = vmatmul.mubr.msk.bf16.vlgmr.msra.gmra.mxu1 %vm1272_vm3, %v1262_v50  ;;  %2470 = vmatmul.mubr.msk.bf16.vlgmr.msra.gmra.mxu0 %vm1272_vm3, %v1263_v51 }
 0x1e2   : > { %2475 = vmatprep.mubr.msk.bf16.mxu1 %vm2888_vm0, %v2887_v0  ;;  %2481 = vmatprep.mubr.msk.bf16.mxu0 %vm2888_vm0, %v2887_v0 }
 0x1e4   : > { %v1268_v52 = vld [vmem:[#allocation3] sm:$0xf]  ;;  %v1269_v53 = vld [vmem:[#allocation3 + $0x4] sm:$0xf] }
 0x1e5   : > { %v1522_v54 = vsel %vm1520_vm4, %v1268_v52, 0  ;;  %v1568_v55 = vsel %vm1520_vm4, %v1269_v53, 0  ;;  %v1270_v27 = vld [vmem:[#allocation3 + $0x8] sm:$0xf]  ;;  %v1271_v31 = vld [vmem:[#allocation3 + $0xc] sm:$0xf] }
 0x1e6   : > { %2474 = vmatpush3.bf16.msra.mxu1 %v1522_v54  ;;  %2480 = vmatpush3.bf16.msra.mxu0 %v1568_v55  ;;  %v1614_v35 = vsel %vm1520_vm4, %v1270_v27, 0  ;;  %v1660_v36 = vsel %vm1520_vm4, %v1271_v31, 0 }
 0x1e7   : > { %2485 = vmatprep.subr.bf16.mxu1 %v2887_v0  ;;  %2491 = vmatprep.subr.bf16.mxu0 %v2887_v0 }
 0x298   : > { %v1313_v56 = vpop.f32.mrf.mxu1 }
 0x299   : > { %v1359_v57 = vpop.f32.mrf.mxu0  ;;  %v1457_v58 = vsel %vm1272_vm3, %v1313_v56, -inf }
 0x29a   : > { %1458 = vmax.xlane.f32.xlu1 %v1457_v58  ;;  %v2453_v11 = vpop.f32.mrf.mxu1  ;;  %v1460_v59 = vsel %vm1272_vm3, %v1359_v57, -inf }
 0x29b   : > { %1461 = vmax.xlane.f32.xlu0 %v1460_v59  ;;  %v2459_v60 = vpop.f32.mrf.mxu0 }
 0x29c   : > { %v1316_v61 = vpop.f32.mrf.mxu1 }
 0x29d   : > { %v1362_v62 = vpop.f32.mrf.mxu0 }
 0x29e   : > { %v2454_v63 = vpop.f32.mrf.mxu1 }
 0x29f   : > { %v2460_v1 = vpop.f32.mrf.mxu0 }
 0x2a1   : > { %v1405_v2 = vpop.f32.mrf.mxu1  ;;  %v1451_v3 = vpop.f32.mrf.mxu0 }
 0x2a2   : > { %v1463_v4 = vsel %vm1272_vm3, %v1405_v2, -inf  ;;  %v1466_v5 = vsel %vm1272_vm3, %v1451_v3, -inf }
 0x2a3   : > { %v2465_v6 = vpop.f32.mrf.mxu1  ;;  %1464 = vmax.xlane.f32.xlu0 %v1463_v4  ;;  %1467 = vmax.xlane.f32.xlu1 %v1466_v5  ;;  %v2471_v7 = vpop.f32.mrf.mxu0 }
 0x2a5   : > { %v1408_v8 = vpop.f32.mrf.mxu1  ;;  %v1454_v10 = vpop.f32.mrf.mxu0 }
 0x2a7   : > { %v2466_v12 = vpop.f32.mrf.mxu1  ;;  %v2472_v13 = vpop.f32.mrf.mxu0 }
 0x323   : > { %v1459_v14 = vpop.xlane.xlu1 %1458 }
 0x324   : > { %v1481_v15 = vsub.f32 %v1313_v56, %v1459_v14  ;;  %v1462_v16 = vpop.xlane.xlu0 %1461  ;;  %v1469_v44 = vsub.f32 -inf, %v1459_v14 }
 0x325   : > { %v1482_v17 = vsub.f32 %v1359_v57, %v1462_v16  ;;  %v1470_v46 = vsub.f32 -inf, %v1462_v16 }
 0x326   : > { %v1485_v18 = vmul.f32 1.442695, %v1481_v15  ;;  %v1473_v48 = vmul.f32 1.442695, %v1469_v44 }
 0x327   : > { %v1487_v19 = vmul.f32 1.442695, %v1482_v17  ;;  %v1475_v50 = vmul.f32 1.442695, %v1470_v46 }
 0x328   : > { %2651 = vpow2.f32 %v1485_v18 }
 0x329   : > { %2653 = vpow2.f32 %v1487_v19 }
 0x32c   : > { %v1465_v20 = vpop.xlane.xlu0 %1464  ;;  %v1468_v21 = vpop.xlane.xlu1 %1467 }
 0x32d   : > { %v1483_v22 = vsub.f32 %v1405_v2, %v1465_v20  ;;  %v1484_v23 = vsub.f32 %v1451_v3, %v1468_v21  ;;  %v1471_v45 = vsub.f32 -inf, %v1465_v20  ;;  %v1472_v47 = vsub.f32 -inf, %v1468_v21 }
 0x32f   : > { %v1489_v24 = vmul.f32 1.442695, %v1483_v22  ;;  %v1491_v25 = vmul.f32 1.442695, %v1484_v23  ;;  %v1477_v49 = vmul.f32 1.442695, %v1471_v45 }
 0x330   : > { %v1479_v51 = vmul.f32 1.442695, %v1472_v47 }
 0x331   : > { %2655 = vpow2.f32 %v1489_v24 }
 0x332   : > { %2657 = vpow2.f32 %v1491_v25 }
 0x333   : > { %2659 = vpow2.f32 %v1473_v48  ;;  %v2639_v48 = vld [vmem:[%s3424_s6 + $0x8] sm:$0xff]  }
 0x334   : > { %2661 = vpow2.f32 %v1477_v49 }
 0x335   : > { %v2652_v26 = vpop.eup %2651  ;;  %2663 = vpow2.f32 %v1475_v50 }
 0x336   : > { %v1497_v28 = vsel %vm1272_vm3, %v2652_v26, 0.0  ;;  %v1513_v29 = vpack.c.bf16 %v2652_v26, %v2652_v26  ;;  %v2654_v30 = vpop.eup %2653  ;;  %2665 = vpow2.f32 %v1479_v51 }
 0x337   : > { %1498 = vadd.xlane.f32.xlu0 %v1497_v28  ;;  %v1500_v32 = vsel %vm1272_vm3, %v2654_v30, 0.0  ;;  %v1514_v33 = vpack.c.bf16 %v2654_v30, %v2654_v30 }
 0x338   : > { %2476 = vmatmul.mubr.msk.bf16.vlgmr.msra.gmra.mxu1 %vm1272_vm3, %v1513_v29  ;;  %1501 = vadd.xlane.f32.xlu1 %v1500_v32 }
 0x339   : > { %2486 = vmatpush3.bf16.msra.mxu1 %v1614_v35  ;;  %2482 = vmatmul.mubr.msk.bf16.vlgmr.msra.gmra.mxu0 %vm1272_vm3, %v1514_v33 }
 0x33a   : > { %2487 = vmatprep.mubr.msk.bf16.mxu1 %vm2888_vm0, %v2887_v0  ;;  %2492 = vmatpush3.bf16.msra.mxu0 %v1660_v36 }
 0x33b   : > { %2493 = vmatprep.mubr.msk.bf16.mxu0 %vm2888_vm0, %v2887_v0  ;;  %2497 = vmatprep.subr.bf16.mxu1 %v2887_v0 }
 0x33c   : > { %2505 = vmatprep.subr.bf16.mxu0 %v2887_v0 }
 0x33e   : > { %v2656_v37 = vpop.eup %2655 }
 0x33f   : > { %v1503_v38 = vsel %vm1272_vm3, %v2656_v37, 0.0  ;;  %v1515_v39 = vpack.c.bf16 %v2656_v37, %v2656_v37  ;;  %v2658_v41 = vpop.eup %2657 }
 0x340   : > { %1504 = vadd.xlane.f32.xlu0 %v1503_v38  ;;  %v1506_v42 = vsel %vm1272_vm3, %v2658_v41, 0.0  ;;  %v1516_v43 = vpack.c.bf16 %v2658_v41, %v2658_v41  ;;  %v2660_v53 = vpop.eup %2659 }
 0x341   : > { %2488 = vmatmul.mubr.msk.bf16.vlgmr.msra.gmra.mxu1 %vm1272_vm3, %v1515_v39  ;;  %1507 = vadd.xlane.f32.xlu1 %v1506_v42  ;;  %v2662_v54 = vpop.eup %2661  ;;  %v1493_v58 = vmul.f32 0.0, %v2660_v53 }
 0x342   : > { %2501 = vmatprep.mubr.msk.bf16.mxu1 %vm2888_vm0, %v2887_v0  ;;  %2494 = vmatmul.mubr.msk.bf16.vlgmr.msra.gmra.mxu0 %vm1272_vm3, %v1516_v43  ;;  %v2664_v56 = vpop.eup %2663  ;;  %v1495_v59 = vmul.f32 0.0, %v2662_v54 }
 0x343   : > { %2509 = vmatprep.mubr.msk.bf16.mxu0 %vm2888_vm0, %v2887_v0  ;;  %v2666_v57 = vpop.eup %2665  ;;  %v1494_v61 = vmul.f32 0.0, %v2664_v56  ;;  %2498 = vmatpush3.bf16.msra.mxu1 %v2639_v48  ;;  %v2650_v48 = vld [vmem:[%s3427_s9] sm:$0xff]  }
 0x344   : > { %v1496_v1 = vmul.f32 0.0, %v2666_v57  ;;  %2499 = vmatprep.subr.bf16.mxu1 %v2887_v0  ;;  %v2640_v57 = vld [vmem:[%s3424_s6] sm:$0xff]  }
 0x347   : > { %2500 = vmatpush3.bf16.msra.mxu1 %v2640_v57  ;;  %v2370_v57 = vld [vmem:[%s3469_s26] ss:$0 sm:$0xff]  ;;  %s2897_s26 = smov [#allocation12]  }
 0x348   : > { %2513 = vmatprep.subr.bf16.mxu1 %v2887_v0  ;;  %s2791_s28 = sshll.u32 %s2897_s26, 4  ;;  %s2792_s28 = int_to_ptr.vmem [resolvable:$false] %s2791_s28 }
 0x3c0   : > { %v1499_v52 = vpop.xlane.xlu0 %1498 }
 0x3c1   : > { %v1502_v55 = vpop.xlane.xlu1 %1501  ;;  %v1509_v60 = vadd.f32 %v1499_v52, %v1493_v58 }
 0x3c2   : > { %v1510_v2 = vadd.f32 %v1502_v55, %v1494_v61 }
 0x3c3   : > { %2667 = vrcp.f32 %v1509_v60 }
 0x3c9   : > { %v1505_v11 = vpop.xlane.xlu0 %1504 }
 0x3ca   : > { %v1508_v62 = vpop.xlane.xlu1 %1507  ;;  %v1511_v63 = vadd.f32 %v1505_v11, %v1495_v59 }
 0x3cb   : > { %v1512_v3 = vadd.f32 %v1508_v62, %v1496_v1 }
 0x3cc   : > { %2669 = vrcp.f32 %v1511_v63 }
 0x3cd   : > { %2671 = vrcp.f32 %v1510_v2 }
 0x3ce   : > { %2673 = vrcp.f32 %v1512_v3 }
 0x3d0   : > { %v2668_v16 = vpop.eup %2667 }
 0x3d9   : > { %v2670_v19 = vpop.eup %2669 }
 0x3da   : > { %v2672_v22 = vpop.eup %2671 }
 0x3db   : > { %v2674_v26 = vpop.eup %2673 }
 0x3f8   : > { %v1558_v4 = vpop.f32.mrf.mxu1 }
 0x3f9   : > { %v1604_v5 = vpop.f32.mrf.mxu0  ;;  %v1702_v13 = vadd.f32 %v1558_v4, %v1493_v58 }
 0x3fa   : > { %v2477_v6 = vpop.f32.mrf.mxu1  ;;  %v1703_v17 = vadd.f32 %v1604_v5, %v1494_v61 }
 0x3fb   : > { %v2483_v7 = vpop.f32.mrf.mxu0  ;;  %v1710_v23 = vmul.f32 %v2668_v16, %v1702_v13 }
 0x3fc   : > { %v1561_v8 = vpop.f32.mrf.mxu1  ;;  %v1711_v29 = vmul.f32 %v2672_v22, %v1703_v17 }
 0x3fd   : > { %v1607_v10 = vpop.f32.mrf.mxu0 }
 0x3fe   : > { %v2478_v12 = vpop.f32.mrf.mxu1 }
 0x3ff   : > { %v2484_v14 = vpop.f32.mrf.mxu0 }
 0x401   : > { %v1650_v15 = vpop.f32.mrf.mxu1 }
 0x402   : > { %v1704_v18 = vadd.f32 %v1650_v15, %v1495_v59  ;;  %v1696_v20 = vpop.f32.mrf.mxu0 }
 0x403   : > { %v2489_v21 = vpop.f32.mrf.mxu1  ;;  %v1705_v25 = vadd.f32 %v1696_v20, %v1496_v1 }
 0x404   : > { %v1712_v24 = vmul.f32 %v2670_v19, %v1704_v18  ;;  %v2495_v27 = vpop.f32.mrf.mxu0 }
 0x405   : > { %v1653_v28 = vpop.f32.mrf.mxu1  ;;  %v1713_v32 = vmul.f32 %v2674_v26, %v1705_v25 }
 0x406   : > { %v1714_v30 = vcombine.low %v1710_v23, %v1712_v24  ;;  %v1715_v31 = vcombine.high %v1710_v23, %v1712_v24  ;;  %v1699_v33 = vpop.f32.mrf.mxu0  ;;  %v2641_v28 = vld [vmem:[#allocation9 + $0x8] sm:$0xff]  }
 0x407   : > { %v2490_v35 = vpop.f32.mrf.mxu1  ;;  %v1730_v38 = vcombine.low %v1711_v29, %v1713_v32  ;;  %v1731_v39 = vcombine.high %v1711_v29, %v1713_v32  ;;  %2506 = vmatpush3.bf16.msra.mxu0 %v2641_v28  ;;  %v2642_v29 = vld [vmem:[#allocation9] sm:$0xff]   ;;  %v2646_v32 = vld [vmem:[%s3427_s9 + $0x20] sm:$0xff]   ;;  %v2647_v33 = vld [vmem:[%s3427_s9 + $0x18] sm:$0xff]  }
 0x408   : > { %v1722_v36 = vrot.slane %v1714_v30, %v3185_v34  ;;  %v1729_v37 = vrot.slane %v1715_v31, %v3185_v34  ;;  %v2496_v41 = vpop.f32.mrf.mxu0  ;;  %2507 = vmatprep.subr.bf16.mxu0 %v2887_v0  ;;  %v2644_v30 = vld [vmem:[%s3427_s9 + $0x30] sm:$0xff]   ;;  %v2645_v31 = vld [vmem:[%s3427_s9 + $0x28] sm:$0xff]  }
 0x409   : > { %v1738_v42 = vrot.slane %v1730_v38, %v3185_v34  ;;  %v1745_v43 = vrot.slane %v1731_v39, %v3185_v34  ;;  %v2648_v35 = vld [vmem:[%s3427_s9 + $0x10] sm:$0xff]   ;;  %v2364_v41 = vld [vmem:[%s3429_s11] ss:$0 sm:$0xff] }
 0x40b   : > { %v1746_v44 = vcombine.low %v1722_v36, %v1738_v42  ;;  %v1747_v45 = vcombine.high %v1722_v36, %v1738_v42  ;;  %v1762_v46 = vcombine.low %v1729_v37, %v1745_v43  ;;  %v1763_v47 = vcombine.high %v1729_v37, %v1745_v43  ;;  %2508 = vmatpush3.bf16.msra.mxu0 %v2642_v29 }
 0x40d   : > { %v1754_v49 = vrot.slane %v1746_v44, %v3187_v40  ;;  %v1761_v50 = vrot.slane %v1747_v45, %v3187_v40  ;;  %v1770_v51 = vrot.slane %v1762_v46, %v3187_v40  ;;  %v1777_v52 = vrot.slane %v1763_v47, %v3187_v40  ;;  %v2649_v47 = vld [vmem:[%s3427_s9 + $0x8] sm:$0xff]  }
 0x40f   : > { %v1782_v53 = vcombine.low %v1754_v49, %v1761_v50  ;;  %v2359_v54 = vcombine.high %v1754_v49, %v1761_v50  ;;  %v1798_v55 = vcombine.low %v1770_v51, %v1777_v52  ;;  %v2360_v56 = vcombine.high %v1770_v51, %v1777_v52  ;;  %v2366_v49 = vld [vmem:[#allocation10] ss:$0 sm:$0xff] }
 0x411   : > { %v1789_v58 = vrot.slane %v1782_v53, %v3185_v34  ;;  %v1797_v11 = vrot.slane %v2359_v54, %v3185_v34  ;;  %v1805_v59 = vrot.slane %v1798_v55, %v3185_v34  ;;  %v1813_v60 = vrot.slane %v2360_v56, %v3185_v34 }
 0x413   : > { %v1815_v61 = vcombine.high %v1789_v58, %v1797_v11  ;;  %v1831_v62 = vcombine.high %v1805_v59, %v1813_v60  ;;  %v1814_v63 = vcombine.low %v1789_v58, %v1797_v11  ;;  %v1830_v1 = vcombine.low %v1805_v59, %v1813_v60 }
 0x415   : > { %v1829_v2 = vrot.slane %v1815_v61, %v3187_v40  ;;  %v1845_v3 = vrot.slane %v1831_v62, %v3187_v40  ;;  %v1822_v4 = vrot.slane %v1814_v63, %v3187_v40  ;;  %v1838_v5 = vrot.slane %v1830_v1, %v3187_v40 }
 0x417   : > { %v1848_v6 = vcombine.low %v1829_v2, %v1845_v3  ;;  %v1847_v7 = vcombine.high %v1822_v4, %v1838_v5  ;;  %v1849_v8 = vcombine.high %v1829_v2, %v1845_v3  ;;  %v1846_v10 = vcombine.low %v1822_v4, %v1838_v5 }
 0x419   : > { %1855 = vrot.lane.b32.xlu1 %v1848_v6, %s2894_s15  ;;  %1851 = vrot.lane.b32.xlu0 %v1847_v7, %s2895_s0  ;;  %s2382_s15 = sshll.u32 %s2871_s21, 7  ;;  %s608_s0 = scalar_lea.vmem [#allocation12], %s2334_s22 }
 0x41a   : > { %s2181_s14 = scalar_lea.hbm %s3472_s27, %s2382_s15  ;;  %s2793_s21 = scalar_lea.vmem %s2792_s28, 256 }
 0x41d   : > { %1859 = vrot.lane.b32.xlu1 %v1849_v8, %s2896_s29  ;;  %s3468_s29 = sld [smem:[#allocation27_spill]] }
 0x423   : > { %v2365_v43 = vld [vmem:[%s3468_s29] ss:$0 sm:$0xff]  ;;  %s2183_s29 = sshll.u32 %s608_s0, 4  ;;  %s2184_s29 = int_to_ptr.vmem [resolvable:$true] %s2183_s29 }
 0x424   : > { %s2787_s12 = scalar_lea.vmem %s2184_s29, 128  ;;  %p2794_p2 = scmp.lt.s32.totalorder %s2184_s29, %s2792_s28 }
 0x425   : > { %p2788_p5 = scmp.ne.s32.totalorder %s2184_s29, %s2787_s12  ;;  %p2795_p12 = scmp.lt.s32.totalorder %s2793_s21, %s2787_s12 }
 0x427   : > { %p2789_p3 = pnand %p2788_p5, %p3069_p0  ;;  %p2796_p7 = por %p2795_p12, %p2794_p2 }
 0x429   : > { %p2790_p1 = pneg %p2789_p3 }
 0x42b   : > { %p2797_p9 = pnand %p2796_p7, %p2790_p1 }
 0x48b   : > { %v1856_v34 = vpop.permute.xlu1 %1855  ;;  %v1852_v12 = vpop.permute.xlu0 %1851 }
 0x48c   : > { %v1862_v13 = vsel %vm1272_vm3, %v1846_v10, %v1852_v12  ;;  %v2379_v10 = vld [vmem:[%s3470_s17] ss:$0 sm:$0xff] }
 0x48d   : > { %v1864_v15 = vsel %vm1863_vm5, %v1862_v13, %v1856_v34  ;;  %v2380_v12 = vld [vmem:[%s3471_s16] ss:$0 sm:$0xff] }
 0x48f   : > { %v1860_v14 = vpop.permute.xlu1 %1859 }
 0x490   : > { %v1866_v16 = vsel %vm1865_vm6, %v1864_v15, %v1860_v14 }
 0x491   : > { %v1867_v40 = vpack.c.bf16 %v1866_v16, %v1866_v16 }
 0x493   : > { %2502 = vmatmul.mubr.msk.bf16.vlgmr.msra.gmra.mxu1 %vm638_vm1, %v1867_v40 }
 0x494   : > { %2529 = vmatprep.mubr.msk.bf16.mxu1 %vm2888_vm0, %v2887_v0 }
 0x553   : > { %v1921_v17 = vpop.f32.mrf.mxu1 }
 0x554   : > { %v1922_v18 = vadd.f32 %v1921_v17, %v3171_v9  ;;  %v2643_v9 = vld [vmem:[%s3427_s9 + $0x38] sm:$0xff]  }
 0x555   : > { %v2503_v19 = vpop.f32.mrf.mxu1  ;;  %2514 = vmatpush3.bf16.msra.mxu1 %v2643_v9 }
 0x556   : > { %v1927_v20 = vsel %vm638_vm1, %v1922_v18, 0.0  ;;  %2515 = vmatprep.subr.bf16.mxu1 %v2887_v0 }
 0x557   : > { %1928 = vadd.xlane.f32.xlu0 %v1927_v20  ;;  %v1924_v21 = vpop.f32.mrf.mxu1 }
 0x559   : > { %v2504_v22 = vpop.f32.mrf.mxu1  ;;  %2516 = vmatpush3.bf16.msra.mxu1 %v2644_v30 }
 0x55a   : > { %2517 = vmatprep.subr.bf16.mxu1 %v2887_v0 }
 0x55d   : > { %2518 = vmatpush3.bf16.msra.mxu1 %v2645_v31 }
 0x55e   : > { %2519 = vmatprep.subr.bf16.mxu1 %v2887_v0 }
 0x561   : > { %2520 = vmatpush3.bf16.msra.mxu1 %v2646_v32 }
 0x562   : > { %2521 = vmatprep.subr.bf16.mxu1 %v2887_v0 }
 0x565   : > { %2522 = vmatpush3.bf16.msra.mxu1 %v2647_v33 }
 0x566   : > { %2523 = vmatprep.subr.bf16.mxu1 %v2887_v0 }
 0x569   : > { %2524 = vmatpush3.bf16.msra.mxu1 %v2648_v35 }
 0x56a   : > { %2525 = vmatprep.subr.bf16.mxu1 %v2887_v0 }
 0x56d   : > { %2526 = vmatpush3.bf16.msra.mxu1 %v2649_v47 }
 0x56e   : > { %2527 = vmatprep.subr.bf16.mxu1 %v2887_v0 }
 0x571   : > { %2528 = vmatpush3.bf16.msra.mxu1 %v2650_v48 }
 0x5e0   : > { %v1929_v23 = vpop.xlane.xlu0 %1928 }
 0x5e1   : > { %v1931_v24 = vmul.f32 0.03125, %v1929_v23 }
 0x5e3   : > { %v1932_v25 = vsub.f32 %v1922_v18, %v1931_v24 }
 0x5e5   : > { %v1933_v26 = vmul.f32 %v1932_v25, %v1932_v25 }
 0x5e7   : > { %v1934_v27 = vsel %vm638_vm1, %v1933_v26, 0.0 }
 0x5e8   : > { %1935 = vadd.xlane.f32.xlu1 %v1934_v27 }
 0x671   : > { %v1936_v36 = vpop.xlane.xlu1 %1935 }
 0x672   : > { %v1937_v37 = vmul.f32 0.03125, %v1936_v36 }
 0x674   : > { %v1938_v38 = vadd.f32 1e-05, %v1937_v37 }
 0x676   : > { %2675 = vrsqrt.f32 %v1938_v38 }
 0x683   : > { %v2676_v39 = vpop.eup %2675 }
 0x684   : > { %v1940_v42 = vmul.f32 %v2676_v39, %v1932_v25 }
 0x686   : > { %v1948_v44 = vmul.f32 %v2364_v41, %v1940_v42 }
 0x688   : > { %v1956_v45 = vadd.f32 %v2365_v43, %v1948_v44 }
 0x68a   : > { %v1957_v46 = vpack.c.bf16 %v1956_v45, %v1956_v45 }
 0x68c   : > { %2510 = vmatmul.mubr.msk.bf16.vlgmr.msra.gmra.mxu0 %vm638_vm1, %v1957_v46 }
 0x74c   : > { %v2018_v50 = vpop.f32.mrf.mxu0 }
 0x74d   : > { %v2019_v51 = vadd.f32 %v2366_v49, %v2018_v50 }
 0x74e   : > { %v2511_v52 = vpop.f32.mrf.mxu0 }
 0x74f   : > { %v2024_v53 = vmax.f32 %v2019_v51, 0.0 }
 0x750   : > { %v2021_v54 = vpop.f32.mrf.mxu0 }
 0x751   : > { %v2025_v55 = vpack.c.bf16 %v2024_v53, %v2024_v53 }
 0x752   : > { %v2512_v56 = vpop.f32.mrf.mxu0 }
 0x753   : > { %2530 = vmatmul.mubr.bf16.vlgmr.msra.gmra.mxu1 %v2025_v55 }
 0x813   : > { %v2131_v58 = vpop.f32.mrf.mxu1 }
 0x814   : > { %v2132_v0 = vadd.f32 %v2370_v57, %v2131_v58 }
 0x815   : > { %v2531_v11 = vpop.f32.mrf.mxu1 }
 0x816   : > { %v2137_v59 = vadd.f32 %v2132_v0, %v1956_v45 }
 0x817   : > { %v2134_v60 = vpop.f32.mrf.mxu1 }
 0x818   : > { %v2138_v61 = vsel %vm638_vm1, %v2137_v59, 0.0 }
 0x819   : > { %2139 = vadd.xlane.f32.xlu0 %v2138_v61  ;;  %v2532_v62 = vpop.f32.mrf.mxu1 }
 0x8a2   : > { %v2140_v63 = vpop.xlane.xlu0 %2139 }
 0x8a3   : > { %v2141_v1 = vmul.f32 0.03125, %v2140_v63 }
 0x8a5   : > { %v2142_v2 = vsub.f32 %v2137_v59, %v2141_v1 }
 0x8a7   : > { %v2143_v3 = vmul.f32 %v2142_v2, %v2142_v2 }
 0x8a9   : > { %v2144_v4 = vsel %vm638_vm1, %v2143_v3, 0.0 }
 0x8aa   : > { %2145 = vadd.xlane.f32.xlu0 %v2144_v4 }
 0x933   : > { %v2146_v5 = vpop.xlane.xlu0 %2145 }
 0x934   : > { %v2147_v6 = vmul.f32 0.03125, %v2146_v5 }
 0x936   : > { %v2148_v7 = vadd.f32 1e-05, %v2147_v6 }
 0x938   : > { %2677 = vrsqrt.f32 %v2148_v7 }
 0x945   : > { %v2678_v8 = vpop.eup %2677 }
 0x946   : > { %v2150_v34 = vmul.f32 %v2678_v8, %v2142_v2 }
 0x948   : > { %v2158_v13 = vmul.f32 %v2379_v10, %v2150_v34 }
 0x94a   : > { %v2166_v14 = vadd.f32 %v2380_v12, %v2158_v13 }
 0x94c   : > { %2167 = vst.msk [vmem:[%s608_s0] sm:$0xff] %vm638_vm1, %v2166_v14 }
 0x94d   : > { %2800 = shalt.err (!%p2797_p9)
}
 0x94e   : > { %s2801_s22 = scalar_lea.hbm %s2181_s14, 128  ;;  %s2805_s17 = scalar_lea.hbm %s3472_s27, 256 }
 0x94f   : > { %p2802_p8 = scmp.ne.s32.totalorder %s2181_s14, %s2801_s22  ;;  %p2806_p13 = scmp.lt.s32.totalorder %s2181_s14, %s3472_s27 }
 0x950   : > { %p2807_p4 = scmp.lt.s32.totalorder %s2805_s17, %s2801_s22 }
 0x951   : > { %p2803_p11 = pnand %p2802_p8, %p3069_p0 }
 0x952   : > { %p2808_p5 = por %p2807_p4, %p2806_p13 }
 0x953   : > { %p2804_p10 = pneg %p2803_p11 }
 0x955   : > { %p2809_p3 = pnand %p2808_p5, %p2804_p10 }
 0x957   : > { %2812 = shalt.err (!%p2809_p3)
}
 0x958   : > { %2545 = dma.vmem_to_hbm [thread:$0]  (%p3069_p0), %s2184_s29, 128, %s2181_s14, %s2169_s1  }
 0x959 PF: > { %s3473_s16 = sld [smem:[#allocation18_spill]]  ;;  %p3475_p1 = scmp.ge.s32.totalorder %s2879_s23, 2 }
 0x95b   : > { %p2562_p2 = pnand %p3475_p1, %p3023_p6 }
 0x95d   : > { %p2563_p12 = pneg %p2562_p2 }
 0x95f   : > { %s2195_s0 = sand.u32 1, %s3473_s16  }
 0x960   : > { %s2196_s7 = scalar_lea.sflag [#allocation6], %s2195_s0 }
 0x961   : > { %2854 = dma.done.wait (%p2563_p12), %s2196_s7, 128  }
 0x962   : > { %2856 = vsyncadd (%p2563_p12), %s2196_s7, 4294967168  ;;  %s35_s23 = sadd.s32 1, %s2879_s23   ;;  %s3476_s21 = sld [smem:[#allocation19_spill]] }
 0x963   : > { %p32_p7 = scmp.ge.s32.totalorder %s35_s23, 4   ;;  %s3477_s22 = sld [smem:[#allocation21_spill]] }
 0x964   : > { %s3478_s18 = smov %s2863_s19  ;;  %s3479_s19 = smov %s2867_s20 }
 0x965   : > { %s3480_s20 = smov %s3078_s25  ;;  %34 = sbr.rel (!%p32_p7) target bundleno = 19 (0x13), region = 153 }
 0x96a   :  { %2201 = vsyncpa [#allocation5], 1 }
 0x96b   :  { %2203 = vsyncpa [#allocation5 + $0x1], 1 }
 0x96c   :  { %2204 = vsyncpa [#allocation8], 1 }
 0x96d   :  { %2206 = vsyncpa [#allocation8 + $0x1], 1 }
 0x96e   :  { %2207 = vsyncpa [#allocation11], 1 }
 0x96f   :  { %2208 = vsyncpa [#allocation6], 1 }
 0x970   :  { %2210 = vsyncpa [#allocation6 + $0x1], 1 }

</bundles_post_ra>
